<compile_context>
chip_gen: v7x
topology: tpu7x:2x2x1
jax: 0.10.0
libtpu: 0.0.40
codegen_flags: <defaults>
</compile_context>

<pallas_src>
import functools

import jax
import jax.numpy as jnp
from jax import lax
from jax.experimental import pallas as pl
from jax.experimental.pallas import tpu as pltpu


# ---------------------------------------------------------------------------
# Kernel: one batch's tokens (S, Din) -> affine + 2 post-LN encoder layers.
# ---------------------------------------------------------------------------
def _itrm_kernel(x_ref, w_aff_ref, b_aff_ref,
                 wq_ref, bq_ref, wk_ref, bk_ref, wv_ref, bv_ref,
                 wo_ref, bo_ref, ln1_g_ref, ln1_b_ref,
                 w1_ref, b1_ref, w2_ref, b2_ref,
                 ln2_g_ref, ln2_b_ref, out_ref, *, nhead):
    f32, bf16 = jnp.float32, jnp.bfloat16
    L, _, D, Dh = wq_ref.shape
    scale = 1.0 / float(Dh) ** 0.5

    def layer_norm(v, g, b):
        # one-pass: two independent reductions instead of two dependent ones
        mu = jnp.mean(v, axis=-1, keepdims=True)
        ms = jnp.mean(v * v, axis=-1, keepdims=True)
        var = ms - mu * mu
        return (v - mu) * lax.rsqrt(var + 1e-5) * g + b

    # affine_matrix: Linear(input_dim -> d_model) over this batch's S tokens.
    x = x_ref[0]                                                     # (S, Din) f32
    h = (jnp.dot(x.astype(bf16), w_aff_ref[...],
                 preferred_element_type=f32) + b_aff_ref[...])       # (S, D) f32

    for l in range(L):                         # static unroll: 2 encoder layers
        # ---------- multi-head self-attention (batch-local, no mask) ----------
        h_bf = h.astype(bf16)
        attn = None
        for hh in range(nhead):                # static unroll over heads
            q = jnp.dot(h_bf, wq_ref[l, hh], preferred_element_type=f32) + bq_ref[l, hh]
            k = jnp.dot(h_bf, wk_ref[l, hh], preferred_element_type=f32) + bk_ref[l, hh]
            v = jnp.dot(h_bf, wv_ref[l, hh], preferred_element_type=f32) + bv_ref[l, hh]
            s = lax.dot_general(q.astype(bf16), k.astype(bf16),
                                (((1,), (1,)), ((), ())),
                                preferred_element_type=f32) * scale   # (S, S) f32
            s = s - jnp.max(s, axis=-1, keepdims=True)
            p = jnp.exp(s)
            p = p * pl.reciprocal(jnp.sum(p, axis=-1, keepdims=True), approx=True)
            ctx = jnp.dot(p.astype(bf16), v.astype(bf16),
                          preferred_element_type=f32)                 # (S, Dh) f32
            # output projection folded into the head loop (no concat)
            part = jnp.dot(ctx.astype(bf16), wo_ref[l, hh],
                           preferred_element_type=f32)                # (S, D) f32
            attn = part if attn is None else attn + part
        attn = attn + bo_ref[l]
        h = layer_norm(h + attn, ln1_g_ref[l], ln1_b_ref[l])

        # ---------- feed-forward: Linear -> ReLU -> Linear, residual + LN ------
        ff = jnp.dot(h.astype(bf16), w1_ref[l], preferred_element_type=f32) + b1_ref[l]
        ff = jnp.maximum(ff, 0.0)
        ff = jnp.dot(ff.astype(bf16), w2_ref[l], preferred_element_type=f32) + b2_ref[l]
        h = layer_norm(h + ff, ln2_g_ref[l], ln2_b_ref[l])
        # TODO(synk): attention/FFN dropout (p=0.1) is train-only; inference identity here.

    out_ref[0] = h


def _forward_pallas(feature, p, *, nhead):
    """feature: (S, B, input_dim) -> (S, B, d_model)."""
    S, B, Din = feature.shape
    D = p["w_aff"].shape[1]
    L = p["wq"].shape[0]
    F = p["w1"].shape[2]

    # Batch-major rows so attention is a clean per-batch (S,S) block.
    x = jnp.transpose(feature, (1, 0, 2))                            # (B, S, Din)

    args = (x, p["w_aff"], p["b_aff"],
            p["wq"], p["bq"], p["wk"], p["bk"], p["wv"], p["bv"],
            p["wo"], p["bo"], p["ln1_g"], p["ln1_b"],
            p["w1"], p["b1"], p["w2"], p["b2"],
            p["ln2_g"], p["ln2_b"])

    def full_spec(a):                         # whole-array block, constant index
        nd = a.ndim
        return pl.BlockSpec(a.shape, lambda b, _nd=nd: (0,) * _nd)

    in_specs = [pl.BlockSpec((1, S, Din), lambda b: (b, 0, 0))]
    in_specs += [full_spec(a) for a in args[1:]]
    out_spec = pl.BlockSpec((1, S, D), lambda b: (b, 0, 0))

    # Cost estimate + VMEM sizing from the actual footprint (not the whole VMEM).
    param_bytes = sum(int(a.size) * a.dtype.itemsize for a in args[1:])
    io_bytes = int(x.size) * x.dtype.itemsize + B * S * D * 4
    bytes_accessed = param_bytes + io_bytes
    flops = 2 * B * S * (Din * D + L * (4 * D * D + 2 * S * D + 2 * D * F))
    transcendentals = B * L * nhead * S * (S + 1) + 2 * B * L * S
    cost = pl.CostEstimate(flops=flops, transcendentals=transcendentals,
                           bytes_accessed=bytes_accessed)
    vmem_limit = int(min(48 * 2 ** 20, 6 * bytes_accessed + 8 * 2 ** 20))

    out = pl.pallas_call(
        functools.partial(_itrm_kernel, nhead=nhead),
        out_shape=jax.ShapeDtypeStruct((B, S, D), jnp.float32),
        grid_spec=pltpu.PrefetchScalarGridSpec(
            num_scalar_prefetch=0,
            grid=(B,),
            in_specs=in_specs,
            out_specs=out_spec),
        compiler_params=pltpu.CompilerParams(
            dimension_semantics=("parallel",),
            vmem_limit_bytes=vmem_limit),
        cost_estimate=cost,
    )(*args)
    return jnp.transpose(out, (1, 0, 2))                             # (S, B, D)


# ---------------------------------------------------------------------------
# Deterministic parameter init. Matmul weights stored bf16, pre-transposed
# (in, out); q/k/v/o stored per head; biases / LN params in f32.
# ---------------------------------------------------------------------------
def init_params(key, input_dim, d_model, dim_feedforward, num_layers, nhead):
    D, F, L, H = d_model, dim_feedforward, num_layers, nhead
    Dh = D // H
    bf16, f32 = jnp.bfloat16, jnp.float32

    def uni(k, shape, fan_in, dtype):
        bound = 1.0 / float(fan_in) ** 0.5
        return jax.random.uniform(k, shape, jnp.float32, -bound, bound).astype(dtype)

    ks = jax.random.split(key, 14)
    return dict(
        w_aff=uni(ks[0], (input_dim, D), input_dim, bf16),
        b_aff=uni(ks[1], (1, D), input_dim, f32),
        wq=uni(ks[2], (L, H, D, Dh), D, bf16),
        bq=uni(ks[3], (L, H, 1, Dh), D, f32),
        wk=uni(ks[4], (L, H, D, Dh), D, bf16),
        bk=uni(ks[5], (L, H, 1, Dh), D, f32),
        wv=uni(ks[6], (L, H, D, Dh), D, bf16),
        bv=uni(ks[7], (L, H, 1, Dh), D, f32),
        wo=uni(ks[8], (L, H, Dh, D), D, bf16),
        bo=uni(ks[9], (L, 1, D), D, f32),
        ln1_g=jnp.ones((L, 1, D), f32),
        ln1_b=jnp.zeros((L, 1, D), f32),
        w1=uni(ks[10], (L, D, F), D, bf16),
        b1=uni(ks[11], (L, 1, F), D, f32),
        w2=uni(ks[12], (L, F, D), F, bf16),
        b2=uni(ks[13], (L, 1, D), F, f32),
        ln2_g=jnp.ones((L, 1, D), f32),
        ln2_b=jnp.zeros((L, 1, D), f32),
    )


class InternalTemporalRelationModulePallas:
    """Pallas port of cmbs.InternalTemporalRelationModule (inference semantics)."""

    def __init__(self, key, input_dim, d_model, dim_feedforward=2048,
                 num_layers=2, nhead=4):
        assert d_model % nhead == 0
        self.nhead = nhead
        self.params = init_params(key, input_dim, d_model, dim_feedforward,
                                  num_layers, nhead)

    def __call__(self, feature):
        return _forward_pallas(feature, self.params, nhead=self.nhead)


# ---------------------------------------------------------------------------
# Pure-JAX f32 reference (same math on the same weights) for correctness check.
# ---------------------------------------------------------------------------
def _reference_forward(feature, params, *, nhead):
    f32 = jnp.float32
    w = {k: v.astype(f32) for k, v in params.items()}
    L, H, _, Dh = w["wq"].shape
    scale = 1.0 / float(Dh) ** 0.5

    def ln(v, g, b):
        mu = v.mean(-1, keepdims=True)
        var = ((v - mu) ** 2).mean(-1, keepdims=True)
        return (v - mu) / jnp.sqrt(var + 1e-5) * g + b

    x = jnp.transpose(feature, (1, 0, 2))                 # (B, S, Din)
    h = x @ w["w_aff"] + w["b_aff"]                       # (B, S, D)
    for l in range(L):
        attn = jnp.zeros_like(h)
        for hh in range(H):
            q = h @ w["wq"][l, hh] + w["bq"][l, hh]
            k = h @ w["wk"][l, hh] + w["bk"][l, hh]
            v = h @ w["wv"][l, hh] + w["bv"][l, hh]
            s = jnp.einsum('bsd,btd->bst', q, k) * scale
            p_ = jax.nn.softmax(s, axis=-1)
            ctx = jnp.einsum('bst,btd->bsd', p_, v)
            attn = attn + ctx @ w["wo"][l, hh]
        attn = attn + w["bo"][l]
        h = ln(h + attn, w["ln1_g"][l], w["ln1_b"][l])
        f = jnp.maximum(h @ w["w1"][l] + w["b1"][l], 0.0)
        f = f @ w["w2"][l] + w["b2"][l]
        h = ln(h + f, w["ln2_g"][l], w["ln2_b"][l])
    return jnp.transpose(h, (1, 0, 2))                    # (S, B, D)


if __name__ == "__main__":
    S, B = 8, 2                       # seq-first layout: (seq, batch, dim)
    input_dim, d_model = 128, 256
    dim_feedforward = 512             # small demo size (PyTorch default is 2048)
    num_layers, nhead = 2, 4

    key = jax.random.PRNGKey(0)
    k_feat, k_param = jax.random.split(key)
    feature = jax.random.normal(k_feat, (S, B, input_dim), jnp.float32)

    module = InternalTemporalRelationModulePallas(
        k_param, input_dim, d_model, dim_feedforward, num_layers, nhead)

    out = jax.block_until_ready(module(feature))
    assert out.shape == (S, B, d_model)
    assert bool(jnp.isfinite(out).all())

    ref = jax.block_until_ready(_reference_forward(feature, module.params, nhead=nhead))
    err = float(jnp.max(jnp.abs(out - ref)))
    # bf16 matmul operands (f32 accumulation) + approx softmax reciprocal vs f32 reference
    assert err < 5e-2, f"max abs error vs reference: {err}"

    print("KERNEL_OK")
</pallas_src>

<mosaic_0001>
module attributes {stable_mosaic.version = 11 : i64} {
  func.func @_itrm_kernel(%arg0: i32, %arg1: memref<1x8x128xf32, #tpu.memory_space<vmem>>, %arg2: memref<128x256xbf16, #tpu.memory_space<vmem>>, %arg3: memref<1x256xf32, #tpu.memory_space<vmem>>, %arg4: memref<2x4x256x64xbf16, #tpu.memory_space<vmem>>, %arg5: memref<2x4x1x64xf32, #tpu.memory_space<vmem>>, %arg6: memref<2x4x256x64xbf16, #tpu.memory_space<vmem>>, %arg7: memref<2x4x1x64xf32, #tpu.memory_space<vmem>>, %arg8: memref<2x4x256x64xbf16, #tpu.memory_space<vmem>>, %arg9: memref<2x4x1x64xf32, #tpu.memory_space<vmem>>, %arg10: memref<2x4x64x256xbf16, #tpu.memory_space<vmem>>, %arg11: memref<2x1x256xf32, #tpu.memory_space<vmem>>, %arg12: memref<2x1x256xf32, #tpu.memory_space<vmem>>, %arg13: memref<2x1x256xf32, #tpu.memory_space<vmem>>, %arg14: memref<2x256x512xbf16, #tpu.memory_space<vmem>>, %arg15: memref<2x1x512xf32, #tpu.memory_space<vmem>>, %arg16: memref<2x512x256xbf16, #tpu.memory_space<vmem>>, %arg17: memref<2x1x256xf32, #tpu.memory_space<vmem>>, %arg18: memref<2x1x256xf32, #tpu.memory_space<vmem>>, %arg19: memref<2x1x256xf32, #tpu.memory_space<vmem>>, %arg20: memref<1x8x256xf32, #tpu.memory_space<vmem>>) attributes {dimension_semantics = [#tpu.dimension_semantics<parallel>], iteration_bounds = array<i64: 2>, scalar_prefetch = 0 : i64, scratch_operands = 0 : i64, tpu.core_type = #tpu.core_type<tc>, window_params = [{transform_indices = @transform_0, window_bounds = array<i64: 1, 8, 128>}, {pipeline_mode = #tpu.pipeline_mode<synchronous>, transform_indices = @transform_1, window_bounds = array<i64: 128, 256>}, {pipeline_mode = #tpu.pipeline_mode<synchronous>, transform_indices = @transform_2, window_bounds = array<i64: 1, 256>}, {pipeline_mode = #tpu.pipeline_mode<synchronous>, transform_indices = @transform_3, window_bounds = array<i64: 2, 4, 256, 64>}, {pipeline_mode = #tpu.pipeline_mode<synchronous>, transform_indices = @transform_4, window_bounds = array<i64: 2, 4, 1, 64>}, {pipeline_mode = #tpu.pipeline_mode<synchronous>, transform_indices = @transform_5, window_bounds = array<i64: 2, 4, 256, 64>}, {pipeline_mode = #tpu.pipeline_mode<synchronous>, transform_indices = @transform_6, window_bounds = array<i64: 2, 4, 1, 64>}, {pipeline_mode = #tpu.pipeline_mode<synchronous>, transform_indices = @transform_7, window_bounds = array<i64: 2, 4, 256, 64>}, {pipeline_mode = #tpu.pipeline_mode<synchronous>, transform_indices = @transform_8, window_bounds = array<i64: 2, 4, 1, 64>}, {pipeline_mode = #tpu.pipeline_mode<synchronous>, transform_indices = @transform_9, window_bounds = array<i64: 2, 4, 64, 256>}, {pipeline_mode = #tpu.pipeline_mode<synchronous>, transform_indices = @transform_10, window_bounds = array<i64: 2, 1, 256>}, {pipeline_mode = #tpu.pipeline_mode<synchronous>, transform_indices = @transform_11, window_bounds = array<i64: 2, 1, 256>}, {pipeline_mode = #tpu.pipeline_mode<synchronous>, transform_indices = @transform_12, window_bounds = array<i64: 2, 1, 256>}, {pipeline_mode = #tpu.pipeline_mode<synchronous>, transform_indices = @transform_13, window_bounds = array<i64: 2, 256, 512>}, {pipeline_mode = #tpu.pipeline_mode<synchronous>, transform_indices = @transform_14, window_bounds = array<i64: 2, 1, 512>}, {pipeline_mode = #tpu.pipeline_mode<synchronous>, transform_indices = @transform_15, window_bounds = array<i64: 2, 512, 256>}, {pipeline_mode = #tpu.pipeline_mode<synchronous>, transform_indices = @transform_16, window_bounds = array<i64: 2, 1, 256>}, {pipeline_mode = #tpu.pipeline_mode<synchronous>, transform_indices = @transform_17, window_bounds = array<i64: 2, 1, 256>}, {pipeline_mode = #tpu.pipeline_mode<synchronous>, transform_indices = @transform_18, window_bounds = array<i64: 2, 1, 256>}, {transform_indices = @transform_19, window_bounds = array<i64: 1, 8, 256>}]} {
    %c0 = arith.constant 0 : index
    %c0_0 = arith.constant 0 : index
    %c0_1 = arith.constant 0 : index
    %0 = vector.load %arg1[%c0, %c0_0, %c0_1] : memref<1x8x128xf32, #tpu.memory_space<vmem>>, vector<1x8x128xf32>
    %1 = vector.shape_cast %0 : vector<1x8x128xf32> to vector<8x128xf32>
    %2 = arith.truncf %1 : vector<8x128xf32> to vector<8x128xbf16>
    %c0_2 = arith.constant 0 : index
    %c0_3 = arith.constant 0 : index
    %3 = vector.load %arg2[%c0_2, %c0_3] : memref<128x256xbf16, #tpu.memory_space<vmem>>, vector<128x256xbf16>
    %cst = arith.constant dense<0.000000e+00> : vector<8x256xf32>
    %4 = tpu.matmul %2, %3, %cst {dimension_numbers = #tpu.dot_dimension_numbers<[1], [0], [0], [1], [0, 0, 1, 1], [], []>} : vector<8x128xbf16>, vector<128x256xbf16>, vector<8x256xf32> -> vector<8x256xf32>
    %c0_4 = arith.constant 0 : index
    %c0_5 = arith.constant 0 : index
    %5 = vector.load %arg3[%c0_4, %c0_5] : memref<1x256xf32, #tpu.memory_space<vmem>>, vector<1x256xf32>
    %6 = vector.broadcast %5 : vector<1x256xf32> to vector<8x256xf32>
    %7 = arith.addf %4, %6 : vector<8x256xf32>
    %8 = arith.truncf %7 : vector<8x256xf32> to vector<8x256xbf16>
    %c0_6 = arith.constant 0 : index
    %c0_7 = arith.constant 0 : index
    %c0_8 = arith.constant 0 : index
    %c0_9 = arith.constant 0 : index
    %9 = vector.load %arg4[%c0_6, %c0_7, %c0_8, %c0_9] : memref<2x4x256x64xbf16, #tpu.memory_space<vmem>>, vector<1x1x256x64xbf16>
    %10 = vector.shape_cast %9 : vector<1x1x256x64xbf16> to vector<256x64xbf16>
    %cst_10 = arith.constant dense<0.000000e+00> : vector<8x64xf32>
    %11 = tpu.matmul %8, %10, %cst_10 {dimension_numbers = #tpu.dot_dimension_numbers<[1], [0], [0], [1], [0, 0, 1, 1], [], []>} : vector<8x256xbf16>, vector<256x64xbf16>, vector<8x64xf32> -> vector<8x64xf32>
    %c0_11 = arith.constant 0 : index
    %c0_12 = arith.constant 0 : index
    %c0_13 = arith.constant 0 : index
    %c0_14 = arith.constant 0 : index
    %12 = vector.load %arg5[%c0_11, %c0_12, %c0_13, %c0_14] : memref<2x4x1x64xf32, #tpu.memory_space<vmem>>, vector<1x1x1x64xf32>
    %13 = vector.shape_cast %12 : vector<1x1x1x64xf32> to vector<1x64xf32>
    %14 = vector.broadcast %13 : vector<1x64xf32> to vector<8x64xf32>
    %15 = arith.addf %11, %14 : vector<8x64xf32>
    %c0_15 = arith.constant 0 : index
    %c0_16 = arith.constant 0 : index
    %c0_17 = arith.constant 0 : index
    %c0_18 = arith.constant 0 : index
    %16 = vector.load %arg6[%c0_15, %c0_16, %c0_17, %c0_18] : memref<2x4x256x64xbf16, #tpu.memory_space<vmem>>, vector<1x1x256x64xbf16>
    %17 = vector.shape_cast %16 : vector<1x1x256x64xbf16> to vector<256x64xbf16>
    %cst_19 = arith.constant dense<0.000000e+00> : vector<8x64xf32>
    %18 = tpu.matmul %8, %17, %cst_19 {dimension_numbers = #tpu.dot_dimension_numbers<[1], [0], [0], [1], [0, 0, 1, 1], [], []>} : vector<8x256xbf16>, vector<256x64xbf16>, vector<8x64xf32> -> vector<8x64xf32>
    %c0_20 = arith.constant 0 : index
    %c0_21 = arith.constant 0 : index
    %c0_22 = arith.constant 0 : index
    %c0_23 = arith.constant 0 : index
    %19 = vector.load %arg7[%c0_20, %c0_21, %c0_22, %c0_23] : memref<2x4x1x64xf32, #tpu.memory_space<vmem>>, vector<1x1x1x64xf32>
    %20 = vector.shape_cast %19 : vector<1x1x1x64xf32> to vector<1x64xf32>
    %21 = vector.broadcast %20 : vector<1x64xf32> to vector<8x64xf32>
    %22 = arith.addf %18, %21 : vector<8x64xf32>
    %c0_24 = arith.constant 0 : index
    %c0_25 = arith.constant 0 : index
    %c0_26 = arith.constant 0 : index
    %c0_27 = arith.constant 0 : index
    %23 = vector.load %arg8[%c0_24, %c0_25, %c0_26, %c0_27] : memref<2x4x256x64xbf16, #tpu.memory_space<vmem>>, vector<1x1x256x64xbf16>
    %24 = vector.shape_cast %23 : vector<1x1x256x64xbf16> to vector<256x64xbf16>
    %cst_28 = arith.constant dense<0.000000e+00> : vector<8x64xf32>
    %25 = tpu.matmul %8, %24, %cst_28 {dimension_numbers = #tpu.dot_dimension_numbers<[1], [0], [0], [1], [0, 0, 1, 1], [], []>} : vector<8x256xbf16>, vector<256x64xbf16>, vector<8x64xf32> -> vector<8x64xf32>
    %c0_29 = arith.constant 0 : index
    %c0_30 = arith.constant 0 : index
    %c0_31 = arith.constant 0 : index
    %c0_32 = arith.constant 0 : index
    %26 = vector.load %arg9[%c0_29, %c0_30, %c0_31, %c0_32] : memref<2x4x1x64xf32, #tpu.memory_space<vmem>>, vector<1x1x1x64xf32>
    %27 = vector.shape_cast %26 : vector<1x1x1x64xf32> to vector<1x64xf32>
    %28 = vector.broadcast %27 : vector<1x64xf32> to vector<8x64xf32>
    %29 = arith.addf %25, %28 : vector<8x64xf32>
    %30 = arith.truncf %15 : vector<8x64xf32> to vector<8x64xbf16>
    %31 = arith.truncf %22 : vector<8x64xf32> to vector<8x64xbf16>
    %cst_33 = arith.constant dense<0.000000e+00> : vector<8x8xf32>
    %32 = tpu.matmul %30, %31, %cst_33 {dimension_numbers = #tpu.dot_dimension_numbers<[1], [1], [0], [0], [0, 0, 1, 0], [], []>} : vector<8x64xbf16>, vector<8x64xbf16>, vector<8x8xf32> -> vector<8x8xf32>
    %cst_34 = arith.constant 1.250000e-01 : f32
    %33 = vector.broadcast %cst_34 : f32 to vector<8x8xf32>
    %34 = arith.mulf %32, %33 : vector<8x8xf32>
    %cst_35 = arith.constant dense<0xFF800000> : vector<8xf32>
    %35 = vector.multi_reduction <maximumf>, %34, %cst_35 [1] : vector<8x8xf32> to vector<8xf32>
    %36 = vector.shape_cast %35 : vector<8xf32> to vector<8x1xf32>
    %37 = vector.broadcast %36 : vector<8x1xf32> to vector<8x8xf32>
    %38 = arith.subf %34, %37 : vector<8x8xf32>
    %39 = math.exp %38 : vector<8x8xf32>
    %cst_36 = arith.constant dense<0.000000e+00> : vector<8xf32>
    %40 = vector.multi_reduction <add>, %39, %cst_36 [1] : vector<8x8xf32> to vector<8xf32>
    %41 = vector.shape_cast %40 : vector<8xf32> to vector<8x1xf32>
    %42 = tpu.reciprocal %41 {approx = true} : vector<8x1xf32> -> vector<8x1xf32>
    %43 = vector.broadcast %42 : vector<8x1xf32> to vector<8x8xf32>
    %44 = arith.mulf %39, %43 : vector<8x8xf32>
    %45 = arith.truncf %44 : vector<8x8xf32> to vector<8x8xbf16>
    %46 = arith.truncf %29 : vector<8x64xf32> to vector<8x64xbf16>
    %cst_37 = arith.constant dense<0.000000e+00> : vector<8x64xf32>
    %47 = tpu.matmul %45, %46, %cst_37 {dimension_numbers = #tpu.dot_dimension_numbers<[1], [0], [0], [1], [0, 0, 1, 1], [], []>} : vector<8x8xbf16>, vector<8x64xbf16>, vector<8x64xf32> -> vector<8x64xf32>
    %48 = arith.truncf %47 : vector<8x64xf32> to vector<8x64xbf16>
    %c0_38 = arith.constant 0 : index
    %c0_39 = arith.constant 0 : index
    %c0_40 = arith.constant 0 : index
    %c0_41 = arith.constant 0 : index
    %49 = vector.load %arg10[%c0_38, %c0_39, %c0_40, %c0_41] : memref<2x4x64x256xbf16, #tpu.memory_space<vmem>>, vector<1x1x64x256xbf16>
    %50 = vector.shape_cast %49 : vector<1x1x64x256xbf16> to vector<64x256xbf16>
    %cst_42 = arith.constant dense<0.000000e+00> : vector<8x256xf32>
    %51 = tpu.matmul %48, %50, %cst_42 {dimension_numbers = #tpu.dot_dimension_numbers<[1], [0], [0], [1], [0, 0, 1, 1], [], []>} : vector<8x64xbf16>, vector<64x256xbf16>, vector<8x256xf32> -> vector<8x256xf32>
    %c0_43 = arith.constant 0 : index
    %c1 = arith.constant 1 : index
    %c0_44 = arith.constant 0 : index
    %c0_45 = arith.constant 0 : index
    %52 = vector.load %arg4[%c0_43, %c1, %c0_44, %c0_45] : memref<2x4x256x64xbf16, #tpu.memory_space<vmem>>, vector<1x1x256x64xbf16>
    %53 = vector.shape_cast %52 : vector<1x1x256x64xbf16> to vector<256x64xbf16>
    %cst_46 = arith.constant dense<0.000000e+00> : vector<8x64xf32>
    %54 = tpu.matmul %8, %53, %cst_46 {dimension_numbers = #tpu.dot_dimension_numbers<[1], [0], [0], [1], [0, 0, 1, 1], [], []>} : vector<8x256xbf16>, vector<256x64xbf16>, vector<8x64xf32> -> vector<8x64xf32>
    %c0_47 = arith.constant 0 : index
    %c1_48 = arith.constant 1 : index
    %c0_49 = arith.constant 0 : index
    %c0_50 = arith.constant 0 : index
    %55 = vector.load %arg5[%c0_47, %c1_48, %c0_49, %c0_50] : memref<2x4x1x64xf32, #tpu.memory_space<vmem>>, vector<1x1x1x64xf32>
    %56 = vector.shape_cast %55 : vector<1x1x1x64xf32> to vector<1x64xf32>
    %57 = vector.broadcast %56 : vector<1x64xf32> to vector<8x64xf32>
    %58 = arith.addf %54, %57 : vector<8x64xf32>
    %c0_51 = arith.constant 0 : index
    %c1_52 = arith.constant 1 : index
    %c0_53 = arith.constant 0 : index
    %c0_54 = arith.constant 0 : index
    %59 = vector.load %arg6[%c0_51, %c1_52, %c0_53, %c0_54] : memref<2x4x256x64xbf16, #tpu.memory_space<vmem>>, vector<1x1x256x64xbf16>
    %60 = vector.shape_cast %59 : vector<1x1x256x64xbf16> to vector<256x64xbf16>
    %cst_55 = arith.constant dense<0.000000e+00> : vector<8x64xf32>
    %61 = tpu.matmul %8, %60, %cst_55 {dimension_numbers = #tpu.dot_dimension_numbers<[1], [0], [0], [1], [0, 0, 1, 1], [], []>} : vector<8x256xbf16>, vector<256x64xbf16>, vector<8x64xf32> -> vector<8x64xf32>
    %c0_56 = arith.constant 0 : index
    %c1_57 = arith.constant 1 : index
    %c0_58 = arith.constant 0 : index
    %c0_59 = arith.constant 0 : index
    %62 = vector.load %arg7[%c0_56, %c1_57, %c0_58, %c0_59] : memref<2x4x1x64xf32, #tpu.memory_space<vmem>>, vector<1x1x1x64xf32>
    %63 = vector.shape_cast %62 : vector<1x1x1x64xf32> to vector<1x64xf32>
    %64 = vector.broadcast %63 : vector<1x64xf32> to vector<8x64xf32>
    %65 = arith.addf %61, %64 : vector<8x64xf32>
    %c0_60 = arith.constant 0 : index
    %c1_61 = arith.constant 1 : index
    %c0_62 = arith.constant 0 : index
    %c0_63 = arith.constant 0 : index
    %66 = vector.load %arg8[%c0_60, %c1_61, %c0_62, %c0_63] : memref<2x4x256x64xbf16, #tpu.memory_space<vmem>>, vector<1x1x256x64xbf16>
    %67 = vector.shape_cast %66 : vector<1x1x256x64xbf16> to vector<256x64xbf16>
    %cst_64 = arith.constant dense<0.000000e+00> : vector<8x64xf32>
    %68 = tpu.matmul %8, %67, %cst_64 {dimension_numbers = #tpu.dot_dimension_numbers<[1], [0], [0], [1], [0, 0, 1, 1], [], []>} : vector<8x256xbf16>, vector<256x64xbf16>, vector<8x64xf32> -> vector<8x64xf32>
    %c0_65 = arith.constant 0 : index
    %c1_66 = arith.constant 1 : index
    %c0_67 = arith.constant 0 : index
    %c0_68 = arith.constant 0 : index
    %69 = vector.load %arg9[%c0_65, %c1_66, %c0_67, %c0_68] : memref<2x4x1x64xf32, #tpu.memory_space<vmem>>, vector<1x1x1x64xf32>
    %70 = vector.shape_cast %69 : vector<1x1x1x64xf32> to vector<1x64xf32>
    %71 = vector.broadcast %70 : vector<1x64xf32> to vector<8x64xf32>
    %72 = arith.addf %68, %71 : vector<8x64xf32>
    %73 = arith.truncf %58 : vector<8x64xf32> to vector<8x64xbf16>
    %74 = arith.truncf %65 : vector<8x64xf32> to vector<8x64xbf16>
    %cst_69 = arith.constant dense<0.000000e+00> : vector<8x8xf32>
    %75 = tpu.matmul %73, %74, %cst_69 {dimension_numbers = #tpu.dot_dimension_numbers<[1], [1], [0], [0], [0, 0, 1, 0], [], []>} : vector<8x64xbf16>, vector<8x64xbf16>, vector<8x8xf32> -> vector<8x8xf32>
    %cst_70 = arith.constant 1.250000e-01 : f32
    %76 = vector.broadcast %cst_70 : f32 to vector<8x8xf32>
    %77 = arith.mulf %75, %76 : vector<8x8xf32>
    %cst_71 = arith.constant dense<0xFF800000> : vector<8xf32>
    %78 = vector.multi_reduction <maximumf>, %77, %cst_71 [1] : vector<8x8xf32> to vector<8xf32>
    %79 = vector.shape_cast %78 : vector<8xf32> to vector<8x1xf32>
    %80 = vector.broadcast %79 : vector<8x1xf32> to vector<8x8xf32>
    %81 = arith.subf %77, %80 : vector<8x8xf32>
    %82 = math.exp %81 : vector<8x8xf32>
    %cst_72 = arith.constant dense<0.000000e+00> : vector<8xf32>
    %83 = vector.multi_reduction <add>, %82, %cst_72 [1] : vector<8x8xf32> to vector<8xf32>
    %84 = vector.shape_cast %83 : vector<8xf32> to vector<8x1xf32>
    %85 = tpu.reciprocal %84 {approx = true} : vector<8x1xf32> -> vector<8x1xf32>
    %86 = vector.broadcast %85 : vector<8x1xf32> to vector<8x8xf32>
    %87 = arith.mulf %82, %86 : vector<8x8xf32>
    %88 = arith.truncf %87 : vector<8x8xf32> to vector<8x8xbf16>
    %89 = arith.truncf %72 : vector<8x64xf32> to vector<8x64xbf16>
    %cst_73 = arith.constant dense<0.000000e+00> : vector<8x64xf32>
    %90 = tpu.matmul %88, %89, %cst_73 {dimension_numbers = #tpu.dot_dimension_numbers<[1], [0], [0], [1], [0, 0, 1, 1], [], []>} : vector<8x8xbf16>, vector<8x64xbf16>, vector<8x64xf32> -> vector<8x64xf32>
    %91 = arith.truncf %90 : vector<8x64xf32> to vector<8x64xbf16>
    %c0_74 = arith.constant 0 : index
    %c1_75 = arith.constant 1 : index
    %c0_76 = arith.constant 0 : index
    %c0_77 = arith.constant 0 : index
    %92 = vector.load %arg10[%c0_74, %c1_75, %c0_76, %c0_77] : memref<2x4x64x256xbf16, #tpu.memory_space<vmem>>, vector<1x1x64x256xbf16>
    %93 = vector.shape_cast %92 : vector<1x1x64x256xbf16> to vector<64x256xbf16>
    %cst_78 = arith.constant dense<0.000000e+00> : vector<8x256xf32>
    %94 = tpu.matmul %91, %93, %cst_78 {dimension_numbers = #tpu.dot_dimension_numbers<[1], [0], [0], [1], [0, 0, 1, 1], [], []>} : vector<8x64xbf16>, vector<64x256xbf16>, vector<8x256xf32> -> vector<8x256xf32>
    %95 = arith.addf %51, %94 : vector<8x256xf32>
    %c0_79 = arith.constant 0 : index
    %c2 = arith.constant 2 : index
    %c0_80 = arith.constant 0 : index
    %c0_81 = arith.constant 0 : index
    %96 = vector.load %arg4[%c0_79, %c2, %c0_80, %c0_81] : memref<2x4x256x64xbf16, #tpu.memory_space<vmem>>, vector<1x1x256x64xbf16>
    %97 = vector.shape_cast %96 : vector<1x1x256x64xbf16> to vector<256x64xbf16>
    %cst_82 = arith.constant dense<0.000000e+00> : vector<8x64xf32>
    %98 = tpu.matmul %8, %97, %cst_82 {dimension_numbers = #tpu.dot_dimension_numbers<[1], [0], [0], [1], [0, 0, 1, 1], [], []>} : vector<8x256xbf16>, vector<256x64xbf16>, vector<8x64xf32> -> vector<8x64xf32>
    %c0_83 = arith.constant 0 : index
    %c2_84 = arith.constant 2 : index
    %c0_85 = arith.constant 0 : index
    %c0_86 = arith.constant 0 : index
    %99 = vector.load %arg5[%c0_83, %c2_84, %c0_85, %c0_86] : memref<2x4x1x64xf32, #tpu.memory_space<vmem>>, vector<1x1x1x64xf32>
    %100 = vector.shape_cast %99 : vector<1x1x1x64xf32> to vector<1x64xf32>
    %101 = vector.broadcast %100 : vector<1x64xf32> to vector<8x64xf32>
    %102 = arith.addf %98, %101 : vector<8x64xf32>
    %c0_87 = arith.constant 0 : index
    %c2_88 = arith.constant 2 : index
    %c0_89 = arith.constant 0 : index
    %c0_90 = arith.constant 0 : index
    %103 = vector.load %arg6[%c0_87, %c2_88, %c0_89, %c0_90] : memref<2x4x256x64xbf16, #tpu.memory_space<vmem>>, vector<1x1x256x64xbf16>
    %104 = vector.shape_cast %103 : vector<1x1x256x64xbf16> to vector<256x64xbf16>
    %cst_91 = arith.constant dense<0.000000e+00> : vector<8x64xf32>
    %105 = tpu.matmul %8, %104, %cst_91 {dimension_numbers = #tpu.dot_dimension_numbers<[1], [0], [0], [1], [0, 0, 1, 1], [], []>} : vector<8x256xbf16>, vector<256x64xbf16>, vector<8x64xf32> -> vector<8x64xf32>
    %c0_92 = arith.constant 0 : index
    %c2_93 = arith.constant 2 : index
    %c0_94 = arith.constant 0 : index
    %c0_95 = arith.constant 0 : index
    %106 = vector.load %arg7[%c0_92, %c2_93, %c0_94, %c0_95] : memref<2x4x1x64xf32, #tpu.memory_space<vmem>>, vector<1x1x1x64xf32>
    %107 = vector.shape_cast %106 : vector<1x1x1x64xf32> to vector<1x64xf32>
    %108 = vector.broadcast %107 : vector<1x64xf32> to vector<8x64xf32>
    %109 = arith.addf %105, %108 : vector<8x64xf32>
    %c0_96 = arith.constant 0 : index
    %c2_97 = arith.constant 2 : index
    %c0_98 = arith.constant 0 : index
    %c0_99 = arith.constant 0 : index
    %110 = vector.load %arg8[%c0_96, %c2_97, %c0_98, %c0_99] : memref<2x4x256x64xbf16, #tpu.memory_space<vmem>>, vector<1x1x256x64xbf16>
    %111 = vector.shape_cast %110 : vector<1x1x256x64xbf16> to vector<256x64xbf16>
    %cst_100 = arith.constant dense<0.000000e+00> : vector<8x64xf32>
    %112 = tpu.matmul %8, %111, %cst_100 {dimension_numbers = #tpu.dot_dimension_numbers<[1], [0], [0], [1], [0, 0, 1, 1], [], []>} : vector<8x256xbf16>, vector<256x64xbf16>, vector<8x64xf32> -> vector<8x64xf32>
    %c0_101 = arith.constant 0 : index
    %c2_102 = arith.constant 2 : index
    %c0_103 = arith.constant 0 : index
    %c0_104 = arith.constant 0 : index
    %113 = vector.load %arg9[%c0_101, %c2_102, %c0_103, %c0_104] : memref<2x4x1x64xf32, #tpu.memory_space<vmem>>, vector<1x1x1x64xf32>
    %114 = vector.shape_cast %113 : vector<1x1x1x64xf32> to vector<1x64xf32>
    %115 = vector.broadcast %114 : vector<1x64xf32> to vector<8x64xf32>
    %116 = arith.addf %112, %115 : vector<8x64xf32>
    %117 = arith.truncf %102 : vector<8x64xf32> to vector<8x64xbf16>
    %118 = arith.truncf %109 : vector<8x64xf32> to vector<8x64xbf16>
    %cst_105 = arith.constant dense<0.000000e+00> : vector<8x8xf32>
    %119 = tpu.matmul %117, %118, %cst_105 {dimension_numbers = #tpu.dot_dimension_numbers<[1], [1], [0], [0], [0, 0, 1, 0], [], []>} : vector<8x64xbf16>, vector<8x64xbf16>, vector<8x8xf32> -> vector<8x8xf32>
    %cst_106 = arith.constant 1.250000e-01 : f32
    %120 = vector.broadcast %cst_106 : f32 to vector<8x8xf32>
    %121 = arith.mulf %119, %120 : vector<8x8xf32>
    %cst_107 = arith.constant dense<0xFF800000> : vector<8xf32>
    %122 = vector.multi_reduction <maximumf>, %121, %cst_107 [1] : vector<8x8xf32> to vector<8xf32>
    %123 = vector.shape_cast %122 : vector<8xf32> to vector<8x1xf32>
    %124 = vector.broadcast %123 : vector<8x1xf32> to vector<8x8xf32>
    %125 = arith.subf %121, %124 : vector<8x8xf32>
    %126 = math.exp %125 : vector<8x8xf32>
    %cst_108 = arith.constant dense<0.000000e+00> : vector<8xf32>
    %127 = vector.multi_reduction <add>, %126, %cst_108 [1] : vector<8x8xf32> to vector<8xf32>
    %128 = vector.shape_cast %127 : vector<8xf32> to vector<8x1xf32>
    %129 = tpu.reciprocal %128 {approx = true} : vector<8x1xf32> -> vector<8x1xf32>
    %130 = vector.broadcast %129 : vector<8x1xf32> to vector<8x8xf32>
    %131 = arith.mulf %126, %130 : vector<8x8xf32>
    %132 = arith.truncf %131 : vector<8x8xf32> to vector<8x8xbf16>
    %133 = arith.truncf %116 : vector<8x64xf32> to vector<8x64xbf16>
    %cst_109 = arith.constant dense<0.000000e+00> : vector<8x64xf32>
    %134 = tpu.matmul %132, %133, %cst_109 {dimension_numbers = #tpu.dot_dimension_numbers<[1], [0], [0], [1], [0, 0, 1, 1], [], []>} : vector<8x8xbf16>, vector<8x64xbf16>, vector<8x64xf32> -> vector<8x64xf32>
    %135 = arith.truncf %134 : vector<8x64xf32> to vector<8x64xbf16>
    %c0_110 = arith.constant 0 : index
    %c2_111 = arith.constant 2 : index
    %c0_112 = arith.constant 0 : index
    %c0_113 = arith.constant 0 : index
    %136 = vector.load %arg10[%c0_110, %c2_111, %c0_112, %c0_113] : memref<2x4x64x256xbf16, #tpu.memory_space<vmem>>, vector<1x1x64x256xbf16>
    %137 = vector.shape_cast %136 : vector<1x1x64x256xbf16> to vector<64x256xbf16>
    %cst_114 = arith.constant dense<0.000000e+00> : vector<8x256xf32>
    %138 = tpu.matmul %135, %137, %cst_114 {dimension_numbers = #tpu.dot_dimension_numbers<[1], [0], [0], [1], [0, 0, 1, 1], [], []>} : vector<8x64xbf16>, vector<64x256xbf16>, vector<8x256xf32> -> vector<8x256xf32>
    %139 = arith.addf %95, %138 : vector<8x256xf32>
    %c0_115 = arith.constant 0 : index
    %c3 = arith.constant 3 : index
    %c0_116 = arith.constant 0 : index
    %c0_117 = arith.constant 0 : index
    %140 = vector.load %arg4[%c0_115, %c3, %c0_116, %c0_117] : memref<2x4x256x64xbf16, #tpu.memory_space<vmem>>, vector<1x1x256x64xbf16>
    %141 = vector.shape_cast %140 : vector<1x1x256x64xbf16> to vector<256x64xbf16>
    %cst_118 = arith.constant dense<0.000000e+00> : vector<8x64xf32>
    %142 = tpu.matmul %8, %141, %cst_118 {dimension_numbers = #tpu.dot_dimension_numbers<[1], [0], [0], [1], [0, 0, 1, 1], [], []>} : vector<8x256xbf16>, vector<256x64xbf16>, vector<8x64xf32> -> vector<8x64xf32>
    %c0_119 = arith.constant 0 : index
    %c3_120 = arith.constant 3 : index
    %c0_121 = arith.constant 0 : index
    %c0_122 = arith.constant 0 : index
    %143 = vector.load %arg5[%c0_119, %c3_120, %c0_121, %c0_122] : memref<2x4x1x64xf32, #tpu.memory_space<vmem>>, vector<1x1x1x64xf32>
    %144 = vector.shape_cast %143 : vector<1x1x1x64xf32> to vector<1x64xf32>
    %145 = vector.broadcast %144 : vector<1x64xf32> to vector<8x64xf32>
    %146 = arith.addf %142, %145 : vector<8x64xf32>
    %c0_123 = arith.constant 0 : index
    %c3_124 = arith.constant 3 : index
    %c0_125 = arith.constant 0 : index
    %c0_126 = arith.constant 0 : index
    %147 = vector.load %arg6[%c0_123, %c3_124, %c0_125, %c0_126] : memref<2x4x256x64xbf16, #tpu.memory_space<vmem>>, vector<1x1x256x64xbf16>
    %148 = vector.shape_cast %147 : vector<1x1x256x64xbf16> to vector<256x64xbf16>
    %cst_127 = arith.constant dense<0.000000e+00> : vector<8x64xf32>
    %149 = tpu.matmul %8, %148, %cst_127 {dimension_numbers = #tpu.dot_dimension_numbers<[1], [0], [0], [1], [0, 0, 1, 1], [], []>} : vector<8x256xbf16>, vector<256x64xbf16>, vector<8x64xf32> -> vector<8x64xf32>
    %c0_128 = arith.constant 0 : index
    %c3_129 = arith.constant 3 : index
    %c0_130 = arith.constant 0 : index
    %c0_131 = arith.constant 0 : index
    %150 = vector.load %arg7[%c0_128, %c3_129, %c0_130, %c0_131] : memref<2x4x1x64xf32, #tpu.memory_space<vmem>>, vector<1x1x1x64xf32>
    %151 = vector.shape_cast %150 : vector<1x1x1x64xf32> to vector<1x64xf32>
    %152 = vector.broadcast %151 : vector<1x64xf32> to vector<8x64xf32>
    %153 = arith.addf %149, %152 : vector<8x64xf32>
    %c0_132 = arith.constant 0 : index
    %c3_133 = arith.constant 3 : index
    %c0_134 = arith.constant 0 : index
    %c0_135 = arith.constant 0 : index
    %154 = vector.load %arg8[%c0_132, %c3_133, %c0_134, %c0_135] : memref<2x4x256x64xbf16, #tpu.memory_space<vmem>>, vector<1x1x256x64xbf16>
    %155 = vector.shape_cast %154 : vector<1x1x256x64xbf16> to vector<256x64xbf16>
    %cst_136 = arith.constant dense<0.000000e+00> : vector<8x64xf32>
    %156 = tpu.matmul %8, %155, %cst_136 {dimension_numbers = #tpu.dot_dimension_numbers<[1], [0], [0], [1], [0, 0, 1, 1], [], []>} : vector<8x256xbf16>, vector<256x64xbf16>, vector<8x64xf32> -> vector<8x64xf32>
    %c0_137 = arith.constant 0 : index
    %c3_138 = arith.constant 3 : index
    %c0_139 = arith.constant 0 : index
    %c0_140 = arith.constant 0 : index
    %157 = vector.load %arg9[%c0_137, %c3_138, %c0_139, %c0_140] : memref<2x4x1x64xf32, #tpu.memory_space<vmem>>, vector<1x1x1x64xf32>
    %158 = vector.shape_cast %157 : vector<1x1x1x64xf32> to vector<1x64xf32>
    %159 = vector.broadcast %158 : vector<1x64xf32> to vector<8x64xf32>
    %160 = arith.addf %156, %159 : vector<8x64xf32>
    %161 = arith.truncf %146 : vector<8x64xf32> to vector<8x64xbf16>
    %162 = arith.truncf %153 : vector<8x64xf32> to vector<8x64xbf16>
    %cst_141 = arith.constant dense<0.000000e+00> : vector<8x8xf32>
    %163 = tpu.matmul %161, %162, %cst_141 {dimension_numbers = #tpu.dot_dimension_numbers<[1], [1], [0], [0], [0, 0, 1, 0], [], []>} : vector<8x64xbf16>, vector<8x64xbf16>, vector<8x8xf32> -> vector<8x8xf32>
    %cst_142 = arith.constant 1.250000e-01 : f32
    %164 = vector.broadcast %cst_142 : f32 to vector<8x8xf32>
    %165 = arith.mulf %163, %164 : vector<8x8xf32>
    %cst_143 = arith.constant dense<0xFF800000> : vector<8xf32>
    %166 = vector.multi_reduction <maximumf>, %165, %cst_143 [1] : vector<8x8xf32> to vector<8xf32>
    %167 = vector.shape_cast %166 : vector<8xf32> to vector<8x1xf32>
    %168 = vector.broadcast %167 : vector<8x1xf32> to vector<8x8xf32>
    %169 = arith.subf %165, %168 : vector<8x8xf32>
    %170 = math.exp %169 : vector<8x8xf32>
    %cst_144 = arith.constant dense<0.000000e+00> : vector<8xf32>
    %171 = vector.multi_reduction <add>, %170, %cst_144 [1] : vector<8x8xf32> to vector<8xf32>
    %172 = vector.shape_cast %171 : vector<8xf32> to vector<8x1xf32>
    %173 = tpu.reciprocal %172 {approx = true} : vector<8x1xf32> -> vector<8x1xf32>
    %174 = vector.broadcast %173 : vector<8x1xf32> to vector<8x8xf32>
    %175 = arith.mulf %170, %174 : vector<8x8xf32>
    %176 = arith.truncf %175 : vector<8x8xf32> to vector<8x8xbf16>
    %177 = arith.truncf %160 : vector<8x64xf32> to vector<8x64xbf16>
    %cst_145 = arith.constant dense<0.000000e+00> : vector<8x64xf32>
    %178 = tpu.matmul %176, %177, %cst_145 {dimension_numbers = #tpu.dot_dimension_numbers<[1], [0], [0], [1], [0, 0, 1, 1], [], []>} : vector<8x8xbf16>, vector<8x64xbf16>, vector<8x64xf32> -> vector<8x64xf32>
    %179 = arith.truncf %178 : vector<8x64xf32> to vector<8x64xbf16>
    %c0_146 = arith.constant 0 : index
    %c3_147 = arith.constant 3 : index
    %c0_148 = arith.constant 0 : index
    %c0_149 = arith.constant 0 : index
    %180 = vector.load %arg10[%c0_146, %c3_147, %c0_148, %c0_149] : memref<2x4x64x256xbf16, #tpu.memory_space<vmem>>, vector<1x1x64x256xbf16>
    %181 = vector.shape_cast %180 : vector<1x1x64x256xbf16> to vector<64x256xbf16>
    %cst_150 = arith.constant dense<0.000000e+00> : vector<8x256xf32>
    %182 = tpu.matmul %179, %181, %cst_150 {dimension_numbers = #tpu.dot_dimension_numbers<[1], [0], [0], [1], [0, 0, 1, 1], [], []>} : vector<8x64xbf16>, vector<64x256xbf16>, vector<8x256xf32> -> vector<8x256xf32>
    %183 = arith.addf %139, %182 : vector<8x256xf32>
    %c0_151 = arith.constant 0 : index
    %c0_152 = arith.constant 0 : index
    %c0_153 = arith.constant 0 : index
    %184 = vector.load %arg11[%c0_151, %c0_152, %c0_153] : memref<2x1x256xf32, #tpu.memory_space<vmem>>, vector<1x1x256xf32>
    %185 = vector.shape_cast %184 : vector<1x1x256xf32> to vector<1x256xf32>
    %186 = vector.broadcast %185 : vector<1x256xf32> to vector<8x256xf32>
    %187 = arith.addf %183, %186 : vector<8x256xf32>
    %188 = arith.addf %7, %187 : vector<8x256xf32>
    %c0_154 = arith.constant 0 : index
    %c0_155 = arith.constant 0 : index
    %c0_156 = arith.constant 0 : index
    %189 = vector.load %arg12[%c0_154, %c0_155, %c0_156] : memref<2x1x256xf32, #tpu.memory_space<vmem>>, vector<1x1x256xf32>
    %190 = vector.shape_cast %189 : vector<1x1x256xf32> to vector<1x256xf32>
    %c0_157 = arith.constant 0 : index
    %c0_158 = arith.constant 0 : index
    %c0_159 = arith.constant 0 : index
    %191 = vector.load %arg13[%c0_157, %c0_158, %c0_159] : memref<2x1x256xf32, #tpu.memory_space<vmem>>, vector<1x1x256xf32>
    %192 = vector.shape_cast %191 : vector<1x1x256xf32> to vector<1x256xf32>
    %cst_160 = arith.constant dense<0.000000e+00> : vector<8xf32>
    %193 = vector.multi_reduction <add>, %188, %cst_160 [1] : vector<8x256xf32> to vector<8xf32>
    %194 = vector.shape_cast %193 : vector<8xf32> to vector<8x1xf32>
    %cst_161 = arith.constant 2.560000e+02 : f32
    %195 = vector.broadcast %cst_161 : f32 to vector<8x1xf32>
    %196 = arith.divf %194, %195 : vector<8x1xf32>
    %197 = arith.mulf %188, %188 : vector<8x256xf32>
    %cst_162 = arith.constant dense<0.000000e+00> : vector<8xf32>
    %198 = vector.multi_reduction <add>, %197, %cst_162 [1] : vector<8x256xf32> to vector<8xf32>
    %199 = vector.shape_cast %198 : vector<8xf32> to vector<8x1xf32>
    %cst_163 = arith.constant 2.560000e+02 : f32
    %200 = vector.broadcast %cst_163 : f32 to vector<8x1xf32>
    %201 = arith.divf %199, %200 : vector<8x1xf32>
    %202 = arith.mulf %196, %196 : vector<8x1xf32>
    %203 = arith.subf %201, %202 : vector<8x1xf32>
    %204 = vector.broadcast %196 : vector<8x1xf32> to vector<8x256xf32>
    %205 = arith.subf %188, %204 : vector<8x256xf32>
    %cst_164 = arith.constant 9.99999974E-6 : f32
    %206 = vector.broadcast %cst_164 : f32 to vector<8x1xf32>
    %207 = arith.addf %203, %206 : vector<8x1xf32>
    %208 = math.rsqrt %207 : vector<8x1xf32>
    %209 = vector.broadcast %208 : vector<8x1xf32> to vector<8x256xf32>
    %210 = arith.mulf %205, %209 : vector<8x256xf32>
    %211 = vector.broadcast %190 : vector<1x256xf32> to vector<8x256xf32>
    %212 = arith.mulf %210, %211 : vector<8x256xf32>
    %213 = vector.broadcast %192 : vector<1x256xf32> to vector<8x256xf32>
    %214 = arith.addf %212, %213 : vector<8x256xf32>
    %215 = arith.truncf %214 : vector<8x256xf32> to vector<8x256xbf16>
    %c0_165 = arith.constant 0 : index
    %c0_166 = arith.constant 0 : index
    %c0_167 = arith.constant 0 : index
    %216 = vector.load %arg14[%c0_165, %c0_166, %c0_167] : memref<2x256x512xbf16, #tpu.memory_space<vmem>>, vector<1x256x512xbf16>
    %217 = vector.shape_cast %216 : vector<1x256x512xbf16> to vector<256x512xbf16>
    %cst_168 = arith.constant dense<0.000000e+00> : vector<8x512xf32>
    %218 = tpu.matmul %215, %217, %cst_168 {dimension_numbers = #tpu.dot_dimension_numbers<[1], [0], [0], [1], [0, 0, 1, 1], [], []>} : vector<8x256xbf16>, vector<256x512xbf16>, vector<8x512xf32> -> vector<8x512xf32>
    %c0_169 = arith.constant 0 : index
    %c0_170 = arith.constant 0 : index
    %c0_171 = arith.constant 0 : index
    %219 = vector.load %arg15[%c0_169, %c0_170, %c0_171] : memref<2x1x512xf32, #tpu.memory_space<vmem>>, vector<1x1x512xf32>
    %220 = vector.shape_cast %219 : vector<1x1x512xf32> to vector<1x512xf32>
    %221 = vector.broadcast %220 : vector<1x512xf32> to vector<8x512xf32>
    %222 = arith.addf %218, %221 : vector<8x512xf32>
    %cst_172 = arith.constant 0.000000e+00 : f32
    %223 = vector.broadcast %cst_172 : f32 to vector<8x512xf32>
    %224 = arith.maximumf %222, %223 : vector<8x512xf32>
    %225 = arith.truncf %224 : vector<8x512xf32> to vector<8x512xbf16>
    %c0_173 = arith.constant 0 : index
    %c0_174 = arith.constant 0 : index
    %c0_175 = arith.constant 0 : index
    %226 = vector.load %arg16[%c0_173, %c0_174, %c0_175] : memref<2x512x256xbf16, #tpu.memory_space<vmem>>, vector<1x512x256xbf16>
    %227 = vector.shape_cast %226 : vector<1x512x256xbf16> to vector<512x256xbf16>
    %cst_176 = arith.constant dense<0.000000e+00> : vector<8x256xf32>
    %228 = tpu.matmul %225, %227, %cst_176 {dimension_numbers = #tpu.dot_dimension_numbers<[1], [0], [0], [1], [0, 0, 1, 1], [], []>} : vector<8x512xbf16>, vector<512x256xbf16>, vector<8x256xf32> -> vector<8x256xf32>
    %c0_177 = arith.constant 0 : index
    %c0_178 = arith.constant 0 : index
    %c0_179 = arith.constant 0 : index
    %229 = vector.load %arg17[%c0_177, %c0_178, %c0_179] : memref<2x1x256xf32, #tpu.memory_space<vmem>>, vector<1x1x256xf32>
    %230 = vector.shape_cast %229 : vector<1x1x256xf32> to vector<1x256xf32>
    %231 = vector.broadcast %230 : vector<1x256xf32> to vector<8x256xf32>
    %232 = arith.addf %228, %231 : vector<8x256xf32>
    %233 = arith.addf %214, %232 : vector<8x256xf32>
    %c0_180 = arith.constant 0 : index
    %c0_181 = arith.constant 0 : index
    %c0_182 = arith.constant 0 : index
    %234 = vector.load %arg18[%c0_180, %c0_181, %c0_182] : memref<2x1x256xf32, #tpu.memory_space<vmem>>, vector<1x1x256xf32>
    %235 = vector.shape_cast %234 : vector<1x1x256xf32> to vector<1x256xf32>
    %c0_183 = arith.constant 0 : index
    %c0_184 = arith.constant 0 : index
    %c0_185 = arith.constant 0 : index
    %236 = vector.load %arg19[%c0_183, %c0_184, %c0_185] : memref<2x1x256xf32, #tpu.memory_space<vmem>>, vector<1x1x256xf32>
    %237 = vector.shape_cast %236 : vector<1x1x256xf32> to vector<1x256xf32>
    %cst_186 = arith.constant dense<0.000000e+00> : vector<8xf32>
    %238 = vector.multi_reduction <add>, %233, %cst_186 [1] : vector<8x256xf32> to vector<8xf32>
    %239 = vector.shape_cast %238 : vector<8xf32> to vector<8x1xf32>
    %cst_187 = arith.constant 2.560000e+02 : f32
    %240 = vector.broadcast %cst_187 : f32 to vector<8x1xf32>
    %241 = arith.divf %239, %240 : vector<8x1xf32>
    %242 = arith.mulf %233, %233 : vector<8x256xf32>
    %cst_188 = arith.constant dense<0.000000e+00> : vector<8xf32>
    %243 = vector.multi_reduction <add>, %242, %cst_188 [1] : vector<8x256xf32> to vector<8xf32>
    %244 = vector.shape_cast %243 : vector<8xf32> to vector<8x1xf32>
    %cst_189 = arith.constant 2.560000e+02 : f32
    %245 = vector.broadcast %cst_189 : f32 to vector<8x1xf32>
    %246 = arith.divf %244, %245 : vector<8x1xf32>
    %247 = arith.mulf %241, %241 : vector<8x1xf32>
    %248 = arith.subf %246, %247 : vector<8x1xf32>
    %249 = vector.broadcast %241 : vector<8x1xf32> to vector<8x256xf32>
    %250 = arith.subf %233, %249 : vector<8x256xf32>
    %cst_190 = arith.constant 9.99999974E-6 : f32
    %251 = vector.broadcast %cst_190 : f32 to vector<8x1xf32>
    %252 = arith.addf %248, %251 : vector<8x1xf32>
    %253 = math.rsqrt %252 : vector<8x1xf32>
    %254 = vector.broadcast %253 : vector<8x1xf32> to vector<8x256xf32>
    %255 = arith.mulf %250, %254 : vector<8x256xf32>
    %256 = vector.broadcast %235 : vector<1x256xf32> to vector<8x256xf32>
    %257 = arith.mulf %255, %256 : vector<8x256xf32>
    %258 = vector.broadcast %237 : vector<1x256xf32> to vector<8x256xf32>
    %259 = arith.addf %257, %258 : vector<8x256xf32>
    %260 = arith.truncf %259 : vector<8x256xf32> to vector<8x256xbf16>
    %c1_191 = arith.constant 1 : index
    %c0_192 = arith.constant 0 : index
    %c0_193 = arith.constant 0 : index
    %c0_194 = arith.constant 0 : index
    %261 = vector.load %arg4[%c1_191, %c0_192, %c0_193, %c0_194] : memref<2x4x256x64xbf16, #tpu.memory_space<vmem>>, vector<1x1x256x64xbf16>
    %262 = vector.shape_cast %261 : vector<1x1x256x64xbf16> to vector<256x64xbf16>
    %cst_195 = arith.constant dense<0.000000e+00> : vector<8x64xf32>
    %263 = tpu.matmul %260, %262, %cst_195 {dimension_numbers = #tpu.dot_dimension_numbers<[1], [0], [0], [1], [0, 0, 1, 1], [], []>} : vector<8x256xbf16>, vector<256x64xbf16>, vector<8x64xf32> -> vector<8x64xf32>
    %c1_196 = arith.constant 1 : index
    %c0_197 = arith.constant 0 : index
    %c0_198 = arith.constant 0 : index
    %c0_199 = arith.constant 0 : index
    %264 = vector.load %arg5[%c1_196, %c0_197, %c0_198, %c0_199] : memref<2x4x1x64xf32, #tpu.memory_space<vmem>>, vector<1x1x1x64xf32>
    %265 = vector.shape_cast %264 : vector<1x1x1x64xf32> to vector<1x64xf32>
    %266 = vector.broadcast %265 : vector<1x64xf32> to vector<8x64xf32>
    %267 = arith.addf %263, %266 : vector<8x64xf32>
    %c1_200 = arith.constant 1 : index
    %c0_201 = arith.constant 0 : index
    %c0_202 = arith.constant 0 : index
    %c0_203 = arith.constant 0 : index
    %268 = vector.load %arg6[%c1_200, %c0_201, %c0_202, %c0_203] : memref<2x4x256x64xbf16, #tpu.memory_space<vmem>>, vector<1x1x256x64xbf16>
    %269 = vector.shape_cast %268 : vector<1x1x256x64xbf16> to vector<256x64xbf16>
    %cst_204 = arith.constant dense<0.000000e+00> : vector<8x64xf32>
    %270 = tpu.matmul %260, %269, %cst_204 {dimension_numbers = #tpu.dot_dimension_numbers<[1], [0], [0], [1], [0, 0, 1, 1], [], []>} : vector<8x256xbf16>, vector<256x64xbf16>, vector<8x64xf32> -> vector<8x64xf32>
    %c1_205 = arith.constant 1 : index
    %c0_206 = arith.constant 0 : index
    %c0_207 = arith.constant 0 : index
    %c0_208 = arith.constant 0 : index
    %271 = vector.load %arg7[%c1_205, %c0_206, %c0_207, %c0_208] : memref<2x4x1x64xf32, #tpu.memory_space<vmem>>, vector<1x1x1x64xf32>
    %272 = vector.shape_cast %271 : vector<1x1x1x64xf32> to vector<1x64xf32>
    %273 = vector.broadcast %272 : vector<1x64xf32> to vector<8x64xf32>
    %274 = arith.addf %270, %273 : vector<8x64xf32>
    %c1_209 = arith.constant 1 : index
    %c0_210 = arith.constant 0 : index
    %c0_211 = arith.constant 0 : index
    %c0_212 = arith.constant 0 : index
    %275 = vector.load %arg8[%c1_209, %c0_210, %c0_211, %c0_212] : memref<2x4x256x64xbf16, #tpu.memory_space<vmem>>, vector<1x1x256x64xbf16>
    %276 = vector.shape_cast %275 : vector<1x1x256x64xbf16> to vector<256x64xbf16>
    %cst_213 = arith.constant dense<0.000000e+00> : vector<8x64xf32>
    %277 = tpu.matmul %260, %276, %cst_213 {dimension_numbers = #tpu.dot_dimension_numbers<[1], [0], [0], [1], [0, 0, 1, 1], [], []>} : vector<8x256xbf16>, vector<256x64xbf16>, vector<8x64xf32> -> vector<8x64xf32>
    %c1_214 = arith.constant 1 : index
    %c0_215 = arith.constant 0 : index
    %c0_216 = arith.constant 0 : index
    %c0_217 = arith.constant 0 : index
    %278 = vector.load %arg9[%c1_214, %c0_215, %c0_216, %c0_217] : memref<2x4x1x64xf32, #tpu.memory_space<vmem>>, vector<1x1x1x64xf32>
    %279 = vector.shape_cast %278 : vector<1x1x1x64xf32> to vector<1x64xf32>
    %280 = vector.broadcast %279 : vector<1x64xf32> to vector<8x64xf32>
    %281 = arith.addf %277, %280 : vector<8x64xf32>
    %282 = arith.truncf %267 : vector<8x64xf32> to vector<8x64xbf16>
    %283 = arith.truncf %274 : vector<8x64xf32> to vector<8x64xbf16>
    %cst_218 = arith.constant dense<0.000000e+00> : vector<8x8xf32>
    %284 = tpu.matmul %282, %283, %cst_218 {dimension_numbers = #tpu.dot_dimension_numbers<[1], [1], [0], [0], [0, 0, 1, 0], [], []>} : vector<8x64xbf16>, vector<8x64xbf16>, vector<8x8xf32> -> vector<8x8xf32>
    %cst_219 = arith.constant 1.250000e-01 : f32
    %285 = vector.broadcast %cst_219 : f32 to vector<8x8xf32>
    %286 = arith.mulf %284, %285 : vector<8x8xf32>
    %cst_220 = arith.constant dense<0xFF800000> : vector<8xf32>
    %287 = vector.multi_reduction <maximumf>, %286, %cst_220 [1] : vector<8x8xf32> to vector<8xf32>
    %288 = vector.shape_cast %287 : vector<8xf32> to vector<8x1xf32>
    %289 = vector.broadcast %288 : vector<8x1xf32> to vector<8x8xf32>
    %290 = arith.subf %286, %289 : vector<8x8xf32>
    %291 = math.exp %290 : vector<8x8xf32>
    %cst_221 = arith.constant dense<0.000000e+00> : vector<8xf32>
    %292 = vector.multi_reduction <add>, %291, %cst_221 [1] : vector<8x8xf32> to vector<8xf32>
    %293 = vector.shape_cast %292 : vector<8xf32> to vector<8x1xf32>
    %294 = tpu.reciprocal %293 {approx = true} : vector<8x1xf32> -> vector<8x1xf32>
    %295 = vector.broadcast %294 : vector<8x1xf32> to vector<8x8xf32>
    %296 = arith.mulf %291, %295 : vector<8x8xf32>
    %297 = arith.truncf %296 : vector<8x8xf32> to vector<8x8xbf16>
    %298 = arith.truncf %281 : vector<8x64xf32> to vector<8x64xbf16>
    %cst_222 = arith.constant dense<0.000000e+00> : vector<8x64xf32>
    %299 = tpu.matmul %297, %298, %cst_222 {dimension_numbers = #tpu.dot_dimension_numbers<[1], [0], [0], [1], [0, 0, 1, 1], [], []>} : vector<8x8xbf16>, vector<8x64xbf16>, vector<8x64xf32> -> vector<8x64xf32>
    %300 = arith.truncf %299 : vector<8x64xf32> to vector<8x64xbf16>
    %c1_223 = arith.constant 1 : index
    %c0_224 = arith.constant 0 : index
    %c0_225 = arith.constant 0 : index
    %c0_226 = arith.constant 0 : index
    %301 = vector.load %arg10[%c1_223, %c0_224, %c0_225, %c0_226] : memref<2x4x64x256xbf16, #tpu.memory_space<vmem>>, vector<1x1x64x256xbf16>
    %302 = vector.shape_cast %301 : vector<1x1x64x256xbf16> to vector<64x256xbf16>
    %cst_227 = arith.constant dense<0.000000e+00> : vector<8x256xf32>
    %303 = tpu.matmul %300, %302, %cst_227 {dimension_numbers = #tpu.dot_dimension_numbers<[1], [0], [0], [1], [0, 0, 1, 1], [], []>} : vector<8x64xbf16>, vector<64x256xbf16>, vector<8x256xf32> -> vector<8x256xf32>
    %c1_228 = arith.constant 1 : index
    %c1_229 = arith.constant 1 : index
    %c0_230 = arith.constant 0 : index
    %c0_231 = arith.constant 0 : index
    %304 = vector.load %arg4[%c1_228, %c1_229, %c0_230, %c0_231] : memref<2x4x256x64xbf16, #tpu.memory_space<vmem>>, vector<1x1x256x64xbf16>
    %305 = vector.shape_cast %304 : vector<1x1x256x64xbf16> to vector<256x64xbf16>
    %cst_232 = arith.constant dense<0.000000e+00> : vector<8x64xf32>
    %306 = tpu.matmul %260, %305, %cst_232 {dimension_numbers = #tpu.dot_dimension_numbers<[1], [0], [0], [1], [0, 0, 1, 1], [], []>} : vector<8x256xbf16>, vector<256x64xbf16>, vector<8x64xf32> -> vector<8x64xf32>
    %c1_233 = arith.constant 1 : index
    %c1_234 = arith.constant 1 : index
    %c0_235 = arith.constant 0 : index
    %c0_236 = arith.constant 0 : index
    %307 = vector.load %arg5[%c1_233, %c1_234, %c0_235, %c0_236] : memref<2x4x1x64xf32, #tpu.memory_space<vmem>>, vector<1x1x1x64xf32>
    %308 = vector.shape_cast %307 : vector<1x1x1x64xf32> to vector<1x64xf32>
    %309 = vector.broadcast %308 : vector<1x64xf32> to vector<8x64xf32>
    %310 = arith.addf %306, %309 : vector<8x64xf32>
    %c1_237 = arith.constant 1 : index
    %c1_238 = arith.constant 1 : index
    %c0_239 = arith.constant 0 : index
    %c0_240 = arith.constant 0 : index
    %311 = vector.load %arg6[%c1_237, %c1_238, %c0_239, %c0_240] : memref<2x4x256x64xbf16, #tpu.memory_space<vmem>>, vector<1x1x256x64xbf16>
    %312 = vector.shape_cast %311 : vector<1x1x256x64xbf16> to vector<256x64xbf16>
    %cst_241 = arith.constant dense<0.000000e+00> : vector<8x64xf32>
    %313 = tpu.matmul %260, %312, %cst_241 {dimension_numbers = #tpu.dot_dimension_numbers<[1], [0], [0], [1], [0, 0, 1, 1], [], []>} : vector<8x256xbf16>, vector<256x64xbf16>, vector<8x64xf32> -> vector<8x64xf32>
    %c1_242 = arith.constant 1 : index
    %c1_243 = arith.constant 1 : index
    %c0_244 = arith.constant 0 : index
    %c0_245 = arith.constant 0 : index
    %314 = vector.load %arg7[%c1_242, %c1_243, %c0_244, %c0_245] : memref<2x4x1x64xf32, #tpu.memory_space<vmem>>, vector<1x1x1x64xf32>
    %315 = vector.shape_cast %314 : vector<1x1x1x64xf32> to vector<1x64xf32>
    %316 = vector.broadcast %315 : vector<1x64xf32> to vector<8x64xf32>
    %317 = arith.addf %313, %316 : vector<8x64xf32>
    %c1_246 = arith.constant 1 : index
    %c1_247 = arith.constant 1 : index
    %c0_248 = arith.constant 0 : index
    %c0_249 = arith.constant 0 : index
    %318 = vector.load %arg8[%c1_246, %c1_247, %c0_248, %c0_249] : memref<2x4x256x64xbf16, #tpu.memory_space<vmem>>, vector<1x1x256x64xbf16>
    %319 = vector.shape_cast %318 : vector<1x1x256x64xbf16> to vector<256x64xbf16>
    %cst_250 = arith.constant dense<0.000000e+00> : vector<8x64xf32>
    %320 = tpu.matmul %260, %319, %cst_250 {dimension_numbers = #tpu.dot_dimension_numbers<[1], [0], [0], [1], [0, 0, 1, 1], [], []>} : vector<8x256xbf16>, vector<256x64xbf16>, vector<8x64xf32> -> vector<8x64xf32>
    %c1_251 = arith.constant 1 : index
    %c1_252 = arith.constant 1 : index
    %c0_253 = arith.constant 0 : index
    %c0_254 = arith.constant 0 : index
    %321 = vector.load %arg9[%c1_251, %c1_252, %c0_253, %c0_254] : memref<2x4x1x64xf32, #tpu.memory_space<vmem>>, vector<1x1x1x64xf32>
    %322 = vector.shape_cast %321 : vector<1x1x1x64xf32> to vector<1x64xf32>
    %323 = vector.broadcast %322 : vector<1x64xf32> to vector<8x64xf32>
    %324 = arith.addf %320, %323 : vector<8x64xf32>
    %325 = arith.truncf %310 : vector<8x64xf32> to vector<8x64xbf16>
    %326 = arith.truncf %317 : vector<8x64xf32> to vector<8x64xbf16>
    %cst_255 = arith.constant dense<0.000000e+00> : vector<8x8xf32>
    %327 = tpu.matmul %325, %326, %cst_255 {dimension_numbers = #tpu.dot_dimension_numbers<[1], [1], [0], [0], [0, 0, 1, 0], [], []>} : vector<8x64xbf16>, vector<8x64xbf16>, vector<8x8xf32> -> vector<8x8xf32>
    %cst_256 = arith.constant 1.250000e-01 : f32
    %328 = vector.broadcast %cst_256 : f32 to vector<8x8xf32>
    %329 = arith.mulf %327, %328 : vector<8x8xf32>
    %cst_257 = arith.constant dense<0xFF800000> : vector<8xf32>
    %330 = vector.multi_reduction <maximumf>, %329, %cst_257 [1] : vector<8x8xf32> to vector<8xf32>
    %331 = vector.shape_cast %330 : vector<8xf32> to vector<8x1xf32>
    %332 = vector.broadcast %331 : vector<8x1xf32> to vector<8x8xf32>
    %333 = arith.subf %329, %332 : vector<8x8xf32>
    %334 = math.exp %333 : vector<8x8xf32>
    %cst_258 = arith.constant dense<0.000000e+00> : vector<8xf32>
    %335 = vector.multi_reduction <add>, %334, %cst_258 [1] : vector<8x8xf32> to vector<8xf32>
    %336 = vector.shape_cast %335 : vector<8xf32> to vector<8x1xf32>
    %337 = tpu.reciprocal %336 {approx = true} : vector<8x1xf32> -> vector<8x1xf32>
    %338 = vector.broadcast %337 : vector<8x1xf32> to vector<8x8xf32>
    %339 = arith.mulf %334, %338 : vector<8x8xf32>
    %340 = arith.truncf %339 : vector<8x8xf32> to vector<8x8xbf16>
    %341 = arith.truncf %324 : vector<8x64xf32> to vector<8x64xbf16>
    %cst_259 = arith.constant dense<0.000000e+00> : vector<8x64xf32>
    %342 = tpu.matmul %340, %341, %cst_259 {dimension_numbers = #tpu.dot_dimension_numbers<[1], [0], [0], [1], [0, 0, 1, 1], [], []>} : vector<8x8xbf16>, vector<8x64xbf16>, vector<8x64xf32> -> vector<8x64xf32>
    %343 = arith.truncf %342 : vector<8x64xf32> to vector<8x64xbf16>
    %c1_260 = arith.constant 1 : index
    %c1_261 = arith.constant 1 : index
    %c0_262 = arith.constant 0 : index
    %c0_263 = arith.constant 0 : index
    %344 = vector.load %arg10[%c1_260, %c1_261, %c0_262, %c0_263] : memref<2x4x64x256xbf16, #tpu.memory_space<vmem>>, vector<1x1x64x256xbf16>
    %345 = vector.shape_cast %344 : vector<1x1x64x256xbf16> to vector<64x256xbf16>
    %cst_264 = arith.constant dense<0.000000e+00> : vector<8x256xf32>
    %346 = tpu.matmul %343, %345, %cst_264 {dimension_numbers = #tpu.dot_dimension_numbers<[1], [0], [0], [1], [0, 0, 1, 1], [], []>} : vector<8x64xbf16>, vector<64x256xbf16>, vector<8x256xf32> -> vector<8x256xf32>
    %347 = arith.addf %303, %346 : vector<8x256xf32>
    %c1_265 = arith.constant 1 : index
    %c2_266 = arith.constant 2 : index
    %c0_267 = arith.constant 0 : index
    %c0_268 = arith.constant 0 : index
    %348 = vector.load %arg4[%c1_265, %c2_266, %c0_267, %c0_268] : memref<2x4x256x64xbf16, #tpu.memory_space<vmem>>, vector<1x1x256x64xbf16>
    %349 = vector.shape_cast %348 : vector<1x1x256x64xbf16> to vector<256x64xbf16>
    %cst_269 = arith.constant dense<0.000000e+00> : vector<8x64xf32>
    %350 = tpu.matmul %260, %349, %cst_269 {dimension_numbers = #tpu.dot_dimension_numbers<[1], [0], [0], [1], [0, 0, 1, 1], [], []>} : vector<8x256xbf16>, vector<256x64xbf16>, vector<8x64xf32> -> vector<8x64xf32>
    %c1_270 = arith.constant 1 : index
    %c2_271 = arith.constant 2 : index
    %c0_272 = arith.constant 0 : index
    %c0_273 = arith.constant 0 : index
    %351 = vector.load %arg5[%c1_270, %c2_271, %c0_272, %c0_273] : memref<2x4x1x64xf32, #tpu.memory_space<vmem>>, vector<1x1x1x64xf32>
    %352 = vector.shape_cast %351 : vector<1x1x1x64xf32> to vector<1x64xf32>
    %353 = vector.broadcast %352 : vector<1x64xf32> to vector<8x64xf32>
    %354 = arith.addf %350, %353 : vector<8x64xf32>
    %c1_274 = arith.constant 1 : index
    %c2_275 = arith.constant 2 : index
    %c0_276 = arith.constant 0 : index
    %c0_277 = arith.constant 0 : index
    %355 = vector.load %arg6[%c1_274, %c2_275, %c0_276, %c0_277] : memref<2x4x256x64xbf16, #tpu.memory_space<vmem>>, vector<1x1x256x64xbf16>
    %356 = vector.shape_cast %355 : vector<1x1x256x64xbf16> to vector<256x64xbf16>
    %cst_278 = arith.constant dense<0.000000e+00> : vector<8x64xf32>
    %357 = tpu.matmul %260, %356, %cst_278 {dimension_numbers = #tpu.dot_dimension_numbers<[1], [0], [0], [1], [0, 0, 1, 1], [], []>} : vector<8x256xbf16>, vector<256x64xbf16>, vector<8x64xf32> -> vector<8x64xf32>
    %c1_279 = arith.constant 1 : index
    %c2_280 = arith.constant 2 : index
    %c0_281 = arith.constant 0 : index
    %c0_282 = arith.constant 0 : index
    %358 = vector.load %arg7[%c1_279, %c2_280, %c0_281, %c0_282] : memref<2x4x1x64xf32, #tpu.memory_space<vmem>>, vector<1x1x1x64xf32>
    %359 = vector.shape_cast %358 : vector<1x1x1x64xf32> to vector<1x64xf32>
    %360 = vector.broadcast %359 : vector<1x64xf32> to vector<8x64xf32>
    %361 = arith.addf %357, %360 : vector<8x64xf32>
    %c1_283 = arith.constant 1 : index
    %c2_284 = arith.constant 2 : index
    %c0_285 = arith.constant 0 : index
    %c0_286 = arith.constant 0 : index
    %362 = vector.load %arg8[%c1_283, %c2_284, %c0_285, %c0_286] : memref<2x4x256x64xbf16, #tpu.memory_space<vmem>>, vector<1x1x256x64xbf16>
    %363 = vector.shape_cast %362 : vector<1x1x256x64xbf16> to vector<256x64xbf16>
    %cst_287 = arith.constant dense<0.000000e+00> : vector<8x64xf32>
    %364 = tpu.matmul %260, %363, %cst_287 {dimension_numbers = #tpu.dot_dimension_numbers<[1], [0], [0], [1], [0, 0, 1, 1], [], []>} : vector<8x256xbf16>, vector<256x64xbf16>, vector<8x64xf32> -> vector<8x64xf32>
    %c1_288 = arith.constant 1 : index
    %c2_289 = arith.constant 2 : index
    %c0_290 = arith.constant 0 : index
    %c0_291 = arith.constant 0 : index
    %365 = vector.load %arg9[%c1_288, %c2_289, %c0_290, %c0_291] : memref<2x4x1x64xf32, #tpu.memory_space<vmem>>, vector<1x1x1x64xf32>
    %366 = vector.shape_cast %365 : vector<1x1x1x64xf32> to vector<1x64xf32>
    %367 = vector.broadcast %366 : vector<1x64xf32> to vector<8x64xf32>
    %368 = arith.addf %364, %367 : vector<8x64xf32>
    %369 = arith.truncf %354 : vector<8x64xf32> to vector<8x64xbf16>
    %370 = arith.truncf %361 : vector<8x64xf32> to vector<8x64xbf16>
    %cst_292 = arith.constant dense<0.000000e+00> : vector<8x8xf32>
    %371 = tpu.matmul %369, %370, %cst_292 {dimension_numbers = #tpu.dot_dimension_numbers<[1], [1], [0], [0], [0, 0, 1, 0], [], []>} : vector<8x64xbf16>, vector<8x64xbf16>, vector<8x8xf32> -> vector<8x8xf32>
    %cst_293 = arith.constant 1.250000e-01 : f32
    %372 = vector.broadcast %cst_293 : f32 to vector<8x8xf32>
    %373 = arith.mulf %371, %372 : vector<8x8xf32>
    %cst_294 = arith.constant dense<0xFF800000> : vector<8xf32>
    %374 = vector.multi_reduction <maximumf>, %373, %cst_294 [1] : vector<8x8xf32> to vector<8xf32>
    %375 = vector.shape_cast %374 : vector<8xf32> to vector<8x1xf32>
    %376 = vector.broadcast %375 : vector<8x1xf32> to vector<8x8xf32>
    %377 = arith.subf %373, %376 : vector<8x8xf32>
    %378 = math.exp %377 : vector<8x8xf32>
    %cst_295 = arith.constant dense<0.000000e+00> : vector<8xf32>
    %379 = vector.multi_reduction <add>, %378, %cst_295 [1] : vector<8x8xf32> to vector<8xf32>
    %380 = vector.shape_cast %379 : vector<8xf32> to vector<8x1xf32>
    %381 = tpu.reciprocal %380 {approx = true} : vector<8x1xf32> -> vector<8x1xf32>
    %382 = vector.broadcast %381 : vector<8x1xf32> to vector<8x8xf32>
    %383 = arith.mulf %378, %382 : vector<8x8xf32>
    %384 = arith.truncf %383 : vector<8x8xf32> to vector<8x8xbf16>
    %385 = arith.truncf %368 : vector<8x64xf32> to vector<8x64xbf16>
    %cst_296 = arith.constant dense<0.000000e+00> : vector<8x64xf32>
    %386 = tpu.matmul %384, %385, %cst_296 {dimension_numbers = #tpu.dot_dimension_numbers<[1], [0], [0], [1], [0, 0, 1, 1], [], []>} : vector<8x8xbf16>, vector<8x64xbf16>, vector<8x64xf32> -> vector<8x64xf32>
    %387 = arith.truncf %386 : vector<8x64xf32> to vector<8x64xbf16>
    %c1_297 = arith.constant 1 : index
    %c2_298 = arith.constant 2 : index
    %c0_299 = arith.constant 0 : index
    %c0_300 = arith.constant 0 : index
    %388 = vector.load %arg10[%c1_297, %c2_298, %c0_299, %c0_300] : memref<2x4x64x256xbf16, #tpu.memory_space<vmem>>, vector<1x1x64x256xbf16>
    %389 = vector.shape_cast %388 : vector<1x1x64x256xbf16> to vector<64x256xbf16>
    %cst_301 = arith.constant dense<0.000000e+00> : vector<8x256xf32>
    %390 = tpu.matmul %387, %389, %cst_301 {dimension_numbers = #tpu.dot_dimension_numbers<[1], [0], [0], [1], [0, 0, 1, 1], [], []>} : vector<8x64xbf16>, vector<64x256xbf16>, vector<8x256xf32> -> vector<8x256xf32>
    %391 = arith.addf %347, %390 : vector<8x256xf32>
    %c1_302 = arith.constant 1 : index
    %c3_303 = arith.constant 3 : index
    %c0_304 = arith.constant 0 : index
    %c0_305 = arith.constant 0 : index
    %392 = vector.load %arg4[%c1_302, %c3_303, %c0_304, %c0_305] : memref<2x4x256x64xbf16, #tpu.memory_space<vmem>>, vector<1x1x256x64xbf16>
    %393 = vector.shape_cast %392 : vector<1x1x256x64xbf16> to vector<256x64xbf16>
    %cst_306 = arith.constant dense<0.000000e+00> : vector<8x64xf32>
    %394 = tpu.matmul %260, %393, %cst_306 {dimension_numbers = #tpu.dot_dimension_numbers<[1], [0], [0], [1], [0, 0, 1, 1], [], []>} : vector<8x256xbf16>, vector<256x64xbf16>, vector<8x64xf32> -> vector<8x64xf32>
    %c1_307 = arith.constant 1 : index
    %c3_308 = arith.constant 3 : index
    %c0_309 = arith.constant 0 : index
    %c0_310 = arith.constant 0 : index
    %395 = vector.load %arg5[%c1_307, %c3_308, %c0_309, %c0_310] : memref<2x4x1x64xf32, #tpu.memory_space<vmem>>, vector<1x1x1x64xf32>
    %396 = vector.shape_cast %395 : vector<1x1x1x64xf32> to vector<1x64xf32>
    %397 = vector.broadcast %396 : vector<1x64xf32> to vector<8x64xf32>
    %398 = arith.addf %394, %397 : vector<8x64xf32>
    %c1_311 = arith.constant 1 : index
    %c3_312 = arith.constant 3 : index
    %c0_313 = arith.constant 0 : index
    %c0_314 = arith.constant 0 : index
    %399 = vector.load %arg6[%c1_311, %c3_312, %c0_313, %c0_314] : memref<2x4x256x64xbf16, #tpu.memory_space<vmem>>, vector<1x1x256x64xbf16>
    %400 = vector.shape_cast %399 : vector<1x1x256x64xbf16> to vector<256x64xbf16>
    %cst_315 = arith.constant dense<0.000000e+00> : vector<8x64xf32>
    %401 = tpu.matmul %260, %400, %cst_315 {dimension_numbers = #tpu.dot_dimension_numbers<[1], [0], [0], [1], [0, 0, 1, 1], [], []>} : vector<8x256xbf16>, vector<256x64xbf16>, vector<8x64xf32> -> vector<8x64xf32>
    %c1_316 = arith.constant 1 : index
    %c3_317 = arith.constant 3 : index
    %c0_318 = arith.constant 0 : index
    %c0_319 = arith.constant 0 : index
    %402 = vector.load %arg7[%c1_316, %c3_317, %c0_318, %c0_319] : memref<2x4x1x64xf32, #tpu.memory_space<vmem>>, vector<1x1x1x64xf32>
    %403 = vector.shape_cast %402 : vector<1x1x1x64xf32> to vector<1x64xf32>
    %404 = vector.broadcast %403 : vector<1x64xf32> to vector<8x64xf32>
    %405 = arith.addf %401, %404 : vector<8x64xf32>
    %c1_320 = arith.constant 1 : index
    %c3_321 = arith.constant 3 : index
    %c0_322 = arith.constant 0 : index
    %c0_323 = arith.constant 0 : index
    %406 = vector.load %arg8[%c1_320, %c3_321, %c0_322, %c0_323] : memref<2x4x256x64xbf16, #tpu.memory_space<vmem>>, vector<1x1x256x64xbf16>
    %407 = vector.shape_cast %406 : vector<1x1x256x64xbf16> to vector<256x64xbf16>
    %cst_324 = arith.constant dense<0.000000e+00> : vector<8x64xf32>
    %408 = tpu.matmul %260, %407, %cst_324 {dimension_numbers = #tpu.dot_dimension_numbers<[1], [0], [0], [1], [0, 0, 1, 1], [], []>} : vector<8x256xbf16>, vector<256x64xbf16>, vector<8x64xf32> -> vector<8x64xf32>
    %c1_325 = arith.constant 1 : index
    %c3_326 = arith.constant 3 : index
    %c0_327 = arith.constant 0 : index
    %c0_328 = arith.constant 0 : index
    %409 = vector.load %arg9[%c1_325, %c3_326, %c0_327, %c0_328] : memref<2x4x1x64xf32, #tpu.memory_space<vmem>>, vector<1x1x1x64xf32>
    %410 = vector.shape_cast %409 : vector<1x1x1x64xf32> to vector<1x64xf32>
    %411 = vector.broadcast %410 : vector<1x64xf32> to vector<8x64xf32>
    %412 = arith.addf %408, %411 : vector<8x64xf32>
    %413 = arith.truncf %398 : vector<8x64xf32> to vector<8x64xbf16>
    %414 = arith.truncf %405 : vector<8x64xf32> to vector<8x64xbf16>
    %cst_329 = arith.constant dense<0.000000e+00> : vector<8x8xf32>
    %415 = tpu.matmul %413, %414, %cst_329 {dimension_numbers = #tpu.dot_dimension_numbers<[1], [1], [0], [0], [0, 0, 1, 0], [], []>} : vector<8x64xbf16>, vector<8x64xbf16>, vector<8x8xf32> -> vector<8x8xf32>
    %cst_330 = arith.constant 1.250000e-01 : f32
    %416 = vector.broadcast %cst_330 : f32 to vector<8x8xf32>
    %417 = arith.mulf %415, %416 : vector<8x8xf32>
    %cst_331 = arith.constant dense<0xFF800000> : vector<8xf32>
    %418 = vector.multi_reduction <maximumf>, %417, %cst_331 [1] : vector<8x8xf32> to vector<8xf32>
    %419 = vector.shape_cast %418 : vector<8xf32> to vector<8x1xf32>
    %420 = vector.broadcast %419 : vector<8x1xf32> to vector<8x8xf32>
    %421 = arith.subf %417, %420 : vector<8x8xf32>
    %422 = math.exp %421 : vector<8x8xf32>
    %cst_332 = arith.constant dense<0.000000e+00> : vector<8xf32>
    %423 = vector.multi_reduction <add>, %422, %cst_332 [1] : vector<8x8xf32> to vector<8xf32>
    %424 = vector.shape_cast %423 : vector<8xf32> to vector<8x1xf32>
    %425 = tpu.reciprocal %424 {approx = true} : vector<8x1xf32> -> vector<8x1xf32>
    %426 = vector.broadcast %425 : vector<8x1xf32> to vector<8x8xf32>
    %427 = arith.mulf %422, %426 : vector<8x8xf32>
    %428 = arith.truncf %427 : vector<8x8xf32> to vector<8x8xbf16>
    %429 = arith.truncf %412 : vector<8x64xf32> to vector<8x64xbf16>
    %cst_333 = arith.constant dense<0.000000e+00> : vector<8x64xf32>
    %430 = tpu.matmul %428, %429, %cst_333 {dimension_numbers = #tpu.dot_dimension_numbers<[1], [0], [0], [1], [0, 0, 1, 1], [], []>} : vector<8x8xbf16>, vector<8x64xbf16>, vector<8x64xf32> -> vector<8x64xf32>
    %431 = arith.truncf %430 : vector<8x64xf32> to vector<8x64xbf16>
    %c1_334 = arith.constant 1 : index
    %c3_335 = arith.constant 3 : index
    %c0_336 = arith.constant 0 : index
    %c0_337 = arith.constant 0 : index
    %432 = vector.load %arg10[%c1_334, %c3_335, %c0_336, %c0_337] : memref<2x4x64x256xbf16, #tpu.memory_space<vmem>>, vector<1x1x64x256xbf16>
    %433 = vector.shape_cast %432 : vector<1x1x64x256xbf16> to vector<64x256xbf16>
    %cst_338 = arith.constant dense<0.000000e+00> : vector<8x256xf32>
    %434 = tpu.matmul %431, %433, %cst_338 {dimension_numbers = #tpu.dot_dimension_numbers<[1], [0], [0], [1], [0, 0, 1, 1], [], []>} : vector<8x64xbf16>, vector<64x256xbf16>, vector<8x256xf32> -> vector<8x256xf32>
    %435 = arith.addf %391, %434 : vector<8x256xf32>
    %c1_339 = arith.constant 1 : index
    %c0_340 = arith.constant 0 : index
    %c0_341 = arith.constant 0 : index
    %436 = vector.load %arg11[%c1_339, %c0_340, %c0_341] : memref<2x1x256xf32, #tpu.memory_space<vmem>>, vector<1x1x256xf32>
    %437 = vector.shape_cast %436 : vector<1x1x256xf32> to vector<1x256xf32>
    %438 = vector.broadcast %437 : vector<1x256xf32> to vector<8x256xf32>
    %439 = arith.addf %435, %438 : vector<8x256xf32>
    %440 = arith.addf %259, %439 : vector<8x256xf32>
    %c1_342 = arith.constant 1 : index
    %c0_343 = arith.constant 0 : index
    %c0_344 = arith.constant 0 : index
    %441 = vector.load %arg12[%c1_342, %c0_343, %c0_344] : memref<2x1x256xf32, #tpu.memory_space<vmem>>, vector<1x1x256xf32>
    %442 = vector.shape_cast %441 : vector<1x1x256xf32> to vector<1x256xf32>
    %c1_345 = arith.constant 1 : index
    %c0_346 = arith.constant 0 : index
    %c0_347 = arith.constant 0 : index
    %443 = vector.load %arg13[%c1_345, %c0_346, %c0_347] : memref<2x1x256xf32, #tpu.memory_space<vmem>>, vector<1x1x256xf32>
    %444 = vector.shape_cast %443 : vector<1x1x256xf32> to vector<1x256xf32>
    %cst_348 = arith.constant dense<0.000000e+00> : vector<8xf32>
    %445 = vector.multi_reduction <add>, %440, %cst_348 [1] : vector<8x256xf32> to vector<8xf32>
    %446 = vector.shape_cast %445 : vector<8xf32> to vector<8x1xf32>
    %cst_349 = arith.constant 2.560000e+02 : f32
    %447 = vector.broadcast %cst_349 : f32 to vector<8x1xf32>
    %448 = arith.divf %446, %447 : vector<8x1xf32>
    %449 = arith.mulf %440, %440 : vector<8x256xf32>
    %cst_350 = arith.constant dense<0.000000e+00> : vector<8xf32>
    %450 = vector.multi_reduction <add>, %449, %cst_350 [1] : vector<8x256xf32> to vector<8xf32>
    %451 = vector.shape_cast %450 : vector<8xf32> to vector<8x1xf32>
    %cst_351 = arith.constant 2.560000e+02 : f32
    %452 = vector.broadcast %cst_351 : f32 to vector<8x1xf32>
    %453 = arith.divf %451, %452 : vector<8x1xf32>
    %454 = arith.mulf %448, %448 : vector<8x1xf32>
    %455 = arith.subf %453, %454 : vector<8x1xf32>
    %456 = vector.broadcast %448 : vector<8x1xf32> to vector<8x256xf32>
    %457 = arith.subf %440, %456 : vector<8x256xf32>
    %cst_352 = arith.constant 9.99999974E-6 : f32
    %458 = vector.broadcast %cst_352 : f32 to vector<8x1xf32>
    %459 = arith.addf %455, %458 : vector<8x1xf32>
    %460 = math.rsqrt %459 : vector<8x1xf32>
    %461 = vector.broadcast %460 : vector<8x1xf32> to vector<8x256xf32>
    %462 = arith.mulf %457, %461 : vector<8x256xf32>
    %463 = vector.broadcast %442 : vector<1x256xf32> to vector<8x256xf32>
    %464 = arith.mulf %462, %463 : vector<8x256xf32>
    %465 = vector.broadcast %444 : vector<1x256xf32> to vector<8x256xf32>
    %466 = arith.addf %464, %465 : vector<8x256xf32>
    %467 = arith.truncf %466 : vector<8x256xf32> to vector<8x256xbf16>
    %c1_353 = arith.constant 1 : index
    %c0_354 = arith.constant 0 : index
    %c0_355 = arith.constant 0 : index
    %468 = vector.load %arg14[%c1_353, %c0_354, %c0_355] : memref<2x256x512xbf16, #tpu.memory_space<vmem>>, vector<1x256x512xbf16>
    %469 = vector.shape_cast %468 : vector<1x256x512xbf16> to vector<256x512xbf16>
    %cst_356 = arith.constant dense<0.000000e+00> : vector<8x512xf32>
    %470 = tpu.matmul %467, %469, %cst_356 {dimension_numbers = #tpu.dot_dimension_numbers<[1], [0], [0], [1], [0, 0, 1, 1], [], []>} : vector<8x256xbf16>, vector<256x512xbf16>, vector<8x512xf32> -> vector<8x512xf32>
    %c1_357 = arith.constant 1 : index
    %c0_358 = arith.constant 0 : index
    %c0_359 = arith.constant 0 : index
    %471 = vector.load %arg15[%c1_357, %c0_358, %c0_359] : memref<2x1x512xf32, #tpu.memory_space<vmem>>, vector<1x1x512xf32>
    %472 = vector.shape_cast %471 : vector<1x1x512xf32> to vector<1x512xf32>
    %473 = vector.broadcast %472 : vector<1x512xf32> to vector<8x512xf32>
    %474 = arith.addf %470, %473 : vector<8x512xf32>
    %cst_360 = arith.constant 0.000000e+00 : f32
    %475 = vector.broadcast %cst_360 : f32 to vector<8x512xf32>
    %476 = arith.maximumf %474, %475 : vector<8x512xf32>
    %477 = arith.truncf %476 : vector<8x512xf32> to vector<8x512xbf16>
    %c1_361 = arith.constant 1 : index
    %c0_362 = arith.constant 0 : index
    %c0_363 = arith.constant 0 : index
    %478 = vector.load %arg16[%c1_361, %c0_362, %c0_363] : memref<2x512x256xbf16, #tpu.memory_space<vmem>>, vector<1x512x256xbf16>
    %479 = vector.shape_cast %478 : vector<1x512x256xbf16> to vector<512x256xbf16>
    %cst_364 = arith.constant dense<0.000000e+00> : vector<8x256xf32>
    %480 = tpu.matmul %477, %479, %cst_364 {dimension_numbers = #tpu.dot_dimension_numbers<[1], [0], [0], [1], [0, 0, 1, 1], [], []>} : vector<8x512xbf16>, vector<512x256xbf16>, vector<8x256xf32> -> vector<8x256xf32>
    %c1_365 = arith.constant 1 : index
    %c0_366 = arith.constant 0 : index
    %c0_367 = arith.constant 0 : index
    %481 = vector.load %arg17[%c1_365, %c0_366, %c0_367] : memref<2x1x256xf32, #tpu.memory_space<vmem>>, vector<1x1x256xf32>
    %482 = vector.shape_cast %481 : vector<1x1x256xf32> to vector<1x256xf32>
    %483 = vector.broadcast %482 : vector<1x256xf32> to vector<8x256xf32>
    %484 = arith.addf %480, %483 : vector<8x256xf32>
    %485 = arith.addf %466, %484 : vector<8x256xf32>
    %c1_368 = arith.constant 1 : index
    %c0_369 = arith.constant 0 : index
    %c0_370 = arith.constant 0 : index
    %486 = vector.load %arg18[%c1_368, %c0_369, %c0_370] : memref<2x1x256xf32, #tpu.memory_space<vmem>>, vector<1x1x256xf32>
    %487 = vector.shape_cast %486 : vector<1x1x256xf32> to vector<1x256xf32>
    %c1_371 = arith.constant 1 : index
    %c0_372 = arith.constant 0 : index
    %c0_373 = arith.constant 0 : index
    %488 = vector.load %arg19[%c1_371, %c0_372, %c0_373] : memref<2x1x256xf32, #tpu.memory_space<vmem>>, vector<1x1x256xf32>
    %489 = vector.shape_cast %488 : vector<1x1x256xf32> to vector<1x256xf32>
    %cst_374 = arith.constant dense<0.000000e+00> : vector<8xf32>
    %490 = vector.multi_reduction <add>, %485, %cst_374 [1] : vector<8x256xf32> to vector<8xf32>
    %491 = vector.shape_cast %490 : vector<8xf32> to vector<8x1xf32>
    %cst_375 = arith.constant 2.560000e+02 : f32
    %492 = vector.broadcast %cst_375 : f32 to vector<8x1xf32>
    %493 = arith.divf %491, %492 : vector<8x1xf32>
    %494 = arith.mulf %485, %485 : vector<8x256xf32>
    %cst_376 = arith.constant dense<0.000000e+00> : vector<8xf32>
    %495 = vector.multi_reduction <add>, %494, %cst_376 [1] : vector<8x256xf32> to vector<8xf32>
    %496 = vector.shape_cast %495 : vector<8xf32> to vector<8x1xf32>
    %cst_377 = arith.constant 2.560000e+02 : f32
    %497 = vector.broadcast %cst_377 : f32 to vector<8x1xf32>
    %498 = arith.divf %496, %497 : vector<8x1xf32>
    %499 = arith.mulf %493, %493 : vector<8x1xf32>
    %500 = arith.subf %498, %499 : vector<8x1xf32>
    %501 = vector.broadcast %493 : vector<8x1xf32> to vector<8x256xf32>
    %502 = arith.subf %485, %501 : vector<8x256xf32>
    %cst_378 = arith.constant 9.99999974E-6 : f32
    %503 = vector.broadcast %cst_378 : f32 to vector<8x1xf32>
    %504 = arith.addf %500, %503 : vector<8x1xf32>
    %505 = math.rsqrt %504 : vector<8x1xf32>
    %506 = vector.broadcast %505 : vector<8x1xf32> to vector<8x256xf32>
    %507 = arith.mulf %502, %506 : vector<8x256xf32>
    %508 = vector.broadcast %487 : vector<1x256xf32> to vector<8x256xf32>
    %509 = arith.mulf %507, %508 : vector<8x256xf32>
    %510 = vector.broadcast %489 : vector<1x256xf32> to vector<8x256xf32>
    %511 = arith.addf %509, %510 : vector<8x256xf32>
    %c0_379 = arith.constant 0 : index
    %c0_380 = arith.constant 0 : index
    %c0_381 = arith.constant 0 : index
    %512 = vector.load %arg20[%c0_379, %c0_380, %c0_381] : memref<1x8x256xf32, #tpu.memory_space<vmem>>, vector<1x8x256xf32>
    %513 = vector.shape_cast %512 : vector<1x8x256xf32> to vector<8x256xf32>
    %514 = vector.shape_cast %511 : vector<8x256xf32> to vector<1x8x256xf32>
    tpu.vector_store %arg20[%c0_379, %c0_380, %c0_381], %514 {strides = array<i32>} : memref<1x8x256xf32, #tpu.memory_space<vmem>>, vector<1x8x256xf32>,
    return
  }
  func.func @transform_0(%arg0: i32) -> (i32, i32, i32) {
    %c0_i32 = arith.constant 0 : i32
    %c0_i32_0 = arith.constant 0 : i32
    %c0_i32_1 = arith.constant 0 : i32
    return %arg0, %c0_i32, %c0_i32_0 : i32, i32, i32
  }
  func.func @transform_1(%arg0: i32) -> (i32, i32) {
    %c0_i32 = arith.constant 0 : i32
    %c0_i32_0 = arith.constant 0 : i32
    %c0_i32_1 = arith.constant 0 : i32
    return %c0_i32, %c0_i32_0 : i32, i32
  }
  func.func @transform_2(%arg0: i32) -> (i32, i32) {
    %c0_i32 = arith.constant 0 : i32
    %c0_i32_0 = arith.constant 0 : i32
    %c0_i32_1 = arith.constant 0 : i32
    return %c0_i32, %c0_i32_0 : i32, i32
  }
  func.func @transform_3(%arg0: i32) -> (i32, i32, i32, i32) {
    %c0_i32 = arith.constant 0 : i32
    %c0_i32_0 = arith.constant 0 : i32
    %c0_i32_1 = arith.constant 0 : i32
    %c0_i32_2 = arith.constant 0 : i32
    %c0_i32_3 = arith.constant 0 : i32
    return %c0_i32, %c0_i32_0, %c0_i32_1, %c0_i32_2 : i32, i32, i32, i32
  }
  func.func @transform_4(%arg0: i32) -> (i32, i32, i32, i32) {
    %c0_i32 = arith.constant 0 : i32
    %c0_i32_0 = arith.constant 0 : i32
    %c0_i32_1 = arith.constant 0 : i32
    %c0_i32_2 = arith.constant 0 : i32
    %c0_i32_3 = arith.constant 0 : i32
    return %c0_i32, %c0_i32_0, %c0_i32_1, %c0_i32_2 : i32, i32, i32, i32
  }
  func.func @transform_5(%arg0: i32) -> (i32, i32, i32, i32) {
    %c0_i32 = arith.constant 0 : i32
    %c0_i32_0 = arith.constant 0 : i32
    %c0_i32_1 = arith.constant 0 : i32
    %c0_i32_2 = arith.constant 0 : i32
    %c0_i32_3 = arith.constant 0 : i32
    return %c0_i32, %c0_i32_0, %c0_i32_1, %c0_i32_2 : i32, i32, i32, i32
  }
  func.func @transform_6(%arg0: i32) -> (i32, i32, i32, i32) {
    %c0_i32 = arith.constant 0 : i32
    %c0_i32_0 = arith.constant 0 : i32
    %c0_i32_1 = arith.constant 0 : i32
    %c0_i32_2 = arith.constant 0 : i32
    %c0_i32_3 = arith.constant 0 : i32
    return %c0_i32, %c0_i32_0, %c0_i32_1, %c0_i32_2 : i32, i32, i32, i32
  }
  func.func @transform_7(%arg0: i32) -> (i32, i32, i32, i32) {
    %c0_i32 = arith.constant 0 : i32
    %c0_i32_0 = arith.constant 0 : i32
    %c0_i32_1 = arith.constant 0 : i32
    %c0_i32_2 = arith.constant 0 : i32
    %c0_i32_3 = arith.constant 0 : i32
    return %c0_i32, %c0_i32_0, %c0_i32_1, %c0_i32_2 : i32, i32, i32, i32
  }
  func.func @transform_8(%arg0: i32) -> (i32, i32, i32, i32) {
    %c0_i32 = arith.constant 0 : i32
    %c0_i32_0 = arith.constant 0 : i32
    %c0_i32_1 = arith.constant 0 : i32
    %c0_i32_2 = arith.constant 0 : i32
    %c0_i32_3 = arith.constant 0 : i32
    return %c0_i32, %c0_i32_0, %c0_i32_1, %c0_i32_2 : i32, i32, i32, i32
  }
  func.func @transform_9(%arg0: i32) -> (i32, i32, i32, i32) {
    %c0_i32 = arith.constant 0 : i32
    %c0_i32_0 = arith.constant 0 : i32
    %c0_i32_1 = arith.constant 0 : i32
    %c0_i32_2 = arith.constant 0 : i32
    %c0_i32_3 = arith.constant 0 : i32
    return %c0_i32, %c0_i32_0, %c0_i32_1, %c0_i32_2 : i32, i32, i32, i32
  }
  func.func @transform_10(%arg0: i32) -> (i32, i32, i32) {
    %c0_i32 = arith.constant 0 : i32
    %c0_i32_0 = arith.constant 0 : i32
    %c0_i32_1 = arith.constant 0 : i32
    %c0_i32_2 = arith.constant 0 : i32
    return %c0_i32, %c0_i32_0, %c0_i32_1 : i32, i32, i32
  }
  func.func @transform_11(%arg0: i32) -> (i32, i32, i32) {
    %c0_i32 = arith.constant 0 : i32
    %c0_i32_0 = arith.constant 0 : i32
    %c0_i32_1 = arith.constant 0 : i32
    %c0_i32_2 = arith.constant 0 : i32
    return %c0_i32, %c0_i32_0, %c0_i32_1 : i32, i32, i32
  }
  func.func @transform_12(%arg0: i32) -> (i32, i32, i32) {
    %c0_i32 = arith.constant 0 : i32
    %c0_i32_0 = arith.constant 0 : i32
    %c0_i32_1 = arith.constant 0 : i32
    %c0_i32_2 = arith.constant 0 : i32
    return %c0_i32, %c0_i32_0, %c0_i32_1 : i32, i32, i32
  }
  func.func @transform_13(%arg0: i32) -> (i32, i32, i32) {
    %c0_i32 = arith.constant 0 : i32
    %c0_i32_0 = arith.constant 0 : i32
    %c0_i32_1 = arith.constant 0 : i32
    %c0_i32_2 = arith.constant 0 : i32
    return %c0_i32, %c0_i32_0, %c0_i32_1 : i32, i32, i32
  }
  func.func @transform_14(%arg0: i32) -> (i32, i32, i32) {
    %c0_i32 = arith.constant 0 : i32
    %c0_i32_0 = arith.constant 0 : i32
    %c0_i32_1 = arith.constant 0 : i32
    %c0_i32_2 = arith.constant 0 : i32
    return %c0_i32, %c0_i32_0, %c0_i32_1 : i32, i32, i32
  }
  func.func @transform_15(%arg0: i32) -> (i32, i32, i32) {
    %c0_i32 = arith.constant 0 : i32
    %c0_i32_0 = arith.constant 0 : i32
    %c0_i32_1 = arith.constant 0 : i32
    %c0_i32_2 = arith.constant 0 : i32
    return %c0_i32, %c0_i32_0, %c0_i32_1 : i32, i32, i32
  }
  func.func @transform_16(%arg0: i32) -> (i32, i32, i32) {
    %c0_i32 = arith.constant 0 : i32
    %c0_i32_0 = arith.constant 0 : i32
    %c0_i32_1 = arith.constant 0 : i32
    %c0_i32_2 = arith.constant 0 : i32
    return %c0_i32, %c0_i32_0, %c0_i32_1 : i32, i32, i32
  }
  func.func @transform_17(%arg0: i32) -> (i32, i32, i32) {
    %c0_i32 = arith.constant 0 : i32
    %c0_i32_0 = arith.constant 0 : i32
    %c0_i32_1 = arith.constant 0 : i32
    %c0_i32_2 = arith.constant 0 : i32
    return %c0_i32, %c0_i32_0, %c0_i32_1 : i32, i32, i32
  }
  func.func @transform_18(%arg0: i32) -> (i32, i32, i32) {
    %c0_i32 = arith.constant 0 : i32
    %c0_i32_0 = arith.constant 0 : i32
    %c0_i32_1 = arith.constant 0 : i32
    %c0_i32_2 = arith.constant 0 : i32
    return %c0_i32, %c0_i32_0, %c0_i32_1 : i32, i32, i32
  }
  func.func @transform_19(%arg0: i32) -> (i32, i32, i32) {
    %c0_i32 = arith.constant 0 : i32
    %c0_i32_0 = arith.constant 0 : i32
    %c0_i32_1 = arith.constant 0 : i32
    return %arg0, %c0_i32, %c0_i32_0 : i32, i32, i32
  }
}

</mosaic_0001>

<bundles_post_ra>
// kernel: tpu_custom_call.1
= control target key start
LH: loop header
LB: loop body
LE: loop exit
PB: predicated region body
PF: predicated region fallthrough
CT: control target
= control target key end

     0   :  { %s15062_s0 = inlined_call_operand.vmem [shape: f32[2,8,128], index: 0, kind: input, shape index: {}]   ;;  %s15063_s1 = inlined_call_operand.vmem [shape: bf16[128,256], index: 1, kind: input, shape index: {}]   ;;  %s15064_s2 = inlined_call_operand.vmem [shape: f32[1,256], index: 2, kind: input, shape index: {}]   ;;  %s15065_s3 = inlined_call_operand.vmem [shape: bf16[2,4,256,64], index: 3, kind: input, shape index: {}]   ;;  %s15066_s4 = inlined_call_operand.vmem [shape: f32[2,4,1,64], index: 4, kind: input, shape index: {}]   ;;  %s15067_s5 = inlined_call_operand.vmem [shape: bf16[2,4,256,64], index: 5, kind: input, shape index: {}]   ;;  %s15068_s6 = inlined_call_operand.vmem [shape: f32[2,4,1,64], index: 6, kind: input, shape index: {}]   ;;  %s15069_s7 = inlined_call_operand.vmem [shape: bf16[2,4,256,64], index: 7, kind: input, shape index: {}]   ;;  %s15070_s8 = inlined_call_operand.vmem [shape: f32[2,4,1,64], index: 8, kind: input, shape index: {}]   ;;  %s15071_s9 = inlined_call_operand.vmem [shape: bf16[2,4,64,256], index: 9, kind: input, shape index: {}]   ;;  %s15072_s10 = inlined_call_operand.vmem [shape: f32[2,1,256], index: 10, kind: input, shape index: {}]   ;;  %s15073_s11 = inlined_call_operand.vmem [shape: f32[2,1,256], index: 11, kind: input, shape index: {}]   ;;  %s15074_s12 = inlined_call_operand.vmem [shape: f32[2,1,256], index: 12, kind: input, shape index: {}]   ;;  %s15075_s13 = inlined_call_operand.vmem [shape: bf16[2,256,512], index: 13, kind: input, shape index: {}]   ;;  %s15076_s14 = inlined_call_operand.vmem [shape: f32[2,1,512], index: 14, kind: input, shape index: {}]   ;;  %s15077_s15 = inlined_call_operand.vmem [shape: bf16[2,512,256], index: 15, kind: input, shape index: {}]   ;;  %s15078_s16 = inlined_call_operand.vmem [shape: f32[2,1,256], index: 16, kind: input, shape index: {}]   ;;  %s15079_s17 = inlined_call_operand.vmem [shape: f32[2,1,256], index: 17, kind: input, shape index: {}]   ;;  %s15080_s18 = inlined_call_operand.vmem [shape: f32[2,1,256], index: 18, kind: input, shape index: {}]   ;;  %s15081_s19 = inlined_call_operand.hbm [shape: f32[2,8,256], index: 19, kind: output, shape index: {}]  }
   0x1   :  { %15094 = sst [smem:[#allocation13_spill]] %s15062_s0 }
   0x2   :  { %15095 = sst [smem:[#allocation14_spill]] %s15063_s1 }
   0x3   :  { %15096 = sst [smem:[#allocation15_spill]] %s15064_s2 }
   0x4   :  { %15097 = sst [smem:[#allocation16_spill]] %s15065_s3 }
   0x5   :  { %15098 = sst [smem:[#allocation17_spill]] %s15066_s4 }
   0x6   :  { %15099 = sst [smem:[#allocation18_spill]] %s15081_s19 }
   0x7   :  { %24 = vsyncpa [#allocation3], 0 }
   0x8   :  { %26 = vsyncpa [#allocation3 + $0x1], 0  ;;  %s12338_s0 = smov 0   ;;  %s12340_s30 = smov 0  }
   0x9   :  { %s12342_s20 = smov 0   ;;  %s12344_s21 = smov 0  }
   0xa LB: > { %15100 = sst [smem:[#allocation5_spill]] %s12220_s0  ;;  %s12359_s1 = sadd.s32 4294967295, %s12232_s21   ;;  %s12232_s21 = sphi %s12344_s21, %s15121_s21   ;;  %s12228_s20 = sphi %s12342_s20, %s15123_s20   ;;  %s12224_s30 = sphi %s12340_s30, %s15125_s30   ;;  %s12220_s0 = sphi %s12338_s0, %s15124_s0  }
   0xb   : > { %15101 = sst [smem:[#allocation6_spill]] %s12228_s20  ;;  %s8880_s22 = sadd.s32 4294967294, %s12232_s21  }
   0xc   : > { %15102 = sst [smem:[#allocation7_spill]] %s12232_s21  ;;  %s12363_s2 = sadd.s32 1, %s12232_s21  }
   0xd   : > { %15103 = sst [smem:[#allocation8_spill]] %s12359_s1  ;;  %s443_s23 = sadd.s32 1, %s12228_s20 }
   0xe   : > { %15104 = sst [smem:[#allocation9_spill]] %s12363_s2  ;;  %s440_s24 = ssub.s32 %s12232_s21, %s12363_s2 }
   0xf   : > { %p453_p0 = scmp.ne.s32.totalorder %s12228_s20, %s12224_s30  ;;  %p441_p1 = scmp.eq.s32.totalorder %s440_s24, 0 }
  0x10   : > { %p454_p2 = scmp.eq.s32.totalorder %s12359_s1, 1  ;;  %p459_p3 = scmp.ne.s32.totalorder %s12224_s30, %s12220_s0 }
  0x11   : > { %p460_p4 = scmp.eq.s32.totalorder %s8880_s22, 1  ;;  %p8883_p7 = scmp.ge.s32.totalorder %s12232_s21, 1 }
  0x12   : > { %s12374_s25 = scalar_select %p441_p1, %s12228_s20, %s443_s23  }
  0x13   : > { %p12376_p5 = por %p454_p2, %p453_p0  ;;  %p12380_p6 = por %p460_p4, %p459_p3 }
  0x14   : > { %15105 = sst [smem:[#allocation10_spill]] %s12374_s25  ;;  %p539_p8 = scmp.lt.s32.totalorder %s12232_s21, 3 }
  0x15   : > { %s15106_s3 = scalar_select %p12376_p5, 1, 0 }
  0x16   : > { %s15108_s26 = scalar_select %p12380_p6, 1, 0 }
  0x17   : > { %15107 = sst [smem:[#allocation11_spill]] %s15106_s3  ;;  %p540_p9 = pnand %p8883_p7, %p539_p8 }
  0x18   : > { %15109 = sst [smem:[#allocation12_spill]] %s15108_s26  ;;  %s15110_s29 = sld [smem:[#allocation14_spill]] (!%p540_p9)  ;;  %v12234_v2 = vmov (!%p540_p9), 0   ;;  %v11267_v27 = vld [vmem:[%s15067_s5 + $0x40] sm:$0xff] (!%p540_p9)   ;;  %v11271_v32 = vld [vmem:[%s15067_s5 + $0x48] sm:$0xff] (!%p540_p9)   ;;  %v11275_v36 = vld [vmem:[%s15067_s5 + $0x50] sm:$0xff] (!%p540_p9)   ;;  %v619_v53 = vlaneseq (!%p540_p9) }
  0x19   : > { %543 = sbr.rel (%p540_p9) target bundleno = 9804 (0x264c), region = 96  ;;  %741 = vmatprep.mubr.bf16.mxu0 (!%p540_p9), %v12234_v2  ;;  %p594_p10 = scmp.lt.s32.totalorder (!%p540_p9), %s12359_s1, 1  ;;  %v11269_v30 = vld [vmem:[%s15067_s5] sm:$0xff] (!%p540_p9)   ;;  %v11273_v34 = vld [vmem:[%s15067_s5 + $0x8] sm:$0xff] (!%p540_p9)   ;;  %v11277_v38 = vld [vmem:[%s15067_s5 + $0x10] sm:$0xff] (!%p540_p9)   ;;  %vm12236_vm0 = vmmov (!%p540_p9), 0  }
  0x1a   : > { %s15111_s27 = sld [smem:[#allocation16_spill]] (!%p540_p9)  ;;  %s15112_s3 = sld [smem:[#allocation13_spill]] (!%p540_p9)  ;;  %v11279_v39 = vld [vmem:[%s15067_s5 + $0x58] sm:$0xff] (!%p540_p9)   ;;  %v11283_v41 = vld [vmem:[%s15067_s5 + $0x60] sm:$0xff] (!%p540_p9)   ;;  %v11287_v43 = vld [vmem:[%s15067_s5 + $0x68] sm:$0xff] (!%p540_p9)   ;;  %v12542_v54 = vshrl.u32 (!%p540_p9), %v619_v53, 7 }
  0x1b   : > { %v11281_v40 = vld [vmem:[%s15067_s5 + $0x18] sm:$0xff] (!%p540_p9)   ;;  %v11285_v42 = vld [vmem:[%s15067_s5 + $0x20] sm:$0xff] (!%p540_p9)   ;;  %v11289_v44 = vld [vmem:[%s15067_s5 + $0x28] sm:$0xff] (!%p540_p9)   ;;  %vm1279_vm1 = vcmask (!%p540_p9), 523264   ;;  %s15114_s4 = sld [smem:[#allocation17_spill]] (!%p540_p9)  ;;  %vm1344_vm2 = vcmask (!%p540_p9), 1043456  }
  0x1c   : > { %v11291_v45 = vld [vmem:[%s15067_s5 + $0x70] sm:$0xff] (!%p540_p9)   ;;  %v11295_v48 = vld [vmem:[%s15067_s5 + $0x78] sm:$0xff] (!%p540_p9)   ;;  %v11298_v51 = vld [vmem:[%s15069_s7 + $0x40] sm:$0xff] (!%p540_p9)   ;;  %v12545_v55 = vsub.s32 (!%p540_p9), 0, %v12542_v54  ;;  %v12548_v56 = vsub.s32 (!%p540_p9), 1, %v12542_v54  ;;  %vm1327_vm3 = vcmask (!%p540_p9), 64512  }
  0x1d   : > { %v11293_v46 = vld [vmem:[%s15067_s5 + $0x30] sm:$0xff] (!%p540_p9)   ;;  %v11297_v50 = vld [vmem:[%s15067_s5 + $0x38] sm:$0xff] (!%p540_p9)   ;;  %s15115_s24 = sld [smem:[#allocation8_spill]] (!%p540_p9)  ;;  %s591_s22 = sand.u32 (!%p540_p9), 1, %s12224_s30  }
  0x1e   : > { %v11242_v0 = vld [vmem:[%s15110_s29 + $0x4] ss:$8 sps:$4 sm:$0xff] (!%p540_p9)   ;;  %v11244_v1 = vld [vmem:[%s15110_s29] ss:$8 sps:$4 sm:$0xff] (!%p540_p9)   ;;  %v11245_v3 = vld [vmem:[%s15110_s29 + $0x14] ss:$8 sps:$4 sm:$0xff] (!%p540_p9)  }
  0x1f   : > { %709 = vmatprep.subr.bf16.mxu0 (!%p540_p9), %v11242_v0  ;;  %v11247_v4 = vld [vmem:[%s15110_s29 + $0x10] ss:$8 sps:$4 sm:$0xff] (!%p540_p9)   ;;  %v11248_v5 = vld [vmem:[%s15110_s29 + $0x24] ss:$8 sps:$4 sm:$0xff] (!%p540_p9)   ;;  %v11250_v6 = vld [vmem:[%s15110_s29 + $0x20] ss:$8 sps:$4 sm:$0xff] (!%p540_p9)  }
  0x20   : > { %710 = vmatpush1.bf16.msra.mxu0 %v11244_v1  ;;  %v11251_v7 = vld [vmem:[%s15110_s29 + $0x34] ss:$8 sps:$4 sm:$0xff]   ;;  %v11253_v8 = vld [vmem:[%s15110_s29 + $0x30] ss:$8 sps:$4 sm:$0xff]   ;;  %v11266_v9 = vld [vmem:[%s15111_s27 + $0x40] sm:$0xff]   ;;  %s595_s0 = scalar_select %p594_p10, %s12359_s1, 1 }
  0x21   : > { %711 = vmatprep.subr.bf16.mxu0 %v11245_v3  ;;  %v11254_v10 = vld [vmem:[%s15110_s29 + $0x44] ss:$8 sps:$4 sm:$0xff]   ;;  %10544 = vmatprep.subr.bf16.mxu1 %v11266_v9  ;;  %v11256_v12 = vld [vmem:[%s15110_s29 + $0x40] ss:$8 sps:$4 sm:$0xff]   ;;  %v11257_v14 = vld [vmem:[%s15110_s29 + $0x54] ss:$8 sps:$4 sm:$0xff]  }
  0x22   : > { %v11268_v11 = vld [vmem:[%s15111_s27] sm:$0xff]   ;;  %v11270_v13 = vld [vmem:[%s15111_s27 + $0x48] sm:$0xff]   ;;  %v11259_v16 = vld [vmem:[%s15110_s29 + $0x50] ss:$8 sps:$4 sm:$0xff]   ;;  %s8885_s25 = sshll.u32 %s595_s0, 3  ;;  %s15117_s1 = sld [smem:[#allocation18_spill]] }
  0x23   : > { %10545 = vmatpush3.bf16.msra.mxu1 %v11268_v11  ;;  %v11272_v15 = vld [vmem:[%s15111_s27 + $0x8] sm:$0xff]   ;;  %v11274_v17 = vld [vmem:[%s15111_s27 + $0x50] sm:$0xff]   ;;  %s597_s19 = scalar_lea.vmem %s15112_s3, %s8885_s25  ;;  %v11278_v21 = vld [vmem:[%s15111_s27 + $0x58] sm:$0xff]   ;;  %s15113_s25 = sld [smem:[#allocation15_spill]] }
  0x24   : > { %712 = vmatpush1.bf16.msra.mxu0 %v11247_v4  ;;  %10546 = vmatprep.subr.bf16.mxu1 %v11270_v13  ;;  %v11260_v18 = vld [vmem:[%s15110_s29 + $0x64] ss:$8 sps:$4 sm:$0xff]   ;;  %v11276_v19 = vld [vmem:[%s15111_s27 + $0x10] sm:$0xff]   ;;  %v11262_v20 = vld [vmem:[%s15110_s29 + $0x60] ss:$8 sps:$4 sm:$0xff]   ;;  %s8884_s3 = sshll.u32 %s591_s22, 4 }
  0x25   : > { %713 = vmatprep.subr.bf16.mxu0 %v11248_v5  ;;  %v11263_v22 = vld [vmem:[%s15110_s29 + $0x74] ss:$8 sps:$4 sm:$0xff]   ;;  %v11265_v23 = vld [vmem:[%s15110_s29 + $0x70] ss:$8 sps:$4 sm:$0xff]   ;;  %v599_v25 = vld [vmem:[%s597_s19] sm:$0xff]  ;;  %s10543_s20 = sshll.u32 %s15115_s24, 8 }
  0x26   : > { %v11280_v24 = vld [vmem:[%s15111_s27 + $0x18] sm:$0xff]   ;;  %v11282_v26 = vld [vmem:[%s15111_s27 + $0x60] sm:$0xff]   ;;  %v600_v29 = vpack.c.bf16 %v599_v25, %v599_v25  ;;  %v11286_v31 = vld [vmem:[%s15111_s27 + $0x68] sm:$0xff]   ;;  %s593_s2 = scalar_lea.vmem [#allocation2], %s8884_s3  ;;  %s8807_s0 = scalar_lea.sflag [#allocation3], %s591_s22 }
  0x27   : > { %10547 = vmatpush3.bf16.msra.mxu1 %v11272_v15  ;;  %v11284_v28 = vld [vmem:[%s15111_s27 + $0x20] sm:$0xff]   ;;  %v11288_v33 = vld [vmem:[%s15111_s27 + $0x28] sm:$0xff]   ;;  %v11290_v35 = vld [vmem:[%s15111_s27 + $0x70] sm:$0xff]   ;;  %s8821_s19 = sshll.u32 %s593_s2, 4  ;;  %s12237_s3 = smov [#allocation2]   ;;  %s15022_s19 = int_to_ptr.vmem [resolvable:$true] %s8821_s19 }
  0x28   : > { %714 = vmatpush1.bf16.msra.mxu0 %v11250_v6  ;;  %10548 = vmatprep.subr.bf16.mxu1 %v11274_v17  ;;  %v11292_v37 = vld [vmem:[%s15111_s27 + $0x30] sm:$0xff]   ;;  %v11294_v47 = vld [vmem:[%s15111_s27 + $0x78] sm:$0xff]   ;;  %v11299_v52 = vld [vmem:[%s15111_s27 + $0xc0] sm:$0xff]   ;;  %s12170_s24 = scalar_lea.vmem %s15022_s19, 256  ;;  %s12174_s26 = sshll.u32 %s12237_s3, 4  ;;  %s12175_s26 = int_to_ptr.vmem [resolvable:$false] %s12174_s26 }
  0x29   : > { %715 = vmatprep.subr.bf16.mxu0 %v11251_v7  ;;  %v11296_v49 = vld [vmem:[%s15111_s27 + $0x38] sm:$0xff]   ;;  %v617_v57 = vld [vmem:[%s15113_s25] sm:$0x3]  ;;  %v11302_v6 = vld [vmem:[%s15069_s7 + $0x48] sm:$0xff]   ;;  %s15020_s25 = scalar_lea.hbm %s15117_s1, %s10543_s20  ;;  %p12171_p11 = scmp.ne.s32.totalorder %s15022_s19, %s12170_s24 }
  0x2a   : > { %v622_v58 = vrot.slane %v617_v57, %v12545_v55  ;;  %v626_v59 = vrot.slane %v617_v57, %v12548_v56  ;;  %v11300_v1 = vld [vmem:[%s15069_s7] sm:$0xff]   ;;  %v11303_v7 = vld [vmem:[%s15111_s27 + $0xc8] sm:$0xff]   ;;  %v11306_v11 = vld [vmem:[%s15069_s7 + $0x50] sm:$0xff]   ;;  %p12177_p0 = scmp.lt.s32.totalorder %s15022_s19, %s12175_s26 }
  0x2b   : > { %10549 = vmatpush3.bf16.msra.mxu1 %v11276_v19  ;;  %v11301_v3 = vld [vmem:[%s15111_s27 + $0x80] sm:$0xff]   ;;  %v11304_v9 = vld [vmem:[%s15069_s7 + $0x8] sm:$0xff]   ;;  %v11308_v13 = vld [vmem:[%s15069_s7 + $0x10] sm:$0xff]   ;;  %p12172_p12 = pnand %p12171_p11, %p12376_p5 }
  0x2c   : > { %716 = vmatpush1.bf16.msra.mxu0 %v11253_v8  ;;  %10550 = vmatprep.subr.bf16.mxu1 %v11278_v21  ;;  %v11310_v15 = vld [vmem:[%s15069_s7 + $0x58] sm:$0xff]   ;;  %v11314_v19 = vld [vmem:[%s15069_s7 + $0x60] sm:$0xff]   ;;  %v11320_v25 = vld [vmem:[%s15069_s7 + $0x28] sm:$0xff]  }
  0x2d   : > { %717 = vmatprep.subr.bf16.mxu0 %v11254_v10  ;;  %v11305_v10 = vld [vmem:[%s15111_s27 + $0x88] sm:$0xff]   ;;  %v11312_v17 = vld [vmem:[%s15069_s7 + $0x18] sm:$0xff]   ;;  %v11316_v21 = vld [vmem:[%s15069_s7 + $0x20] sm:$0xff]   ;;  %p12173_p13 = pneg %p12172_p12 }
  0x2f   : > { %10551 = vmatpush3.bf16.msra.mxu1 %v11280_v24  ;;  %v11319_v24 = vld [vmem:[%s15111_s27 + $0xe8] sm:$0xff]  }
  0x30   : > { %718 = vmatpush1.bf16.msra.mxu0 %v11256_v12  ;;  %10552 = vmatprep.subr.bf16.mxu1 %v11282_v26  ;;  %v11307_v12 = vld [vmem:[%s15111_s27 + $0xd0] sm:$0xff]   ;;  %v11321_v26 = vld [vmem:[%s15111_s27 + $0xa8] sm:$0xff]  }
  0x31   : > { %719 = vmatprep.subr.bf16.mxu0 %v11257_v14  ;;  %v11309_v14 = vld [vmem:[%s15111_s27 + $0x90] sm:$0xff]  }
  0x33   : > { %10553 = vmatpush3.bf16.msra.mxu1 %v11284_v28  ;;  %v11323_v28 = vld [vmem:[%s15111_s27 + $0xf0] sm:$0xff]  }
  0x34   : > { %720 = vmatpush1.bf16.msra.mxu0 %v11259_v16  ;;  %10554 = vmatprep.subr.bf16.mxu1 %v11286_v31  ;;  %v11311_v16 = vld [vmem:[%s15111_s27 + $0xd8] sm:$0xff]  }
  0x35   : > { %721 = vmatprep.subr.bf16.mxu0 %v11260_v18  ;;  %v11313_v18 = vld [vmem:[%s15111_s27 + $0x98] sm:$0xff]  }
  0x36   : > { %v11326_v31 = vld [vmem:[%s15069_s7 + $0x78] sm:$0xff]  }
  0x37   : > { %10555 = vmatpush3.bf16.msra.mxu1 %v11288_v33  ;;  %v11328_v33 = vld [vmem:[%s15069_s7 + $0x38] sm:$0xff]  }
  0x38   : > { %722 = vmatpush1.bf16.msra.mxu0 %v11262_v20  ;;  %10556 = vmatprep.subr.bf16.mxu1 %v11290_v35  ;;  %v11315_v20 = vld [vmem:[%s15111_s27 + $0xe0] sm:$0xff]  }
  0x39   : > { %723 = vmatprep.subr.bf16.mxu0 %v11263_v22  ;;  %v11317_v22 = vld [vmem:[%s15111_s27 + $0xa0] sm:$0xff]  }
  0x3a   : > { %v11330_v35 = vld [vmem:[%s15069_s7 + $0xc0] sm:$0xff]  }
  0x3b   : > { %10557 = vmatpush3.bf16.msra.mxu1 %v11292_v37  ;;  %v11332_v37 = vld [vmem:[%s15069_s7 + $0xc8] sm:$0xff]  }
  0x3c   : > { %724 = vmatpush1.bf16.msra.mxu0 %v11265_v23  ;;  %10558 = vmatprep.subr.bf16.mxu1 %v11294_v47  ;;  %v11318_v23 = vld [vmem:[%s15069_s7 + $0x68] sm:$0xff]   ;;  %v11342_v47 = vld [vmem:[%s15069_s7 + $0xf0] sm:$0xff]  }
  0x3d   : > { %10566 = vmatprep.subr.bf16.mxu0 %v11267_v27  ;;  %v11322_v27 = vld [vmem:[%s15069_s7 + $0x70] sm:$0xff]  }
  0x3f   : > { %742 = vmatmul.mubr.bf16.vlgmr.msra.gmra.mrb[0].mxu0 %v600_v29  ;;  %10559 = vmatpush3.bf16.msra.mxu1 %v11296_v49  ;;  %v11324_v29 = vld [vmem:[%s15069_s7 + $0x30] sm:$0xff]   ;;  %v11344_v49 = vld [vmem:[%s15069_s7 + $0xf8] sm:$0xff]  }
  0x40   : > { %10567 = vmatpush3.bf16.msra.mxu0 %v11269_v30  ;;  %10588 = vmatprep.subr.bf16.mxu1 %v11298_v51  ;;  %v11325_v30 = vld [vmem:[%s15111_s27 + $0xb0] sm:$0xff]   ;;  %v12235_v51 = vmov 0.0  }
  0x41   : > { %10568 = vmatprep.subr.bf16.mxu0 %v11271_v32  ;;  %v11327_v32 = vld [vmem:[%s15111_s27 + $0xf8] sm:$0xff]  }
  0x44   : > { %10569 = vmatpush3.bf16.msra.mxu0 %v11273_v34  ;;  %v11329_v34 = vld [vmem:[%s15111_s27 + $0xb8] sm:$0xff]  }
  0x45   : > { %10570 = vmatprep.subr.bf16.mxu0 %v11275_v36  ;;  %v11331_v36 = vld [vmem:[%s15069_s7 + $0x80] sm:$0xff]  }
  0x48   : > { %10571 = vmatpush3.bf16.msra.mxu0 %v11277_v38  ;;  %v11333_v38 = vld [vmem:[%s15069_s7 + $0x88] sm:$0xff]  }
  0x49   : > { %10572 = vmatprep.subr.bf16.mxu0 %v11279_v39  ;;  %v11334_v39 = vld [vmem:[%s15069_s7 + $0xd0] sm:$0xff]  }
  0x4c   : > { %10573 = vmatpush3.bf16.msra.mxu0 %v11281_v40  ;;  %v11335_v40 = vld [vmem:[%s15069_s7 + $0x90] sm:$0xff]  }
  0x4d   : > { %10574 = vmatprep.subr.bf16.mxu0 %v11283_v41  ;;  %v11336_v41 = vld [vmem:[%s15069_s7 + $0xd8] sm:$0xff]  }
  0x50   : > { %10575 = vmatpush3.bf16.msra.mxu0 %v11285_v42  ;;  %v11337_v42 = vld [vmem:[%s15069_s7 + $0x98] sm:$0xff]  }
  0x51   : > { %10576 = vmatprep.subr.bf16.mxu0 %v11287_v43  ;;  %v11338_v43 = vld [vmem:[%s15069_s7 + $0xe0] sm:$0xff]  }
  0x54   : > { %10577 = vmatpush3.bf16.msra.mxu0 %v11289_v44  ;;  %v11339_v44 = vld [vmem:[%s15069_s7 + $0xa0] sm:$0xff]  }
  0x55   : > { %10578 = vmatprep.subr.bf16.mxu0 %v11291_v45  ;;  %v11340_v45 = vld [vmem:[%s15069_s7 + $0xe8] sm:$0xff]  }
  0x58   : > { %10579 = vmatpush3.bf16.msra.mxu0 %v11293_v46  ;;  %v11341_v46 = vld [vmem:[%s15069_s7 + $0xa8] sm:$0xff]  }
  0x59   : > { %10580 = vmatprep.subr.bf16.mxu0 %v11295_v48  ;;  %v11343_v48 = vld [vmem:[%s15069_s7 + $0xb0] sm:$0xff]  }
  0x5c   : > { %10581 = vmatpush3.bf16.msra.mxu0 %v11297_v50  ;;  %v11345_v50 = vld [vmem:[%s15069_s7 + $0xb8] sm:$0xff]  }
  0x5d   : > { %10614 = vmatprep.subr.bf16.mxu0 %v11299_v52 }
 0x112   : > { %v743_v60 = vpop.f32.mrb[0].mxu0 }
 0x113   : > { %v12555_v61 = vadd.f32 %v743_v60, %v622_v58  ;;  %v745_v62 = vpop.f32.mrb[1].mxu0  ;;  %v8919_v58 = vld [vmem:[%s15068_s6] ss:$0 sm:$0xff] }
 0x114   : > { %v12557_v63 = vadd.f32 %v745_v62, %v626_v59  ;;  %v747_v0 = vpop.f32.mrb[2].mxu0 }
 0x115   : > { %v748_v4 = vpop.f32.mrb[3].mxu0  ;;  %v12577_v8 = vpack.c.bf16 %v12555_v61, %v12555_v61 }
 0x116   : > { %v12567_v5 = vpack.c.bf16 %v12557_v63, %v12557_v63 }
 0x118   : > { %919 = vmatprep.mubr.bf16.mxu1 %v12567_v5  ;;  %1094 = vmatprep.mubr.bf16.mxu0 %v12567_v5 }
 0x119   : > { %920 = vmatmul.mubr.bf16.vlgmr.msra.gmra.mrb[0].mxu1 %v12577_v8  ;;  %1095 = vmatmul.mubr.bf16.vlgmr.msra.gmra.mrb[4].mxu0 %v12577_v8 }
 0x11a   : > { %10589 = vmatpush3.bf16.msra.mxu1 %v11300_v1  ;;  %10615 = vmatpush3.bf16.msra.mxu0 %v11301_v3 }
 0x11b   : > { %1269 = vmatprep.mubr.bf16.mxu1 %v12567_v5  ;;  %1566 = vmatprep.mubr.bf16.mxu0 %v12567_v5 }
 0x11c   : > { %10590 = vmatprep.subr.bf16.mxu1 %v11302_v6  ;;  %10616 = vmatprep.subr.bf16.mxu0 %v11303_v7 }
 0x11e   : > { %10591 = vmatpush3.bf16.msra.mxu1 %v11304_v9  ;;  %10617 = vmatpush3.bf16.msra.mxu0 %v11305_v10  ;;  %v8902_v9 = vld [vmem:[%s15114_s4] ss:$0 sm:$0xff] }
 0x11f   : > { %10592 = vmatprep.subr.bf16.mxu1 %v11306_v11  ;;  %10618 = vmatprep.subr.bf16.mxu0 %v11307_v12 }
 0x122   : > { %10593 = vmatpush3.bf16.msra.mxu1 %v11308_v13  ;;  %10619 = vmatpush3.bf16.msra.mxu0 %v11309_v14 }
 0x123   : > { %10594 = vmatprep.subr.bf16.mxu1 %v11310_v15  ;;  %10620 = vmatprep.subr.bf16.mxu0 %v11311_v16  ;;  %v8936_v15 = vld [vmem:[%s15070_s8] ss:$0 sm:$0xff] }
 0x126   : > { %10595 = vmatpush3.bf16.msra.mxu1 %v11312_v17  ;;  %10621 = vmatpush3.bf16.msra.mxu0 %v11313_v18 }
 0x127   : > { %10596 = vmatprep.subr.bf16.mxu1 %v11314_v19  ;;  %10622 = vmatprep.subr.bf16.mxu0 %v11315_v20 }
 0x12a   : > { %10597 = vmatpush3.bf16.msra.mxu1 %v11316_v21  ;;  %10623 = vmatpush3.bf16.msra.mxu0 %v11317_v22 }
 0x12b   : > { %10598 = vmatprep.subr.bf16.mxu1 %v11318_v23  ;;  %10624 = vmatprep.subr.bf16.mxu0 %v11319_v24 }
 0x12e   : > { %10599 = vmatpush3.bf16.msra.mxu1 %v11320_v25  ;;  %10625 = vmatpush3.bf16.msra.mxu0 %v11321_v26 }
 0x12f   : > { %10600 = vmatprep.subr.bf16.mxu1 %v11322_v27  ;;  %10626 = vmatprep.subr.bf16.mxu0 %v11323_v28 }
 0x132   : > { %10601 = vmatpush3.bf16.msra.mxu1 %v11324_v29  ;;  %10627 = vmatpush3.bf16.msra.mxu0 %v11325_v30 }
 0x133   : > { %10602 = vmatprep.subr.bf16.mxu1 %v11326_v31  ;;  %10628 = vmatprep.subr.bf16.mxu0 %v11327_v32 }
 0x136   : > { %10603 = vmatpush3.bf16.msra.mxu1 %v11328_v33  ;;  %10629 = vmatpush3.bf16.msra.mxu0 %v11329_v34 }
 0x137   : > { %10658 = vmatprep.subr.bf16.mxu0 %v11330_v35  ;;  %11104 = vmatprep.subr.bf16.mxu1 %v12235_v51 }
 0x139   : > { %1270 = vmatmul.mubr.bf16.vlgmr.msra.gmra.mrb[4].mxu1 %v12577_v8  ;;  %1567 = vmatmul.mubr.bf16.vlgmr.msra.gmra.mrb[8].mxu0 %v12577_v8 }
 0x13a   : > { %10659 = vmatpush3.bf16.msra.mxu0 %v11331_v36  ;;  %1920 = vmatprep.mubr.bf16.mxu0 %v12567_v5 }
 0x13b   : > { %10660 = vmatprep.subr.bf16.mxu0 %v11332_v37  ;;  %11106 = vmatprep.mubr.msk.bf16.mxu1 %vm12236_vm0, %v12235_v51 }
 0x13e   : > { %10661 = vmatpush3.bf16.msra.mxu0 %v11333_v38 }
 0x13f   : > { %10662 = vmatprep.subr.bf16.mxu0 %v11334_v39 }
 0x142   : > { %10663 = vmatpush3.bf16.msra.mxu0 %v11335_v40 }
 0x143   : > { %10664 = vmatprep.subr.bf16.mxu0 %v11336_v41 }
 0x146   : > { %10665 = vmatpush3.bf16.msra.mxu0 %v11337_v42 }
 0x147   : > { %10666 = vmatprep.subr.bf16.mxu0 %v11338_v43  ;;  %v11346_v43 = vld [vmem:[%s15067_s5 + $0xc0] sm:$0xff]  }
 0x14a   : > { %10667 = vmatpush3.bf16.msra.mxu0 %v11339_v44  ;;  %v11362_v44 = vld [vmem:[%s15071_s9] ss:$8 sps:$4 sm:$0xff]  }
 0x14b   : > { %10668 = vmatprep.subr.bf16.mxu0 %v11340_v45  ;;  %v11364_v45 = vld [vmem:[%s15071_s9 + $0x4] ss:$8 sps:$4 sm:$0xff]  }
 0x14e   : > { %10669 = vmatpush3.bf16.msra.mxu0 %v11341_v46  ;;  %v11367_v46 = vld [vmem:[%s15071_s9 + $0x14] ss:$8 sps:$4 sm:$0xff]  }
 0x14f   : > { %10670 = vmatprep.subr.bf16.mxu0 %v11342_v47  ;;  %v11365_v47 = vld [vmem:[%s15071_s9 + $0x10] ss:$8 sps:$4 sm:$0xff]  }
 0x152   : > { %10671 = vmatpush3.bf16.msra.mxu0 %v11343_v48  ;;  %v11370_v48 = vld [vmem:[%s15071_s9 + $0x24] ss:$8 sps:$4 sm:$0xff]  }
 0x153   : > { %10672 = vmatprep.subr.bf16.mxu0 %v11344_v49  ;;  %v11368_v49 = vld [vmem:[%s15071_s9 + $0x20] ss:$8 sps:$4 sm:$0xff]  }
 0x156   : > { %10673 = vmatpush3.bf16.msra.mxu0 %v11345_v50  ;;  %v11373_v50 = vld [vmem:[%s15071_s9 + $0x34] ss:$8 sps:$4 sm:$0xff]  }
 0x157   : > { %2173 = vmatprep.subr.bf16.mxu0 %v11364_v45 }
 0x159   : > { %1921 = vmatmul.mubr.bf16.vlgmr.msra.gmra.mrb[12].mxu0 %v12577_v8 }
 0x15a   : > { %2205 = vmatprep.mubr.bf16.mxu0 %v12234_v2  ;;  %2174 = vmatpush1.bf16.msra.mxu0 %v11362_v44 }
 0x15b   : > { %2175 = vmatprep.subr.bf16.mxu0 %v11367_v46  ;;  %v9088_v46 = vld [vmem:[%s15070_s8 + $0x1] ss:$0 sm:$0xff] }
 0x15e   : > { %2176 = vmatpush1.bf16.msra.mxu0 %v11365_v47 }
 0x15f   : > { %2177 = vmatprep.subr.bf16.mxu0 %v11370_v48  ;;  %v8988_v48 = vld [vmem:[%s15114_s4 + $0x1] ss:$0 sm:$0xff] }
 0x162   : > { %2178 = vmatpush1.bf16.msra.mxu0 %v11368_v49 }
 0x163   : > { %2179 = vmatprep.subr.bf16.mxu0 %v11373_v50 }
 0x1ec   : > { %v10560_v52 = vpop.f32.mrb[0].mxu1  ;;  %v10582_v53 = vpop.f32.mrb[4].mxu0 }
 0x1ed   : > { %v10561_v57 = vpop.f32.mrb[1].mxu1  ;;  %v10583_v59 = vpop.f32.mrb[5].mxu0 }
 0x1ee   : > { %v10562_v60 = vadd.f32 %v10561_v57, %v10560_v52  ;;  %v10584_v62 = vadd.f32 %v10583_v59, %v10582_v53  ;;  %v10563_v0 = vpop.f32.mrb[2].mxu1  ;;  %v10585_v1 = vpop.f32.mrb[6].mxu0  ;;  %v11371_v52 = vld [vmem:[%s15071_s9 + $0x30] ss:$8 sps:$4 sm:$0xff]   ;;  %v11347_v59 = vld [vmem:[%s15067_s5 + $0x80] sm:$0xff]  }
 0x1ef   : > { %v10564_v3 = vpop.f32.mrb[3].mxu1  ;;  %v10586_v4 = vpop.f32.mrb[7].mxu0  ;;  %2180 = vmatpush1.bf16.msra.mxu0 %v11371_v52  ;;  %v11349_v0 = vld [vmem:[%s15067_s5 + $0x88] sm:$0xff]   ;;  %v11350_v1 = vld [vmem:[%s15067_s5 + $0xd0] sm:$0xff]  }
 0x1f0   : > { %v1097_v6 = vadd.f32 %v10584_v62, %v8919_v58  ;;  %v922_v11 = vadd.f32 %v10562_v60, %v8902_v9  ;;  %v11348_v62 = vld [vmem:[%s15067_s5 + $0xc8] sm:$0xff]   ;;  %v11351_v3 = vld [vmem:[%s15067_s5 + $0x90] sm:$0xff]   ;;  %v11352_v4 = vld [vmem:[%s15067_s5 + $0xd8] sm:$0xff]  }
 0x1f1   : > { %v11355_v9 = vld [vmem:[%s15067_s5 + $0xa0] sm:$0xff]  }
 0x1f2   : > { %v1278_v7 = vpack.c.bf16 %v1097_v6, %v1097_v6  ;;  %v1277_v12 = vpack.c.bf16 %v922_v11, %v922_v11  ;;  %v11353_v6 = vld [vmem:[%s15067_s5 + $0x98] sm:$0xff]   ;;  %v11357_v11 = vld [vmem:[%s15067_s5 + $0xa8] sm:$0xff]  }
 0x1f4   : > { %v1284_v10 = vsel %vm1279_vm1, %v1278_v7, 0  ;;  %v11354_v7 = vld [vmem:[%s15067_s5 + $0xe0] sm:$0xff]  }
 0x1f5   : > { %11105 = vmatpush3.bf16.xpose.msra.mxu1 %v1284_v10  ;;  %v11356_v10 = vld [vmem:[%s15067_s5 + $0xe8] sm:$0xff]  }
 0x1f6   : > { %11110 = vmatprep.subr.bf16.mxu1 %v12235_v51 }
 0x1fc   : > { %11107 = vmatmul.mubr.msk.bf16.vlgmr.msra.gmra.mrb[8].mxu1 %vm1279_vm1, %v1277_v12  ;;  %v11358_v12 = vld [vmem:[%s15067_s5 + $0xf0] sm:$0xff]  }
 0x1fd   : > { %11112 = vmatprep.mubr.msk.bf16.mxu1 %vm12236_vm0, %v12235_v51 }
 0x20c   : > { %v10604_v13 = vpop.f32.mrb[4].mxu1  ;;  %v10630_v14 = vpop.f32.mrb[8].mxu0 }
 0x20d   : > { %v10605_v16 = vpop.f32.mrb[5].mxu1  ;;  %v10631_v17 = vpop.f32.mrb[9].mxu0 }
 0x20e   : > { %v10606_v18 = vadd.f32 %v10605_v16, %v10604_v13  ;;  %v12733_v19 = vadd.f32 %v10631_v17, %v10630_v14  ;;  %v10607_v20 = vpop.f32.mrb[6].mxu1  ;;  %v10633_v21 = vpop.f32.mrb[10].mxu0  ;;  %v11359_v13 = vld [vmem:[%s15067_s5 + $0xb0] sm:$0xff]   ;;  %v11360_v14 = vld [vmem:[%s15067_s5 + $0xf8] sm:$0xff]   ;;  %v11374_v16 = vld [vmem:[%s15067_s5 + $0x140] sm:$0xff]  }
 0x20f   : > { %v10608_v22 = vpop.f32.mrb[7].mxu1  ;;  %v10634_v23 = vpop.f32.mrb[11].mxu0  ;;  %10706 = vmatprep.subr.bf16.mxu0 %v11374_v16 }
 0x210   : > { %v1272_v24 = vadd.f32 %v10606_v18, %v8936_v15  ;;  %v11361_v15 = vld [vmem:[%s15067_s5 + $0xb8] sm:$0xff]   ;;  %v11375_v18 = vld [vmem:[%s15067_s5 + $0x100] sm:$0xff]   ;;  %v11376_v22 = vld [vmem:[%s15067_s5 + $0x148] sm:$0xff]   ;;  %v1569_v52 = vadd.f32 %v12733_v19, %v8988_v48 }
 0x211   : > { %v9216_v19 = vld [vmem:[%s15068_s6 + $0x2] ss:$0 sm:$0xff]  ;;  %v11409_v48 = vld [vmem:[%s15111_s27 + $0x118] sm:$0xff]  }
 0x212   : > { %v1340_v25 = vpack.c.bf16 %v1272_v24, %v1272_v24 }
 0x214   : > { %v1346_v26 = vsel %vm1344_vm2, %v1340_v25, 0  ;;  %v11377_v25 = vld [vmem:[%s15067_s5 + $0x108] sm:$0xff]  }
 0x215   : > { %11111 = vmatpush3.bf16.msra.mxu1 %v1346_v26  ;;  %v11378_v26 = vld [vmem:[%s15067_s5 + $0x150] sm:$0xff]  }
 0x216   : > { %10636 = vmatprep.subr.bf16.mxu1 %v11346_v43 }
 0x22c   : > { %v10674_v27 = vpop.f32.mrb[12].mxu0 }
 0x22d   : > { %v10675_v28 = vpop.f32.mrb[13].mxu0 }
 0x22e   : > { %v12736_v29 = vadd.f32 %v10675_v28, %v10674_v27  ;;  %v10677_v30 = vpop.f32.mrb[14].mxu0  ;;  %v11379_v27 = vld [vmem:[%s15067_s5 + $0x110] sm:$0xff]   ;;  %v11380_v28 = vld [vmem:[%s15067_s5 + $0x158] sm:$0xff]  }
 0x22f   : > { %v10678_v31 = vpop.f32.mrb[15].mxu0  ;;  %v11381_v30 = vld [vmem:[%s15067_s5 + $0x118] sm:$0xff]  }
 0x230   : > { %v11382_v31 = vld [vmem:[%s15067_s5 + $0x160] sm:$0xff]   ;;  %v1923_v49 = vadd.f32 %v12736_v29, %v9088_v46  ;;  %v11407_v46 = vld [vmem:[%s15111_s27 + $0x110] sm:$0xff]  }
 0x2cf   : > { %v1320_v32 = vpop.f32.mrb[8].mxu1 }
 0x2d0   : > { %v1326_v33 = vmul.f32 0.125, %v1320_v32  ;;  %v11108_v34 = vpop.f32.mrb[9].mxu1  ;;  %v11383_v32 = vld [vmem:[%s15067_s5 + $0x120] sm:$0xff]  }
 0x2d1   : > { %v1323_v35 = vpop.f32.mrb[10].mxu1  ;;  %v11385_v34 = vld [vmem:[%s15067_s5 + $0x128] sm:$0xff]  }
 0x2d2   : > { %v11109_v36 = vpop.f32.mrb[11].mxu1  ;;  %v1328_v37 = vsel %vm1327_vm3, %v1326_v33, -inf  ;;  %v11386_v35 = vld [vmem:[%s15067_s5 + $0x170] sm:$0xff]  }
 0x2d3   : > { %1329 = vmax.xlane.f32.xlu0 %v1328_v37  ;;  %v11387_v36 = vld [vmem:[%s15067_s5 + $0x130] sm:$0xff]   ;;  %v11388_v37 = vld [vmem:[%s15067_s5 + $0x178] sm:$0xff]  }
 0x360   : > { %v1330_v38 = vpop.xlane.xlu0 %1329 }
 0x361   : > { %v1331_v39 = vsub.f32 %v1326_v33, %v1330_v38  ;;  %v11384_v33 = vld [vmem:[%s15067_s5 + $0x168] sm:$0xff]   ;;  %v11389_v38 = vld [vmem:[%s15067_s5 + $0x138] sm:$0xff]  }
 0x363   : > { %v1332_v40 = vmul.f32 1.442695, %v1331_v39 }
 0x365   : > { %12130 = vpow2.f32 %v1332_v40  ;;  %v9038_v40 = vld [vmem:[%s15068_s6 + $0x1] ss:$0 sm:$0xff] }
 0x36f   : > { %v12131_v41 = vpop.eup %12130 }
 0x370   : > { %v1334_v42 = vsel %vm1327_vm3, %v12131_v41, 0.0 }
 0x371   : > { %1335 = vadd.xlane.f32.xlu0 %v1334_v42 }
 0x3fe   : > { %v1336_v53 = vpop.xlane.xlu0 %1335 }
 0x3ff   : > { %12132 = vrcp.f32 %v1336_v53  ;;  %v1989_v53 = vpack.c.bf16 %v1923_v49, %v1923_v49  ;;  %v11410_v49 = vld [vmem:[%s15111_s27 + $0x160] sm:$0xff]  }
 0x409   : > { %v12133_v57 = vpop.eup %12132 }
 0x40a   : > { %v1338_v58 = vmul.f32 %v12133_v57, %v12131_v41  ;;  %v1928_v57 = vpack.c.bf16 %v1569_v52, %v1569_v52  ;;  %v11412_v52 = vld [vmem:[%s15111_s27 + $0x168] sm:$0xff]  }
 0x40c   : > { %v1339_v60 = vpack.c.bf16 %v1338_v58, %v1338_v58  ;;  %v1994_v58 = vsel %vm1344_vm2, %v1989_v53, 0  ;;  %v11413_v53 = vld [vmem:[%s15111_s27 + $0x128] sm:$0xff]  }
 0x40e   : > { %11113 = vmatmul.mubr.msk.bf16.vlgmr.msra.gmra.mrb[12].mxu1 %vm1327_vm3, %v1339_v60 }
 0x40f   : > { %10637 = vmatpush3.bf16.msra.mxu1 %v11347_v59  ;;  %1743 = vmatprep.mubr.bf16.mxu1 %v12567_v5 }
 0x410   : > { %10638 = vmatprep.subr.bf16.mxu1 %v11348_v62 }
 0x413   : > { %10639 = vmatpush3.bf16.msra.mxu1 %v11349_v0 }
 0x414   : > { %10640 = vmatprep.subr.bf16.mxu1 %v11350_v1 }
 0x417   : > { %10641 = vmatpush3.bf16.msra.mxu1 %v11351_v3 }
 0x418   : > { %10642 = vmatprep.subr.bf16.mxu1 %v11352_v4 }
 0x41b   : > { %10643 = vmatpush3.bf16.msra.mxu1 %v11353_v6 }
 0x41c   : > { %10644 = vmatprep.subr.bf16.mxu1 %v11354_v7 }
 0x41f   : > { %10645 = vmatpush3.bf16.msra.mxu1 %v11355_v9 }
 0x420   : > { %10646 = vmatprep.subr.bf16.mxu1 %v11356_v10 }
 0x423   : > { %10647 = vmatpush3.bf16.msra.mxu1 %v11357_v11 }
 0x424   : > { %10648 = vmatprep.subr.bf16.mxu1 %v11358_v12 }
 0x427   : > { %10649 = vmatpush3.bf16.msra.mxu1 %v11359_v13 }
 0x428   : > { %10650 = vmatprep.subr.bf16.mxu1 %v11360_v14 }
 0x42b   : > { %10651 = vmatpush3.bf16.msra.mxu1 %v11361_v15 }
 0x42c   : > { %11116 = vmatprep.subr.bf16.mxu1 %v12235_v51 }
 0x42e   : > { %1744 = vmatmul.mubr.bf16.vlgmr.msra.gmra.mrb[16].mxu1 %v12577_v8 }
 0x42f   : > { %11118 = vmatprep.mubr.msk.bf16.mxu1 %vm12236_vm0, %v12235_v51 }
 0x4e1   : > { %v1382_v17 = vpop.f32.mrb[12].mxu1 }
 0x4e2   : > { %v1388_v20 = vpack.c.bf16 %v1382_v17, %v1382_v17  ;;  %v11114_v21 = vpop.f32.mrb[13].mxu1 }
 0x4e3   : > { %v1385_v23 = vpop.f32.mrb[14].mxu1 }
 0x4e4   : > { %v11115_v24 = vpop.f32.mrb[15].mxu1  ;;  %9132 = vmatmul.mubr.msk.bf16.vlgmr.msra.gmra.mrb[16].mxu0 %vm1279_vm1, %v1388_v20  ;;  %v11392_v23 = vld [vmem:[%s15071_s9 + $0x44] ss:$8 sps:$4 sm:$0xff]  }
 0x4e5   : > { %10707 = vmatpush3.bf16.msra.mxu0 %v11375_v18  ;;  %2560 = vmatprep.mubr.bf16.mxu0 %v12567_v5 }
 0x4e6   : > { %10708 = vmatprep.subr.bf16.mxu0 %v11376_v22 }
 0x4e9   : > { %10709 = vmatpush3.bf16.msra.mxu0 %v11377_v25 }
 0x4ea   : > { %10710 = vmatprep.subr.bf16.mxu0 %v11378_v26 }
 0x4ed   : > { %10711 = vmatpush3.bf16.msra.mxu0 %v11379_v27  ;;  %v11390_v27 = vld [vmem:[%s15071_s9 + $0x40] ss:$8 sps:$4 sm:$0xff]  }
 0x4ee   : > { %10712 = vmatprep.subr.bf16.mxu0 %v11380_v28 }
 0x4f1   : > { %10713 = vmatpush3.bf16.msra.mxu0 %v11381_v30  ;;  %v11395_v30 = vld [vmem:[%s15071_s9 + $0x54] ss:$8 sps:$4 sm:$0xff]  }
 0x4f2   : > { %10714 = vmatprep.subr.bf16.mxu0 %v11382_v31  ;;  %v11393_v31 = vld [vmem:[%s15071_s9 + $0x50] ss:$8 sps:$4 sm:$0xff]  }
 0x4f5   : > { %10715 = vmatpush3.bf16.msra.mxu0 %v11383_v32  ;;  %v11398_v32 = vld [vmem:[%s15071_s9 + $0x64] ss:$8 sps:$4 sm:$0xff]  }
 0x4f6   : > { %10716 = vmatprep.subr.bf16.mxu0 %v11384_v33  ;;  %v11396_v33 = vld [vmem:[%s15071_s9 + $0x60] ss:$8 sps:$4 sm:$0xff]  }
 0x4f9   : > { %10717 = vmatpush3.bf16.msra.mxu0 %v11385_v34  ;;  %v11401_v34 = vld [vmem:[%s15071_s9 + $0x74] ss:$8 sps:$4 sm:$0xff]  }
 0x4fa   : > { %10718 = vmatprep.subr.bf16.mxu0 %v11386_v35  ;;  %v11399_v35 = vld [vmem:[%s15071_s9 + $0x70] ss:$8 sps:$4 sm:$0xff]  }
 0x4fd   : > { %10719 = vmatpush3.bf16.msra.mxu0 %v11387_v36  ;;  %v11402_v36 = vld [vmem:[%s15111_s27 + $0x140] sm:$0xff]  }
 0x4fe   : > { %10720 = vmatprep.subr.bf16.mxu0 %v11388_v37 }
 0x501   : > { %v10652_v39 = vpop.f32.mrb[16].mxu1  ;;  %10721 = vmatpush3.bf16.msra.mxu0 %v11389_v38  ;;  %v11403_v38 = vld [vmem:[%s15111_s27 + $0x100] sm:$0xff]  }
 0x502   : > { %v10653_v41 = vpop.f32.mrb[17].mxu1  ;;  %11128 = vmatprep.subr.bf16.mxu0 %v12235_v51 }
 0x503   : > { %v10654_v42 = vadd.f32 %v10653_v41, %v10652_v39  ;;  %v10655_v43 = vpop.f32.mrb[18].mxu1  ;;  %v11404_v41 = vld [vmem:[%s15111_s27 + $0x148] sm:$0xff]  }
 0x504   : > { %v10656_v44 = vpop.f32.mrb[19].mxu1  ;;  %2561 = vmatmul.mubr.bf16.vlgmr.msra.gmra.mrb[20].mxu0 %v12577_v8 }
 0x505   : > { %v1746_v45 = vadd.f32 %v10654_v42, %v9038_v40  ;;  %11130 = vmatprep.mubr.msk.bf16.mxu0 %vm12236_vm0, %v12235_v51  ;;  %v11405_v44 = vld [vmem:[%s15111_s27 + $0x108] sm:$0xff]  }
 0x507   : > { %v1929_v47 = vpack.c.bf16 %v1746_v45, %v1746_v45  ;;  %v11406_v45 = vld [vmem:[%s15111_s27 + $0x150] sm:$0xff]  }
 0x509   : > { %v1934_v50 = vsel %vm1279_vm1, %v1929_v47, 0  ;;  %v11408_v47 = vld [vmem:[%s15111_s27 + $0x158] sm:$0xff]  }
 0x50a   : > { %11117 = vmatpush3.bf16.xpose.msra.mxu1 %v1934_v50  ;;  %v11411_v50 = vld [vmem:[%s15111_s27 + $0x120] sm:$0xff]  }
 0x50b   : > { %11122 = vmatprep.subr.bf16.mxu1 %v12235_v51 }
 0x511   : > { %11119 = vmatmul.mubr.msk.bf16.vlgmr.msra.gmra.mrb[20].mxu1 %vm1279_vm1, %v1928_v57  ;;  %v11414_v57 = vld [vmem:[%s15111_s27 + $0x170] sm:$0xff]  }
 0x512   : > { %11123 = vmatpush3.bf16.msra.mxu1 %v1994_v58  ;;  %11124 = vmatprep.mubr.msk.bf16.mxu1 %vm12236_vm0, %v12235_v51  ;;  %v11415_v58 = vld [vmem:[%s15111_s27 + $0x130] sm:$0xff]  }
 0x513   : > { %2089 = vmatprep.subr.bf16.mxu1 %v11392_v23  ;;  %v11438_v23 = vld [vmem:[%s15111_s27 + $0x1d0] sm:$0xff]  }
 0x5b7   : > { %v12889_v59 = vpop.f32.mrb[16].mxu0 }
 0x5b8   : > { %v12891_v29 = vpop.f32.mrb[17].mxu0 }
 0x5b9   : > { %v2211_v60 = vpop.f32.mrb[18].mxu0 }
 0x5ba   : > { %v2212_v62 = vpop.f32.mrb[19].mxu0  ;;  %v11416_v60 = vld [vmem:[%s15111_s27 + $0x178] sm:$0xff]  }
 0x5bb   : > { %v11417_v62 = vld [vmem:[%s15111_s27 + $0x138] sm:$0xff]  }
 0x5d7   : > { %v10722_v0 = vpop.f32.mrb[20].mxu0 }
 0x5d8   : > { %v10723_v1 = vpop.f32.mrb[21].mxu0 }
 0x5d9   : > { %v10724_v3 = vadd.f32 %v10723_v1, %v10722_v0  ;;  %v10725_v4 = vpop.f32.mrb[22].mxu0  ;;  %v11418_v0 = vld [vmem:[%s15069_s7 + $0x140] sm:$0xff]   ;;  %v11420_v1 = vld [vmem:[%s15069_s7 + $0x148] sm:$0xff]  }
 0x5da   : > { %v10726_v6 = vpop.f32.mrb[23].mxu0  ;;  %v11422_v4 = vld [vmem:[%s15069_s7 + $0x150] sm:$0xff]  }
 0x5db   : > { %v2563_v7 = vadd.f32 %v10724_v3, %v9216_v19  ;;  %v11419_v19 = vld [vmem:[%s15069_s7 + $0x100] sm:$0xff]   ;;  %v11421_v3 = vld [vmem:[%s15069_s7 + $0x108] sm:$0xff]   ;;  %v11423_v6 = vld [vmem:[%s15069_s7 + $0x110] sm:$0xff]  }
 0x5dd   : > { %v2746_v9 = vpack.c.bf16 %v2563_v7, %v2563_v7  ;;  %v11424_v7 = vld [vmem:[%s15069_s7 + $0x158] sm:$0xff]  }
 0x5df   : > { %v2751_v10 = vsel %vm1279_vm1, %v2746_v9, 0  ;;  %v11425_v9 = vld [vmem:[%s15069_s7 + $0x118] sm:$0xff]  }
 0x5e0   : > { %11129 = vmatpush3.bf16.xpose.msra.mxu0 %v2751_v10  ;;  %v11426_v10 = vld [vmem:[%s15069_s7 + $0x160] sm:$0xff]  }
 0x5e1   : > { %11134 = vmatprep.subr.bf16.mxu0 %v12235_v51 }
 0x5e4   : > { %v1970_v11 = vpop.f32.mrb[20].mxu1 }
 0x5e5   : > { %v1976_v12 = vmul.f32 0.125, %v1970_v11  ;;  %v11120_v13 = vpop.f32.mrb[21].mxu1  ;;  %v11427_v11 = vld [vmem:[%s15069_s7 + $0x120] sm:$0xff]  }
 0x5e6   : > { %v1973_v14 = vpop.f32.mrb[22].mxu1  ;;  %v11429_v13 = vld [vmem:[%s15069_s7 + $0x128] sm:$0xff]  }
 0x5e7   : > { %v11121_v15 = vpop.f32.mrb[23].mxu1  ;;  %v1977_v16 = vsel %vm1327_vm3, %v1976_v12, -inf  ;;  %v11430_v14 = vld [vmem:[%s15069_s7 + $0x170] sm:$0xff]  }
 0x5e8   : > { %1978 = vmax.xlane.f32.xlu1 %v1977_v16  ;;  %v11431_v15 = vld [vmem:[%s15069_s7 + $0x130] sm:$0xff]   ;;  %v11432_v16 = vld [vmem:[%s15069_s7 + $0x178] sm:$0xff]  }
 0x675   : > { %v1979_v17 = vpop.xlane.xlu1 %1978 }
 0x676   : > { %v1980_v18 = vsub.f32 %v1976_v12, %v1979_v17  ;;  %v11428_v12 = vld [vmem:[%s15069_s7 + $0x168] sm:$0xff]   ;;  %v11433_v17 = vld [vmem:[%s15069_s7 + $0x138] sm:$0xff]  }
 0x678   : > { %v1981_v20 = vmul.f32 1.442695, %v1980_v18  ;;  %v11434_v18 = vld [vmem:[%s15111_s27 + $0x1c0] sm:$0xff]  }
 0x67a   : > { %12134 = vpow2.f32 %v1981_v20  ;;  %v11435_v20 = vld [vmem:[%s15111_s27 + $0x180] sm:$0xff]  }
 0x684   : > { %v12135_v21 = vpop.eup %12134 }
 0x685   : > { %v1983_v22 = vsel %vm1327_vm3, %v12135_v21, 0.0 }
 0x686   : > { %1984 = vadd.xlane.f32.xlu1 %v1983_v22  ;;  %v11437_v22 = vld [vmem:[%s15111_s27 + $0x188] sm:$0xff]  }
 0x713   : > { %v1985_v24 = vpop.xlane.xlu1 %1984 }
 0x714   : > { %12136 = vrcp.f32 %v1985_v24  ;;  %v11439_v24 = vld [vmem:[%s15111_s27 + $0x190] sm:$0xff]  }
 0x71e   : > { %v12137_v25 = vpop.eup %12136 }
 0x71f   : > { %v1987_v26 = vmul.f32 %v12137_v25, %v12135_v21  ;;  %v11436_v21 = vld [vmem:[%s15111_s27 + $0x1c8] sm:$0xff]   ;;  %v11440_v25 = vld [vmem:[%s15111_s27 + $0x1d8] sm:$0xff]  }
 0x721   : > { %v1988_v28 = vpack.c.bf16 %v1987_v26, %v1987_v26  ;;  %v11441_v26 = vld [vmem:[%s15111_s27 + $0x198] sm:$0xff]  }
 0x723   : > { %11125 = vmatmul.mubr.msk.bf16.vlgmr.msra.gmra.mrb[24].mxu1 %vm1327_vm3, %v1988_v28  ;;  %v11443_v28 = vld [vmem:[%s15111_s27 + $0x1a0] sm:$0xff]  }
 0x724   : > { %2090 = vmatpush1.bf16.msra.mxu1 %v11390_v27  ;;  %2121 = vmatprep.mubr.bf16.mxu1 %v12234_v2  ;;  %v11442_v27 = vld [vmem:[%s15111_s27 + $0x1e0] sm:$0xff]  }
 0x725   : > { %2091 = vmatprep.subr.bf16.mxu1 %v11395_v30  ;;  %v11444_v30 = vld [vmem:[%s15111_s27 + $0x1e8] sm:$0xff]  }
 0x728   : > { %2092 = vmatpush1.bf16.msra.mxu1 %v11393_v31  ;;  %v11445_v31 = vld [vmem:[%s15111_s27 + $0x1a8] sm:$0xff]  }
 0x729   : > { %2093 = vmatprep.subr.bf16.mxu1 %v11398_v32  ;;  %v11446_v32 = vld [vmem:[%s15111_s27 + $0x1f0] sm:$0xff]  }
 0x72c   : > { %2094 = vmatpush1.bf16.msra.mxu1 %v11396_v33  ;;  %v11447_v33 = vld [vmem:[%s15111_s27 + $0x1b0] sm:$0xff]  }
 0x72d   : > { %2095 = vmatprep.subr.bf16.mxu1 %v11401_v34  ;;  %v11448_v34 = vld [vmem:[%s15111_s27 + $0x1f8] sm:$0xff]  }
 0x730   : > { %2096 = vmatpush1.bf16.msra.mxu1 %v11399_v35  ;;  %v11449_v35 = vld [vmem:[%s15111_s27 + $0x1b8] sm:$0xff]  }
 0x731   : > { %10684 = vmatprep.subr.bf16.mxu1 %v11402_v36  ;;  %v11450_v36 = vld [vmem:[%s15069_s7 + $0x1c0] sm:$0xff]  }
 0x7f6   : > { %v2030_v37 = vpop.f32.mrb[24].mxu1 }
 0x7f7   : > { %v2036_v39 = vpack.c.bf16 %v2030_v37, %v2030_v37  ;;  %v11126_v40 = vpop.f32.mrb[25].mxu1  ;;  %v11451_v37 = vld [vmem:[%s15069_s7 + $0x180] sm:$0xff]  }
 0x7f8   : > { %v2033_v42 = vpop.f32.mrb[26].mxu1  ;;  %v11454_v40 = vld [vmem:[%s15069_s7 + $0x1d0] sm:$0xff]  }
 0x7f9   : > { %v11127_v43 = vpop.f32.mrb[27].mxu1  ;;  %9123 = vmatmul.mubr.msk.bf16.vlgmr.msra.gmra.mrb[28].mxu1 %vm1279_vm1, %v2036_v39  ;;  %v11453_v39 = vld [vmem:[%s15069_s7 + $0x188] sm:$0xff]   ;;  %v11456_v42 = vld [vmem:[%s15069_s7 + $0x1d8] sm:$0xff]  }
 0x7fa   : > { %10685 = vmatpush3.bf16.msra.mxu1 %v11403_v38  ;;  %2383 = vmatprep.mubr.bf16.mxu1 %v12567_v5  ;;  %v11452_v38 = vld [vmem:[%s15069_s7 + $0x1c8] sm:$0xff]   ;;  %v11457_v43 = vld [vmem:[%s15069_s7 + $0x198] sm:$0xff]  }
 0x7fb   : > { %10686 = vmatprep.subr.bf16.mxu1 %v11404_v41  ;;  %v11455_v41 = vld [vmem:[%s15069_s7 + $0x190] sm:$0xff]  }
 0x7fe   : > { %10687 = vmatpush3.bf16.msra.mxu1 %v11405_v44  ;;  %v11458_v44 = vld [vmem:[%s15069_s7 + $0x1e0] sm:$0xff]  }
 0x7ff   : > { %10688 = vmatprep.subr.bf16.mxu1 %v11406_v45  ;;  %v11459_v45 = vld [vmem:[%s15069_s7 + $0x1a0] sm:$0xff]  }
 0x802   : > { %10689 = vmatpush3.bf16.msra.mxu1 %v11407_v46  ;;  %v11460_v46 = vld [vmem:[%s15069_s7 + $0x1e8] sm:$0xff]  }
 0x803   : > { %10690 = vmatprep.subr.bf16.mxu1 %v11408_v47  ;;  %v11461_v47 = vld [vmem:[%s15069_s7 + $0x1a8] sm:$0xff]  }
 0x806   : > { %10691 = vmatpush3.bf16.msra.mxu1 %v11409_v48  ;;  %v11462_v48 = vld [vmem:[%s15069_s7 + $0x1f0] sm:$0xff]  }
 0x807   : > { %10692 = vmatprep.subr.bf16.mxu1 %v11410_v49  ;;  %v11463_v49 = vld [vmem:[%s15069_s7 + $0x1b0] sm:$0xff]  }
 0x80a   : > { %10693 = vmatpush3.bf16.msra.mxu1 %v11411_v50  ;;  %v11464_v50 = vld [vmem:[%s15069_s7 + $0x1f8] sm:$0xff]  }
 0x80b   : > { %10694 = vmatprep.subr.bf16.mxu1 %v11412_v52  ;;  %v11465_v52 = vld [vmem:[%s15069_s7 + $0x1b8] sm:$0xff]  }
 0x80e   : > { %10695 = vmatpush3.bf16.msra.mxu1 %v11413_v53 }
 0x80f   : > { %10696 = vmatprep.subr.bf16.mxu1 %v11414_v57 }
 0x812   : > { %10697 = vmatpush3.bf16.msra.mxu1 %v11415_v58 }
 0x813   : > { %10698 = vmatprep.subr.bf16.mxu1 %v11416_v60 }
 0x816   : > { %10699 = vmatpush3.bf16.msra.mxu1 %v11417_v62 }
 0x817   : > { %10728 = vmatprep.subr.bf16.mxu1 %v11418_v0 }
 0x819   : > { %2384 = vmatmul.mubr.bf16.vlgmr.msra.gmra.mrb[32].mxu1 %v12577_v8 }
 0x81a   : > { %10729 = vmatpush3.bf16.msra.mxu1 %v11419_v19  ;;  %2737 = vmatprep.mubr.bf16.mxu1 %v12567_v5 }
 0x81b   : > { %10730 = vmatprep.subr.bf16.mxu1 %v11420_v1  ;;  %v9166_v1 = vld [vmem:[%s15114_s4 + $0x2] ss:$0 sm:$0xff] }
 0x81e   : > { %10731 = vmatpush3.bf16.msra.mxu1 %v11421_v3 }
 0x81f   : > { %10732 = vmatprep.subr.bf16.mxu1 %v11422_v4 }
 0x822   : > { %10733 = vmatpush3.bf16.msra.mxu1 %v11423_v6 }
 0x823   : > { %10734 = vmatprep.subr.bf16.mxu1 %v11424_v7 }
 0x826   : > { %10735 = vmatpush3.bf16.msra.mxu1 %v11425_v9 }
 0x827   : > { %10736 = vmatprep.subr.bf16.mxu1 %v11426_v10 }
 0x82a   : > { %10737 = vmatpush3.bf16.msra.mxu1 %v11427_v11 }
 0x82b   : > { %10738 = vmatprep.subr.bf16.mxu1 %v11428_v12 }
 0x82e   : > { %10739 = vmatpush3.bf16.msra.mxu1 %v11429_v13 }
 0x82f   : > { %10740 = vmatprep.subr.bf16.mxu1 %v11430_v14 }
 0x832   : > { %10741 = vmatpush3.bf16.msra.mxu1 %v11431_v15 }
 0x833   : > { %10742 = vmatprep.subr.bf16.mxu1 %v11432_v16 }
 0x836   : > { %10743 = vmatpush3.bf16.msra.mxu1 %v11433_v17 }
 0x837   : > { %10754 = vmatprep.subr.bf16.mxu1 %v11434_v18 }
 0x839   : > { %2738 = vmatmul.mubr.bf16.vlgmr.msra.gmra.mrb[36].mxu1 %v12577_v8 }
 0x83a   : > { %10755 = vmatpush3.bf16.msra.mxu1 %v11435_v20  ;;  %3118 = vmatprep.mubr.bf16.mxu1 %v12567_v5 }
 0x83b   : > { %10756 = vmatprep.subr.bf16.mxu1 %v11436_v21 }
 0x83e   : > { %10757 = vmatpush3.bf16.msra.mxu1 %v11437_v22 }
 0x83f   : > { %10758 = vmatprep.subr.bf16.mxu1 %v11438_v23 }
 0x842   : > { %10759 = vmatpush3.bf16.msra.mxu1 %v11439_v24 }
 0x843   : > { %10760 = vmatprep.subr.bf16.mxu1 %v11440_v25 }
 0x846   : > { %10761 = vmatpush3.bf16.msra.mxu1 %v11441_v26 }
 0x847   : > { %10762 = vmatprep.subr.bf16.mxu1 %v11442_v27 }
 0x84a   : > { %10763 = vmatpush3.bf16.msra.mxu1 %v11443_v28 }
 0x84b   : > { %10764 = vmatprep.subr.bf16.mxu1 %v11444_v30 }
 0x84e   : > { %10765 = vmatpush3.bf16.msra.mxu1 %v11445_v31 }
 0x84f   : > { %10766 = vmatprep.subr.bf16.mxu1 %v11446_v32 }
 0x852   : > { %10767 = vmatpush3.bf16.msra.mxu1 %v11447_v33 }
 0x853   : > { %10768 = vmatprep.subr.bf16.mxu1 %v11448_v34 }
 0x856   : > { %10769 = vmatpush3.bf16.msra.mxu1 %v11449_v35 }
 0x857   : > { %10798 = vmatprep.subr.bf16.mxu1 %v11450_v36 }
 0x859   : > { %3119 = vmatmul.mubr.bf16.vlgmr.msra.gmra.mrb[40].mxu1 %v12577_v8 }
 0x85a   : > { %10799 = vmatpush3.bf16.msra.mxu1 %v11451_v37  ;;  %3472 = vmatprep.mubr.bf16.mxu1 %v12567_v5 }
 0x85b   : > { %10800 = vmatprep.subr.bf16.mxu1 %v11452_v38 }
 0x85e   : > { %10801 = vmatpush3.bf16.msra.mxu1 %v11453_v39 }
 0x85f   : > { %10802 = vmatprep.subr.bf16.mxu1 %v11454_v40 }
 0x862   : > { %10803 = vmatpush3.bf16.msra.mxu1 %v11455_v41  ;;  %v11468_v41 = vld [vmem:[%s15071_s9 + $0x84] ss:$8 sps:$4 sm:$0xff]  }
 0x863   : > { %10804 = vmatprep.subr.bf16.mxu1 %v11456_v42 }
 0x866   : > { %10805 = vmatpush3.bf16.msra.mxu1 %v11457_v43 }
 0x867   : > { %10806 = vmatprep.subr.bf16.mxu1 %v11458_v44 }
 0x86a   : > { %10807 = vmatpush3.bf16.msra.mxu1 %v11459_v45  ;;  %v11466_v45 = vld [vmem:[%s15071_s9 + $0x80] ss:$8 sps:$4 sm:$0xff]  }
 0x86b   : > { %10808 = vmatprep.subr.bf16.mxu1 %v11460_v46 }
 0x86e   : > { %10809 = vmatpush3.bf16.msra.mxu1 %v11461_v47  ;;  %v11471_v47 = vld [vmem:[%s15071_s9 + $0x94] ss:$8 sps:$4 sm:$0xff]  }
 0x86f   : > { %10810 = vmatprep.subr.bf16.mxu1 %v11462_v48  ;;  %v11469_v48 = vld [vmem:[%s15071_s9 + $0x90] ss:$8 sps:$4 sm:$0xff]  }
 0x872   : > { %10811 = vmatpush3.bf16.msra.mxu1 %v11463_v49  ;;  %v11474_v49 = vld [vmem:[%s15071_s9 + $0xa4] ss:$8 sps:$4 sm:$0xff]  }
 0x873   : > { %10812 = vmatprep.subr.bf16.mxu1 %v11464_v50  ;;  %v11472_v50 = vld [vmem:[%s15071_s9 + $0xa0] ss:$8 sps:$4 sm:$0xff]  }
 0x876   : > { %10813 = vmatpush3.bf16.msra.mxu1 %v11465_v52  ;;  %v11477_v52 = vld [vmem:[%s15071_s9 + $0xb4] ss:$8 sps:$4 sm:$0xff]  }
 0x879   : > { %3473 = vmatmul.mubr.bf16.vlgmr.msra.gmra.mrb[44].mxu1 %v12577_v8 }
 0x8cc   : > { %v2123_v53 = vpop.f32.mrb[28].mxu1 }
 0x8cd   : > { %v13128_v57 = vadd.f32 %v12889_v59, %v2123_v53  ;;  %v2125_v58 = vpop.f32.mrb[29].mxu1  ;;  %v11475_v53 = vld [vmem:[%s15071_s9 + $0xb0] ss:$8 sps:$4 sm:$0xff]  }
 0x8ce   : > { %v13131_v60 = vadd.f32 %v12891_v29, %v2125_v58  ;;  %v2127_v62 = vpop.f32.mrb[30].mxu1  ;;  %v9266_v29 = vld [vmem:[%s15070_s8 + $0x2] ss:$0 sm:$0xff] }
 0x8cf   : > { %v2128_v0 = vpop.f32.mrb[31].mxu1  ;;  %v11478_v58 = vld [vmem:[%s15067_s5 + $0x1c0] sm:$0xff]  }
 0x8d0   : > { %v11479_v0 = vld [vmem:[%s15067_s5 + $0x180] sm:$0xff]  }
 0x8ec   : > { %v10700_v19 = vpop.f32.mrb[32].mxu1 }
 0x8ed   : > { %v10701_v3 = vpop.f32.mrb[33].mxu1 }
 0x8ee   : > { %v10702_v4 = vadd.f32 %v10701_v3, %v10700_v19  ;;  %v10703_v6 = vpop.f32.mrb[34].mxu1  ;;  %v11480_v3 = vld [vmem:[%s15067_s5 + $0x1c8] sm:$0xff]  }
 0x8ef   : > { %v10704_v7 = vpop.f32.mrb[35].mxu1 }
 0x8f0   : > { %v2386_v9 = vadd.f32 %v10702_v4, %v9166_v1  ;;  %v11481_v7 = vld [vmem:[%s15067_s5 + $0x188] sm:$0xff]  }
 0x8f2   : > { %v2745_v10 = vpack.c.bf16 %v2386_v9, %v2386_v9  ;;  %v11482_v9 = vld [vmem:[%s15067_s5 + $0x1d0] sm:$0xff]  }
 0x8f4   : > { %11131 = vmatmul.mubr.msk.bf16.vlgmr.msra.gmra.mrb[24].mxu0 %vm1279_vm1, %v2745_v10  ;;  %v11483_v10 = vld [vmem:[%s15067_s5 + $0x190] sm:$0xff]  }
 0x8f5   : > { %11136 = vmatprep.mubr.msk.bf16.mxu0 %vm12236_vm0, %v12235_v51 }
 0x90c   : > { %v10744_v59 = vpop.f32.mrb[36].mxu1 }
 0x90d   : > { %v10745_v11 = vpop.f32.mrb[37].mxu1 }
 0x90e   : > { %v10746_v12 = vadd.f32 %v10745_v11, %v10744_v59  ;;  %v10747_v13 = vpop.f32.mrb[38].mxu1  ;;  %v11484_v59 = vld [vmem:[%s15067_s5 + $0x1d8] sm:$0xff]   ;;  %v11487_v11 = vld [vmem:[%s15067_s5 + $0x1a0] sm:$0xff]  }
 0x90f   : > { %v10748_v14 = vpop.f32.mrb[39].mxu1  ;;  %v11489_v13 = vld [vmem:[%s15067_s5 + $0x1a8] sm:$0xff]  }
 0x910   : > { %v2740_v15 = vadd.f32 %v10746_v12, %v9266_v29  ;;  %v11486_v29 = vld [vmem:[%s15067_s5 + $0x1e0] sm:$0xff]   ;;  %v11488_v12 = vld [vmem:[%s15067_s5 + $0x1e8] sm:$0xff]   ;;  %v11490_v14 = vld [vmem:[%s15067_s5 + $0x1f0] sm:$0xff]  }
 0x912   : > { %v2806_v16 = vpack.c.bf16 %v2740_v15, %v2740_v15  ;;  %v11491_v15 = vld [vmem:[%s15067_s5 + $0x1b0] sm:$0xff]  }
 0x914   : > { %v2811_v17 = vsel %vm1344_vm2, %v2806_v16, 0  ;;  %v11492_v16 = vld [vmem:[%s15067_s5 + $0x1f8] sm:$0xff]  }
 0x915   : > { %11135 = vmatpush3.bf16.msra.mxu0 %v2811_v17  ;;  %v11493_v17 = vld [vmem:[%s15067_s5 + $0x1b8] sm:$0xff]  }
 0x916   : > { %2906 = vmatprep.subr.bf16.mxu0 %v11468_v41 }
 0x92c   : > { %v10770_v18 = vpop.f32.mrb[40].mxu1 }
 0x92d   : > { %v10771_v20 = vpop.f32.mrb[41].mxu1 }
 0x92e   : > { %v13143_v21 = vadd.f32 %v10771_v20, %v10770_v18  ;;  %v10773_v22 = vpop.f32.mrb[42].mxu1 }
 0x92f   : > { %v10774_v23 = vpop.f32.mrb[43].mxu1 }
 0x94c   : > { %v10814_v24 = vpop.f32.mrb[44].mxu1 }
 0x94d   : > { %v10815_v25 = vpop.f32.mrb[45].mxu1 }
 0x94e   : > { %v13145_v26 = vadd.f32 %v10815_v25, %v10814_v24  ;;  %v10817_v27 = vpop.f32.mrb[46].mxu1 }
 0x94f   : > { %v10818_v28 = vpop.f32.mrb[47].mxu1 }
 0x950   : > { %v9385_v28 = vld [vmem:[%s15068_s6 + $0x3] ss:$0 sm:$0xff] }
 0x9c7   : > { %v2787_v30 = vpop.f32.mrb[24].mxu0 }
 0x9c8   : > { %v2793_v31 = vmul.f32 0.125, %v2787_v30  ;;  %v11132_v32 = vpop.f32.mrb[25].mxu0 }
 0x9c9   : > { %v2790_v33 = vpop.f32.mrb[26].mxu0 }
 0x9ca   : > { %v11133_v34 = vpop.f32.mrb[27].mxu0  ;;  %v2794_v35 = vsel %vm1327_vm3, %v2793_v31, -inf }
 0x9cb   : > { %2795 = vmax.xlane.f32.xlu0 %v2794_v35 }
 0xa58   : > { %v2796_v36 = vpop.xlane.xlu0 %2795 }
 0xa59   : > { %v2797_v37 = vsub.f32 %v2793_v31, %v2796_v36 }
 0xa5b   : > { %v2798_v38 = vmul.f32 1.442695, %v2797_v37 }
 0xa5d   : > { %12138 = vpow2.f32 %v2798_v38 }
 0xa67   : > { %v12139_v39 = vpop.eup %12138 }
 0xa68   : > { %v2800_v40 = vsel %vm1327_vm3, %v12139_v39, 0.0 }
 0xa69   : > { %2801 = vadd.xlane.f32.xlu1 %v2800_v40 }
 0xaf6   : > { %v2802_v42 = vpop.xlane.xlu1 %2801 }
 0xaf7   : > { %12140 = vrcp.f32 %v2802_v42 }
 0xb01   : > { %v12141_v43 = vpop.eup %12140 }
 0xb02   : > { %v2804_v44 = vmul.f32 %v12141_v43, %v12139_v39 }
 0xb04   : > { %v2805_v46 = vpack.c.bf16 %v2804_v44, %v2804_v44 }
 0xb06   : > { %11137 = vmatmul.mubr.msk.bf16.vlgmr.msra.gmra.mrb[28].mxu0 %vm1327_vm3, %v2805_v46 }
 0xb07   : > { %2907 = vmatpush1.bf16.msra.mxu0 %v11466_v45  ;;  %2938 = vmatprep.mubr.bf16.mxu0 %v12234_v2 }
 0xb08   : > { %2908 = vmatprep.subr.bf16.mxu0 %v11471_v47 }
 0xb0b   : > { %2909 = vmatpush1.bf16.msra.mxu0 %v11469_v48 }
 0xb0c   : > { %2910 = vmatprep.subr.bf16.mxu0 %v11474_v49 }
 0xb0f   : > { %2911 = vmatpush1.bf16.msra.mxu0 %v11472_v50  ;;  %v11496_v50 = vld [vmem:[%s15071_s9 + $0xc4] ss:$8 sps:$4 sm:$0xff]  }
 0xb10   : > { %2912 = vmatprep.subr.bf16.mxu0 %v11477_v52 }
 0xb13   : > { %2913 = vmatpush1.bf16.msra.mxu0 %v11475_v53 }
 0xb14   : > { %10776 = vmatprep.subr.bf16.mxu0 %v11478_v58 }
 0xbd9   : > { %v2847_v62 = vpop.f32.mrb[28].mxu0 }
 0xbda   : > { %v2853_v19 = vpack.c.bf16 %v2847_v62, %v2847_v62  ;;  %v11138_v1 = vpop.f32.mrb[29].mxu0  ;;  %v11494_v62 = vld [vmem:[%s15071_s9 + $0xc0] ss:$8 sps:$4 sm:$0xff]  }
 0xbdb   : > { %v2850_v4 = vpop.f32.mrb[30].mxu0  ;;  %v11497_v1 = vld [vmem:[%s15071_s9 + $0xd0] ss:$8 sps:$4 sm:$0xff]  }
 0xbdc   : > { %v11139_v6 = vpop.f32.mrb[31].mxu0  ;;  %9301 = vmatmul.mubr.msk.bf16.vlgmr.msra.gmra.mrb[32].mxu0 %vm1279_vm1, %v2853_v19  ;;  %v11499_v19 = vld [vmem:[%s15071_s9 + $0xd4] ss:$8 sps:$4 sm:$0xff]   ;;  %v11500_v4 = vld [vmem:[%s15071_s9 + $0xe0] ss:$8 sps:$4 sm:$0xff]  }
 0xbdd   : > { %10777 = vmatpush3.bf16.msra.mxu0 %v11479_v0  ;;  %3295 = vmatprep.mubr.bf16.mxu0 %v12567_v5  ;;  %v11485_v5 = vld [vmem:[%s15067_s5 + $0x198] sm:$0xff]  }
 0xbde   : > { %10778 = vmatprep.subr.bf16.mxu0 %v11480_v3  ;;  %v11502_v3 = vld [vmem:[%s15071_s9 + $0xe4] ss:$8 sps:$4 sm:$0xff]   ;;  %v11505_v6 = vld [vmem:[%s15071_s9 + $0xf4] ss:$8 sps:$4 sm:$0xff]  }
 0xbe1   : > { %10779 = vmatpush3.bf16.msra.mxu0 %v11481_v7  ;;  %v11503_v7 = vld [vmem:[%s15071_s9 + $0xf0] ss:$8 sps:$4 sm:$0xff]  }
 0xbe2   : > { %10780 = vmatprep.subr.bf16.mxu0 %v11482_v9 }
 0xbe5   : > { %10781 = vmatpush3.bf16.msra.mxu0 %v11483_v10 }
 0xbe6   : > { %10782 = vmatprep.subr.bf16.mxu0 %v11484_v59 }
 0xbe9   : > { %10783 = vmatpush3.bf16.msra.mxu0 %v11485_v5 }
 0xbea   : > { %10784 = vmatprep.subr.bf16.mxu0 %v11486_v29 }
 0xbed   : > { %10785 = vmatpush3.bf16.msra.mxu0 %v11487_v11  ;;  %v11506_v11 = vld [vmem:[%s15075_s13] ss:$16 sps:$4 sm:$0xff]  }
 0xbee   : > { %10786 = vmatprep.subr.bf16.mxu0 %v11488_v12  ;;  %v11508_v12 = vld [vmem:[%s15075_s13 + $0x4] ss:$16 sps:$4 sm:$0xff]  }
 0xbef   : > { %4155 = vmatprep.subr.bf16.mxu1 %v11508_v12  ;;  %v11569_v12 = vld [vmem:[%s15075_s13 + $0x148] ss:$16 sps:$4 sm:$0xff]  }
 0xbf0   : > { %4156 = vmatpush1.bf16.msra.mxu1 %v11506_v11  ;;  %v11566_v11 = vld [vmem:[%s15075_s13 + $0x140] ss:$16 sps:$4 sm:$0xff]  }
 0xbf1   : > { %10787 = vmatpush3.bf16.msra.mxu0 %v11489_v13  ;;  %v11509_v13 = vld [vmem:[%s15075_s13 + $0x8] ss:$16 sps:$4 sm:$0xff]  }
 0xbf2   : > { %10788 = vmatprep.subr.bf16.mxu0 %v11490_v14  ;;  %v11511_v14 = vld [vmem:[%s15075_s13 + $0xc] ss:$16 sps:$4 sm:$0xff]  }
 0xbf5   : > { %10789 = vmatpush3.bf16.msra.mxu0 %v11491_v15  ;;  %v11514_v15 = vld [vmem:[%s15075_s13 + $0x24] ss:$16 sps:$4 sm:$0xff]  }
 0xbf6   : > { %10790 = vmatprep.subr.bf16.mxu0 %v11492_v16  ;;  %v11517_v16 = vld [vmem:[%s15075_s13 + $0x2c] ss:$16 sps:$4 sm:$0xff]   ;;  %4157 = vmatprep.subr.bf16.mxu1 %v11514_v15  ;;  %v11572_v15 = vld [vmem:[%s15075_s13 + $0x160] ss:$16 sps:$4 sm:$0xff]  }
 0xbf9   : > { %10791 = vmatpush3.bf16.msra.mxu0 %v11493_v17  ;;  %v11512_v17 = vld [vmem:[%s15075_s13 + $0x20] ss:$16 sps:$4 sm:$0xff]  }
 0xbfa   : > { %11140 = vmatprep.subr.bf16.mxu0 %v12235_v51  ;;  %4158 = vmatpush1.bf16.msra.mxu1 %v11512_v17  ;;  %v11580_v17 = vld [vmem:[%s15075_s13 + $0x184] ss:$16 sps:$4 sm:$0xff]  }
 0xbfc   : > { %3296 = vmatmul.mubr.bf16.vlgmr.msra.gmra.mrb[36].mxu0 %v12577_v8 }
 0xbfd   : > { %11142 = vmatprep.mubr.msk.bf16.mxu0 %vm12236_vm0, %v12235_v51 }
 0xcaf   : > { %v2940_v18 = vpop.f32.mrb[32].mxu0 }
 0xcb0   : > { %v13230_v20 = vadd.f32 %v2940_v18, %v13128_v57  ;;  %v2942_v22 = vpop.f32.mrb[33].mxu0  ;;  %v9435_v57 = vld [vmem:[%s15070_s8 + $0x3] ss:$0 sm:$0xff]  ;;  %v11515_v18 = vld [vmem:[%s15075_s13 + $0x28] ss:$16 sps:$4 sm:$0xff]  }
 0xcb1   : > { %v13233_v23 = vadd.f32 %v2942_v22, %v13131_v60  ;;  %v2944_v24 = vpop.f32.mrb[34].mxu0  ;;  %v9335_v60 = vld [vmem:[%s15114_s4 + $0x3] ss:$0 sm:$0xff]  ;;  %v3475_v35 = vadd.f32 %v13145_v26, %v9435_v57  ;;  %v11520_v22 = vld [vmem:[%s15075_s13 + $0x44] ss:$16 sps:$4 sm:$0xff]  }
 0xcb2   : > { %v2945_v25 = vpop.f32.mrb[35].mxu0  ;;  %v3121_v37 = vadd.f32 %v13143_v21, %v9335_v60  ;;  %v11523_v24 = vld [vmem:[%s15075_s13 + $0x4c] ss:$16 sps:$4 sm:$0xff]   ;;  %4159 = vmatprep.subr.bf16.mxu1 %v11520_v22  ;;  %v11530_v57 = vld [vmem:[%s15075_s13 + $0x80] ss:$16 sps:$4 sm:$0xff]  }
 0xcb3   : > { %v3541_v38 = vpack.c.bf16 %v3475_v35, %v3475_v35  ;;  %v11518_v25 = vld [vmem:[%s15075_s13 + $0x40] ss:$16 sps:$4 sm:$0xff]   ;;  %v11538_v60 = vld [vmem:[%s15075_s13 + $0xa4] ss:$16 sps:$4 sm:$0xff]   ;;  %v11541_v35 = vld [vmem:[%s15075_s13 + $0xac] ss:$16 sps:$4 sm:$0xff]  }
 0xcb4   : > { %v3480_v39 = vpack.c.bf16 %v3121_v37, %v3121_v37  ;;  %4160 = vmatpush1.bf16.msra.mxu1 %v11518_v25  ;;  %v11539_v37 = vld [vmem:[%s15075_s13 + $0xa8] ss:$16 sps:$4 sm:$0xff]   ;;  %v11586_v25 = vld [vmem:[%s15075_s13 + $0x1a4] ss:$16 sps:$4 sm:$0xff]  }
 0xcb5   : > { %v3546_v40 = vsel %vm1344_vm2, %v3541_v38, 0  ;;  %v11544_v38 = vld [vmem:[%s15075_s13 + $0xc4] ss:$16 sps:$4 sm:$0xff]   ;;  %v11581_v22 = vld [vmem:[%s15075_s13 + $0x188] ss:$16 sps:$4 sm:$0xff]  }
 0xccf   : > { %v10792_v27 = vpop.f32.mrb[36].mxu0 }
 0xcd0   : > { %v10793_v30 = vpop.f32.mrb[37].mxu0 }
 0xcd1   : > { %v10794_v8 = vadd.f32 %v10793_v30, %v10792_v27  ;;  %v10795_v31 = vpop.f32.mrb[38].mxu0  ;;  %v11521_v27 = vld [vmem:[%s15075_s13 + $0x48] ss:$16 sps:$4 sm:$0xff]   ;;  %v11529_v30 = vld [vmem:[%s15075_s13 + $0x6c] ss:$16 sps:$4 sm:$0xff]  }
 0xcd2   : > { %v10796_v32 = vpop.f32.mrb[39].mxu0  ;;  %v11527_v31 = vld [vmem:[%s15075_s13 + $0x68] ss:$16 sps:$4 sm:$0xff]  }
 0xcd3   : > { %v3298_v33 = vadd.f32 %v10794_v8, %v9385_v28  ;;  %v11526_v28 = vld [vmem:[%s15075_s13 + $0x64] ss:$16 sps:$4 sm:$0xff]   ;;  %v11524_v8 = vld [vmem:[%s15075_s13 + $0x60] ss:$16 sps:$4 sm:$0xff]  }
 0xcd4   : > { %4161 = vmatprep.subr.bf16.mxu1 %v11526_v28  ;;  %v11532_v32 = vld [vmem:[%s15075_s13 + $0x84] ss:$16 sps:$4 sm:$0xff]   ;;  %v11584_v28 = vld [vmem:[%s15075_s13 + $0x1a0] ss:$16 sps:$4 sm:$0xff]  }
 0xcd5   : > { %v3481_v34 = vpack.c.bf16 %v3298_v33, %v3298_v33  ;;  %v11535_v33 = vld [vmem:[%s15075_s13 + $0x8c] ss:$16 sps:$4 sm:$0xff]   ;;  %4162 = vmatpush1.bf16.msra.mxu1 %v11524_v8  ;;  %v11592_v8 = vld [vmem:[%s15075_s13 + $0x1c4] ss:$16 sps:$4 sm:$0xff]  }
 0xcd6   : > { %4163 = vmatprep.subr.bf16.mxu1 %v11532_v32  ;;  %v11590_v32 = vld [vmem:[%s15075_s13 + $0x1c0] ss:$16 sps:$4 sm:$0xff]  }
 0xcd7   : > { %v3486_v36 = vsel %vm1279_vm1, %v3481_v34, 0  ;;  %v11533_v34 = vld [vmem:[%s15075_s13 + $0x88] ss:$16 sps:$4 sm:$0xff]  }
 0xcd8   : > { %11141 = vmatpush3.bf16.xpose.msra.mxu0 %v3486_v36  ;;  %v11536_v36 = vld [vmem:[%s15075_s13 + $0xa0] ss:$16 sps:$4 sm:$0xff]  }
 0xcd9   : > { %11146 = vmatprep.subr.bf16.mxu0 %v12235_v51  ;;  %4164 = vmatpush1.bf16.msra.mxu1 %v11530_v57  ;;  %v11598_v57 = vld [vmem:[%s15075_s13 + $0x1e4] ss:$16 sps:$4 sm:$0xff]  }
 0xcda   : > { %4165 = vmatprep.subr.bf16.mxu1 %v11538_v60  ;;  %v11596_v60 = vld [vmem:[%s15075_s13 + $0x1e0] ss:$16 sps:$4 sm:$0xff]  }
 0xcdd   : > { %4166 = vmatpush1.bf16.msra.mxu1 %v11536_v36  ;;  %v11604_v36 = vld [vmem:[%s15077_s15 + $0x4] ss:$8 sps:$4 sm:$0xff]  }
 0xcde   : > { %4167 = vmatprep.subr.bf16.mxu1 %v11544_v38 }
 0xcdf   : > { %11143 = vmatmul.mubr.msk.bf16.vlgmr.msra.gmra.mrb[40].mxu0 %vm1279_vm1, %v3480_v39  ;;  %v11547_v39 = vld [vmem:[%s15075_s13 + $0xcc] ss:$16 sps:$4 sm:$0xff]  }
 0xce0   : > { %11147 = vmatpush3.bf16.msra.mxu0 %v3546_v40  ;;  %11148 = vmatprep.mubr.msk.bf16.mxu0 %vm12236_vm0, %v12235_v51  ;;  %v11542_v40 = vld [vmem:[%s15075_s13 + $0xc0] ss:$16 sps:$4 sm:$0xff]  }
 0xce1   : > { %3641 = vmatprep.subr.bf16.mxu0 %v11496_v50  ;;  %4168 = vmatpush1.bf16.msra.mxu1 %v11542_v40 }
 0xdb2   : > { %v3522_v41 = vpop.f32.mrb[40].mxu0 }
 0xdb3   : > { %v3528_v42 = vmul.f32 0.125, %v3522_v41  ;;  %v11144_v26 = vpop.f32.mrb[41].mxu0  ;;  %v11545_v41 = vld [vmem:[%s15075_s13 + $0xc8] ss:$16 sps:$4 sm:$0xff]  }
 0xdb4   : > { %v3525_v43 = vpop.f32.mrb[42].mxu0  ;;  %v11553_v26 = vld [vmem:[%s15075_s13 + $0xec] ss:$16 sps:$4 sm:$0xff]  }
 0xdb5   : > { %v11145_v44 = vpop.f32.mrb[43].mxu0  ;;  %v3529_v45 = vsel %vm1327_vm3, %v3528_v42, -inf  ;;  %v11548_v43 = vld [vmem:[%s15075_s13 + $0xe0] ss:$16 sps:$4 sm:$0xff]  }
 0xdb6   : > { %3530 = vmax.xlane.f32.xlu0 %v3529_v45  ;;  %v11551_v44 = vld [vmem:[%s15075_s13 + $0xe8] ss:$16 sps:$4 sm:$0xff]   ;;  %v11556_v45 = vld [vmem:[%s15075_s13 + $0x104] ss:$16 sps:$4 sm:$0xff]  }
 0xe43   : > { %v3531_v21 = vpop.xlane.xlu0 %3530 }
 0xe44   : > { %v3532_v46 = vsub.f32 %v3528_v42, %v3531_v21  ;;  %v11550_v42 = vld [vmem:[%s15075_s13 + $0xe4] ss:$16 sps:$4 sm:$0xff]   ;;  %v11559_v21 = vld [vmem:[%s15075_s13 + $0x10c] ss:$16 sps:$4 sm:$0xff]  }
 0xe45   : > { %4169 = vmatprep.subr.bf16.mxu1 %v11550_v42 }
 0xe46   : > { %v3533_v47 = vmul.f32 1.442695, %v3532_v46  ;;  %4170 = vmatpush1.bf16.msra.mxu1 %v11548_v43  ;;  %v11554_v46 = vld [vmem:[%s15075_s13 + $0x100] ss:$16 sps:$4 sm:$0xff]  }
 0xe47   : > { %4171 = vmatprep.subr.bf16.mxu1 %v11556_v45  ;;  %v3701_v45 = vld [vmem:[%s15074_s12] sm:$0x3] }
 0xe48   : > { %12142 = vpow2.f32 %v3533_v47  ;;  %v11557_v47 = vld [vmem:[%s15075_s13 + $0x108] ss:$16 sps:$4 sm:$0xff]  }
 0xe4a   : > { %4172 = vmatpush1.bf16.msra.mxu1 %v11554_v46 }
 0xe52   : > { %v12143_v48 = vpop.eup %12142 }
 0xe53   : > { %v3535_v49 = vsel %vm1327_vm3, %v12143_v48, 0.0 }
 0xe54   : > { %3536 = vadd.xlane.f32.xlu1 %v3535_v49 }
 0xee1   : > { %v3537_v52 = vpop.xlane.xlu1 %3536 }
 0xee2   : > { %12144 = vrcp.f32 %v3537_v52 }
 0xeec   : > { %v12145_v53 = vpop.eup %12144 }
 0xeed   : > { %v3539_v58 = vmul.f32 %v12145_v53, %v12143_v48  ;;  %v3684_v48 = vld [vmem:[%s15072_s10] sm:$0x3] }
 0xeee   : > { %v3689_v49 = vrot.slane %v3684_v48, %v12545_v55  ;;  %v3693_v52 = vrot.slane %v3684_v48, %v12548_v56 }
 0xeef   : > { %v3540_v0 = vpack.c.bf16 %v3539_v58, %v3539_v58 }
 0xef1   : > { %11149 = vmatmul.mubr.msk.bf16.vlgmr.msra.gmra.mrb[44].mxu0 %vm1327_vm3, %v3540_v0 }
 0xef2   : > { %3642 = vmatpush1.bf16.msra.mxu0 %v11494_v62  ;;  %3673 = vmatprep.mubr.bf16.mxu0 %v12234_v2 }
 0xef3   : > { %3643 = vmatprep.subr.bf16.mxu0 %v11499_v19 }
 0xef6   : > { %3644 = vmatpush1.bf16.msra.mxu0 %v11497_v1 }
 0xef7   : > { %3645 = vmatprep.subr.bf16.mxu0 %v11502_v3 }
 0xefa   : > { %3646 = vmatpush1.bf16.msra.mxu0 %v11500_v4 }
 0xefb   : > { %3647 = vmatprep.subr.bf16.mxu0 %v11505_v6 }
 0xefe   : > { %3648 = vmatpush1.bf16.msra.mxu0 %v11503_v7 }
 0xeff   : > { %4196 = vmatprep.subr.bf16.mxu0 %v11511_v14  ;;  %v11577_v14 = vld [vmem:[%s15075_s13 + $0x16c] ss:$16 sps:$4 sm:$0xff]  }
 0xfc4   : > { %v3582_v9 = vpop.f32.mrb[44].mxu0 }
 0xfc5   : > { %v3588_v10 = vpack.c.bf16 %v3582_v9, %v3582_v9  ;;  %v11150_v59 = vpop.f32.mrb[45].mxu0 }
 0xfc6   : > { %v3585_v5 = vpop.f32.mrb[46].mxu0  ;;  %v11563_v59 = vld [vmem:[%s15075_s13 + $0x128] ss:$16 sps:$4 sm:$0xff]  }
 0xfc7   : > { %v11151_v29 = vpop.f32.mrb[47].mxu0  ;;  %9470 = vmatmul.mubr.msk.bf16.vlgmr.msra.gmra.mrb[48].mxu0 %vm1279_vm1, %v3588_v10  ;;  %v11560_v10 = vld [vmem:[%s15075_s13 + $0x120] ss:$16 sps:$4 sm:$0xff]   ;;  %v11568_v5 = vld [vmem:[%s15075_s13 + $0x144] ss:$16 sps:$4 sm:$0xff]  }
 0xfc8   : > { %4197 = vmatpush1.bf16.msra.mxu0 %v11509_v13  ;;  %v11571_v29 = vld [vmem:[%s15075_s13 + $0x14c] ss:$16 sps:$4 sm:$0xff]   ;;  %v11574_v13 = vld [vmem:[%s15075_s13 + $0x164] ss:$16 sps:$4 sm:$0xff]  }
 0xfc9   : > { %4198 = vmatprep.subr.bf16.mxu0 %v11517_v16  ;;  %v11575_v16 = vld [vmem:[%s15075_s13 + $0x168] ss:$16 sps:$4 sm:$0xff]  }
 0xfcc   : > { %4199 = vmatpush1.bf16.msra.mxu0 %v11515_v18  ;;  %v11578_v18 = vld [vmem:[%s15075_s13 + $0x180] ss:$16 sps:$4 sm:$0xff]  }
 0xfcd   : > { %4200 = vmatprep.subr.bf16.mxu0 %v11523_v24  ;;  %v11583_v24 = vld [vmem:[%s15075_s13 + $0x18c] ss:$16 sps:$4 sm:$0xff]  }
 0xfd0   : > { %4201 = vmatpush1.bf16.msra.mxu0 %v11521_v27  ;;  %v11589_v27 = vld [vmem:[%s15075_s13 + $0x1ac] ss:$16 sps:$4 sm:$0xff]  }
 0xfd1   : > { %4202 = vmatprep.subr.bf16.mxu0 %v11529_v30  ;;  %v11587_v30 = vld [vmem:[%s15075_s13 + $0x1a8] ss:$16 sps:$4 sm:$0xff]  }
 0xfd4   : > { %4203 = vmatpush1.bf16.msra.mxu0 %v11527_v31  ;;  %v11595_v31 = vld [vmem:[%s15075_s13 + $0x1cc] ss:$16 sps:$4 sm:$0xff]  }
 0xfd5   : > { %4204 = vmatprep.subr.bf16.mxu0 %v11535_v33  ;;  %v11593_v33 = vld [vmem:[%s15075_s13 + $0x1c8] ss:$16 sps:$4 sm:$0xff]  }
 0xfd8   : > { %4205 = vmatpush1.bf16.msra.mxu0 %v11533_v34  ;;  %v11601_v34 = vld [vmem:[%s15075_s13 + $0x1ec] ss:$16 sps:$4 sm:$0xff]  }
 0xfd9   : > { %4206 = vmatprep.subr.bf16.mxu0 %v11541_v35  ;;  %v11599_v35 = vld [vmem:[%s15075_s13 + $0x1e8] ss:$16 sps:$4 sm:$0xff]  }
 0xfdc   : > { %4207 = vmatpush1.bf16.msra.mxu0 %v11539_v37  ;;  %v11607_v37 = vld [vmem:[%s15077_s15 + $0x104] ss:$8 sps:$4 sm:$0xff]  }
 0xfdd   : > { %4208 = vmatprep.subr.bf16.mxu0 %v11547_v39 }
 0xfe0   : > { %4209 = vmatpush1.bf16.msra.mxu0 %v11545_v41 }
 0xfe1   : > { %4210 = vmatprep.subr.bf16.mxu0 %v11553_v26 }
 0xfe4   : > { %4211 = vmatpush1.bf16.msra.mxu0 %v11551_v44  ;;  %v3700_v44 = vld [vmem:[%s15073_s11] sm:$0x3] }
 0xfe5   : > { %4212 = vmatprep.subr.bf16.mxu0 %v11559_v21  ;;  %v3729_v48 = vrot.slane %v3700_v44, %v12548_v56 }
 0xfe8   : > { %4213 = vmatpush1.bf16.msra.mxu0 %v11557_v47  ;;  %v3725_v47 = vrot.slane %v3700_v44, %v12545_v55  ;;  %v11670_v44 = vld [vmem:[%s15077_s15 + $0xb4] ss:$8 sps:$4 sm:$0xff]  }
0x109a   : > { %v3675_v50 = vpop.f32.mrb[48].mxu0 }
0x109b   : > { %v3682_v53 = vadd.f32 %v3675_v50, %v13230_v20  ;;  %v3677_v58 = vpop.f32.mrb[49].mxu0 }
0x109c   : > { %v3683_v62 = vadd.f32 %v3677_v58, %v13233_v23  ;;  %v3679_v0 = vpop.f32.mrb[50].mxu0 }
0x109d   : > { %v3696_v19 = vadd.f32 %v3689_v49, %v3682_v53  ;;  %v3680_v1 = vpop.f32.mrb[51].mxu0  ;;  %v3742_v53 = vrot.slane %v3701_v45, %v12548_v56 }
0x109e   : > { %v3697_v3 = vadd.f32 %v3693_v52, %v3683_v62  ;;  %v3738_v52 = vrot.slane %v3701_v45, %v12545_v55  ;;  %v11673_v45 = vld [vmem:[%s15077_s15 + $0x1b4] ss:$8 sps:$4 sm:$0xff]  }
0x109f   : > { %v13397_v4 = vadd.f32 %v3696_v19, %v12555_v61  ;;  %v11562_v61 = vld [vmem:[%s15075_s13 + $0x124] ss:$16 sps:$4 sm:$0xff]  }
0x10a0   : > { %v13400_v6 = vadd.f32 %v3697_v3, %v12557_v63  ;;  %v11565_v63 = vld [vmem:[%s15075_s13 + $0x12c] ss:$16 sps:$4 sm:$0xff]   ;;  %4173 = vmatprep.subr.bf16.mxu1 %v11562_v61  ;;  %v11611_v61 = vld [vmem:[%s15077_s15 + $0x110] ss:$8 sps:$4 sm:$0xff]  }
0x10a1   : > { %v3707_v7 = vmul.f32 %v13397_v4, %v13397_v4  ;;  %4214 = vmatprep.subr.bf16.mxu0 %v11565_v63  ;;  %4174 = vmatpush1.bf16.msra.mxu1 %v11560_v10  ;;  %v11616_v63 = vld [vmem:[%s15077_s15 + $0x24] ss:$8 sps:$4 sm:$0xff]  }
0x10a2   : > { %v3702_v9 = vadd.f32 %v13400_v6, %v13397_v4  ;;  %v3708_v20 = vmul.f32 %v13400_v6, %v13400_v6  ;;  %4215 = vmatpush1.bf16.msra.mxu0 %v11563_v59  ;;  %4175 = vmatprep.subr.bf16.mxu1 %v11568_v5  ;;  %v11619_v10 = vld [vmem:[%s15077_s15 + $0x124] ss:$8 sps:$4 sm:$0xff]   ;;  %v11614_v59 = vld [vmem:[%s15077_s15 + $0x20] ss:$8 sps:$4 sm:$0xff]  }
0x10a3   : > { %4216 = vmatprep.subr.bf16.mxu0 %v11571_v29  ;;  %v11617_v5 = vld [vmem:[%s15077_s15 + $0x120] ss:$8 sps:$4 sm:$0xff]   ;;  %v11622_v29 = vld [vmem:[%s15077_s15 + $0x34] ss:$8 sps:$4 sm:$0xff]  }
0x10a4   : > { %3703 = vadd.xlane.f32.xlu0 %v3702_v9  ;;  %v3709_v23 = vadd.f32 %v3708_v20, %v3707_v7  ;;  %v11605_v7 = vld [vmem:[%s15077_s15 + $0x100] ss:$8 sps:$4 sm:$0xff]   ;;  %v11610_v9 = vld [vmem:[%s15077_s15 + $0x14] ss:$8 sps:$4 sm:$0xff]  }
0x10a5   : > { %4176 = vmatpush1.bf16.msra.mxu1 %v11566_v11  ;;  %v11613_v20 = vld [vmem:[%s15077_s15 + $0x114] ss:$8 sps:$4 sm:$0xff]  }
0x10a6   : > { %3710 = vadd.xlane.f32.xlu1 %v3709_v23  ;;  %4217 = vmatpush1.bf16.msra.mxu0 %v11569_v12  ;;  %v11608_v23 = vld [vmem:[%s15077_s15 + $0x10] ss:$8 sps:$4 sm:$0xff]   ;;  %v11625_v11 = vld [vmem:[%s15077_s15 + $0x134] ss:$8 sps:$4 sm:$0xff]  }
0x10a7   : > { %4177 = vmatprep.subr.bf16.mxu1 %v11574_v13  ;;  %4218 = vmatprep.subr.bf16.mxu0 %v11577_v14  ;;  %v11620_v12 = vld [vmem:[%s15077_s15 + $0x30] ss:$8 sps:$4 sm:$0xff]   ;;  %v11628_v14 = vld [vmem:[%s15077_s15 + $0x44] ss:$8 sps:$4 sm:$0xff]  }
0x10a8   : > { %v11623_v13 = vld [vmem:[%s15077_s15 + $0x130] ss:$8 sps:$4 sm:$0xff]  }
0x10a9   : > { %4178 = vmatpush1.bf16.msra.mxu1 %v11572_v15  ;;  %v11631_v15 = vld [vmem:[%s15077_s15 + $0x144] ss:$8 sps:$4 sm:$0xff]  }
0x10aa   : > { %4219 = vmatpush1.bf16.msra.mxu0 %v11575_v16  ;;  %4179 = vmatprep.subr.bf16.mxu1 %v11580_v17  ;;  %v11626_v16 = vld [vmem:[%s15077_s15 + $0x40] ss:$8 sps:$4 sm:$0xff]  }
0x10ab   : > { %4220 = vmatprep.subr.bf16.mxu0 %v11583_v24  ;;  %v11629_v17 = vld [vmem:[%s15077_s15 + $0x140] ss:$8 sps:$4 sm:$0xff]   ;;  %v11632_v24 = vld [vmem:[%s15077_s15 + $0x50] ss:$8 sps:$4 sm:$0xff]  }
0x10ad   : > { %4180 = vmatpush1.bf16.msra.mxu1 %v11578_v18  ;;  %v11634_v18 = vld [vmem:[%s15077_s15 + $0x54] ss:$8 sps:$4 sm:$0xff]  }
0x10ae   : > { %4221 = vmatpush1.bf16.msra.mxu0 %v11581_v22  ;;  %4181 = vmatprep.subr.bf16.mxu1 %v11586_v25  ;;  %v11637_v22 = vld [vmem:[%s15077_s15 + $0x154] ss:$8 sps:$4 sm:$0xff]   ;;  %v11635_v25 = vld [vmem:[%s15077_s15 + $0x150] ss:$8 sps:$4 sm:$0xff]  }
0x10af   : > { %4222 = vmatprep.subr.bf16.mxu0 %v11589_v27  ;;  %v11640_v27 = vld [vmem:[%s15077_s15 + $0x64] ss:$8 sps:$4 sm:$0xff]  }
0x10b1   : > { %4182 = vmatpush1.bf16.msra.mxu1 %v11584_v28  ;;  %v11643_v28 = vld [vmem:[%s15077_s15 + $0x164] ss:$8 sps:$4 sm:$0xff]  }
0x10b2   : > { %4223 = vmatpush1.bf16.msra.mxu0 %v11587_v30  ;;  %4183 = vmatprep.subr.bf16.mxu1 %v11592_v8  ;;  %v11638_v30 = vld [vmem:[%s15077_s15 + $0x60] ss:$8 sps:$4 sm:$0xff]  }
0x10b3   : > { %4224 = vmatprep.subr.bf16.mxu0 %v11595_v31  ;;  %v11641_v8 = vld [vmem:[%s15077_s15 + $0x160] ss:$8 sps:$4 sm:$0xff]   ;;  %v11646_v31 = vld [vmem:[%s15077_s15 + $0x74] ss:$8 sps:$4 sm:$0xff]  }
0x10b5   : > { %4184 = vmatpush1.bf16.msra.mxu1 %v11590_v32  ;;  %v11649_v32 = vld [vmem:[%s15077_s15 + $0x174] ss:$8 sps:$4 sm:$0xff]  }
0x10b6   : > { %4225 = vmatpush1.bf16.msra.mxu0 %v11593_v33  ;;  %4185 = vmatprep.subr.bf16.mxu1 %v11598_v57  ;;  %v11644_v33 = vld [vmem:[%s15077_s15 + $0x70] ss:$8 sps:$4 sm:$0xff]  }
0x10b7   : > { %4226 = vmatprep.subr.bf16.mxu0 %v11601_v34  ;;  %v11647_v57 = vld [vmem:[%s15077_s15 + $0x170] ss:$8 sps:$4 sm:$0xff]   ;;  %v11652_v34 = vld [vmem:[%s15077_s15 + $0x84] ss:$8 sps:$4 sm:$0xff]  }
0x10b9   : > { %4186 = vmatpush1.bf16.msra.mxu1 %v11596_v60  ;;  %v11655_v60 = vld [vmem:[%s15077_s15 + $0x184] ss:$8 sps:$4 sm:$0xff]  }
0x10ba   : > { %4227 = vmatpush1.bf16.msra.mxu0 %v11599_v35  ;;  %4641 = vmatprep.subr.bf16.mxu1 %v11604_v36  ;;  %v11650_v35 = vld [vmem:[%s15077_s15 + $0x80] ss:$8 sps:$4 sm:$0xff]  }
0x10bb   : > { %4682 = vmatprep.subr.bf16.mxu0 %v11607_v37  ;;  %v11653_v36 = vld [vmem:[%s15077_s15 + $0x180] ss:$8 sps:$4 sm:$0xff]   ;;  %v11658_v37 = vld [vmem:[%s15077_s15 + $0x94] ss:$8 sps:$4 sm:$0xff]  }
0x1131   : > { %v3704_v38 = vpop.xlane.xlu0 %3703 }
0x1132   : > { %v3706_v39 = vmul.f32 0.00390625, %v3704_v38  ;;  %v11661_v38 = vld [vmem:[%s15077_s15 + $0x194] ss:$8 sps:$4 sm:$0xff]  }
0x1133   : > { %v3711_v40 = vpop.xlane.xlu1 %3710 }
0x1134   : > { %v3712_v41 = vmul.f32 0.00390625, %v3711_v40  ;;  %v3713_v42 = vmul.f32 %v3706_v39, %v3706_v39  ;;  %v3715_v21 = vsub.f32 %v13397_v4, %v3706_v39  ;;  %v3716_v46 = vsub.f32 %v13400_v6, %v3706_v39  ;;  %v11602_v6 = vld [vmem:[%s15077_s15] ss:$8 sps:$4 sm:$0xff]   ;;  %v11656_v39 = vld [vmem:[%s15077_s15 + $0x90] ss:$8 sps:$4 sm:$0xff]  }
0x1135   : > { %v11659_v40 = vld [vmem:[%s15077_s15 + $0x190] ss:$8 sps:$4 sm:$0xff]  }
0x1136   : > { %v3714_v26 = vsub.f32 %v3712_v41, %v3713_v42  ;;  %v11664_v41 = vld [vmem:[%s15077_s15 + $0xa4] ss:$8 sps:$4 sm:$0xff]  }
0x1137   : > { %v11667_v42 = vld [vmem:[%s15077_s15 + $0x1a4] ss:$8 sps:$4 sm:$0xff]  }
0x1138   : > { %v3717_v43 = vadd.f32 1e-05, %v3714_v26  ;;  %v11662_v26 = vld [vmem:[%s15077_s15 + $0xa0] ss:$8 sps:$4 sm:$0xff]  }
0x113a   : > { %12146 = vrsqrt.f32 %v3717_v43  ;;  %v11665_v43 = vld [vmem:[%s15077_s15 + $0x1a0] ss:$8 sps:$4 sm:$0xff]  }
0x1144   : > { %v12147_v49 = vpop.eup %12146 }
0x1145   : > { %v3720_v50 = vmul.f32 %v12147_v49, %v3716_v46  ;;  %v3719_v58 = vmul.f32 %v12147_v49, %v3715_v21  ;;  %v11668_v21 = vld [vmem:[%s15077_s15 + $0xb0] ss:$8 sps:$4 sm:$0xff]   ;;  %v11674_v49 = vld [vmem:[%s15077_s15 + $0xc0] ss:$8 sps:$4 sm:$0xff]  }
0x1146   : > { %v11671_v46 = vld [vmem:[%s15077_s15 + $0x1b0] ss:$8 sps:$4 sm:$0xff]  }
0x1147   : > { %v3733_v62 = vmul.f32 %v3729_v48, %v3720_v50  ;;  %v3732_v0 = vmul.f32 %v3725_v47, %v3719_v58  ;;  %v11676_v47 = vld [vmem:[%s15077_s15 + $0xc4] ss:$8 sps:$4 sm:$0xff]   ;;  %v11677_v50 = vld [vmem:[%s15077_s15 + $0x1c0] ss:$8 sps:$4 sm:$0xff]   ;;  %v11680_v58 = vld [vmem:[%s15077_s15 + $0xd0] ss:$8 sps:$4 sm:$0xff]  }
0x1148   : > { %v11679_v48 = vld [vmem:[%s15077_s15 + $0x1c4] ss:$8 sps:$4 sm:$0xff]  }
0x1149   : > { %v13510_v19 = vadd.f32 %v3742_v53, %v3733_v62  ;;  %v13512_v1 = vadd.f32 %v3738_v52, %v3732_v0  ;;  %v11682_v52 = vld [vmem:[%s15077_s15 + $0xd4] ss:$8 sps:$4 sm:$0xff]   ;;  %v11683_v62 = vld [vmem:[%s15077_s15 + $0x1d0] ss:$8 sps:$4 sm:$0xff]   ;;  %v11688_v0 = vld [vmem:[%s15077_s15 + $0xe4] ss:$8 sps:$4 sm:$0xff]  }
0x114a   : > { %v11685_v53 = vld [vmem:[%s15077_s15 + $0x1d4] ss:$8 sps:$4 sm:$0xff]  }
0x114b   : > { %v3748_v3 = vpack.c.bf16 %v13510_v19, %v13510_v19  ;;  %v3747_v4 = vpack.c.bf16 %v13512_v1, %v13512_v1 }
0x114d   : > { %4187 = vmatprep.mubr.bf16.mxu1 %v3748_v3  ;;  %4228 = vmatprep.mubr.bf16.mxu0 %v3748_v3  ;;  %v11691_v3 = vld [vmem:[%s15077_s15 + $0x1e4] ss:$8 sps:$4 sm:$0xff]  }
0x114e   : > { %4188 = vmatmul.mubr.bf16.vlgmr.msra.gmra.mrb[48].mxu1 %v3747_v4  ;;  %4229 = vmatmul.mubr.bf16.vlgmr.msra.gmra.mrb[52].mxu0 %v3747_v4  ;;  %v11686_v4 = vld [vmem:[%s15077_s15 + $0xe0] ss:$8 sps:$4 sm:$0xff]  }
0x114f   : > { %4642 = vmatpush1.bf16.msra.mxu1 %v11602_v6  ;;  %4683 = vmatpush1.bf16.msra.mxu0 %v11605_v7  ;;  %v11689_v6 = vld [vmem:[%s15077_s15 + $0x1e0] ss:$8 sps:$4 sm:$0xff]   ;;  %v11694_v7 = vld [vmem:[%s15077_s15 + $0xf4] ss:$8 sps:$4 sm:$0xff]  }
0x1150   : > { %4643 = vmatprep.subr.bf16.mxu1 %v11610_v9  ;;  %4684 = vmatprep.subr.bf16.mxu0 %v11613_v20  ;;  %v11697_v9 = vld [vmem:[%s15077_s15 + $0x1f4] ss:$8 sps:$4 sm:$0xff]   ;;  %v11692_v20 = vld [vmem:[%s15077_s15 + $0xf0] ss:$8 sps:$4 sm:$0xff]  }
0x1153   : > { %4644 = vmatpush1.bf16.msra.mxu1 %v11608_v23  ;;  %4685 = vmatpush1.bf16.msra.mxu0 %v11611_v61  ;;  %v11695_v23 = vld [vmem:[%s15077_s15 + $0x1f0] ss:$8 sps:$4 sm:$0xff]   ;;  %v3825_v61 = vsub.s32 2, %v12542_v54 }
0x1154   : > { %4645 = vmatprep.subr.bf16.mxu1 %v11616_v63  ;;  %4686 = vmatprep.subr.bf16.mxu0 %v11619_v10  ;;  %v3813_v63 = vld [vmem:[%s15076_s14] sm:$0xf]  ;;  %v3829_v10 = vsub.s32 3, %v12542_v54 }
0x1157   : > { %4646 = vmatpush1.bf16.msra.mxu1 %v11614_v59  ;;  %4687 = vmatpush1.bf16.msra.mxu0 %v11617_v5  ;;  %v3818_v59 = vrot.slane %v3813_v63, %v12545_v55  ;;  %v3826_v5 = vrot.slane %v3813_v63, %v3825_v61 }
0x1158   : > { %4647 = vmatprep.subr.bf16.mxu1 %v11622_v29  ;;  %4688 = vmatprep.subr.bf16.mxu0 %v11625_v11  ;;  %v3822_v29 = vrot.slane %v3813_v63, %v12548_v56  ;;  %v3830_v11 = vrot.slane %v3813_v63, %v3829_v10  ;;  %v11709_v63 = vld [vmem:[%s15067_s5 + $0x210] sm:$0xff]  }
0x115b   : > { %4648 = vmatpush1.bf16.msra.mxu1 %v11620_v12  ;;  %4689 = vmatpush1.bf16.msra.mxu0 %v11623_v13 }
0x115c   : > { %4649 = vmatprep.subr.bf16.mxu1 %v11628_v14  ;;  %4690 = vmatprep.subr.bf16.mxu0 %v11631_v15 }
0x115f   : > { %4650 = vmatpush1.bf16.msra.mxu1 %v11626_v16  ;;  %4691 = vmatpush1.bf16.msra.mxu0 %v11629_v17 }
0x1160   : > { %4651 = vmatprep.subr.bf16.mxu1 %v11634_v18  ;;  %4692 = vmatprep.subr.bf16.mxu0 %v11637_v22 }
0x1163   : > { %4652 = vmatpush1.bf16.msra.mxu1 %v11632_v24  ;;  %4693 = vmatpush1.bf16.msra.mxu0 %v11635_v25 }
0x1164   : > { %4653 = vmatprep.subr.bf16.mxu1 %v11640_v27  ;;  %4694 = vmatprep.subr.bf16.mxu0 %v11643_v28 }
0x1167   : > { %4654 = vmatpush1.bf16.msra.mxu1 %v11638_v30  ;;  %4695 = vmatpush1.bf16.msra.mxu0 %v11641_v8 }
0x1168   : > { %4655 = vmatprep.subr.bf16.mxu1 %v11646_v31  ;;  %4696 = vmatprep.subr.bf16.mxu0 %v11649_v32 }
0x116b   : > { %4656 = vmatpush1.bf16.msra.mxu1 %v11644_v33  ;;  %4697 = vmatpush1.bf16.msra.mxu0 %v11647_v57 }
0x116c   : > { %4657 = vmatprep.subr.bf16.mxu1 %v11652_v34  ;;  %4698 = vmatprep.subr.bf16.mxu0 %v11655_v60 }
0x116f   : > { %4658 = vmatpush1.bf16.msra.mxu1 %v11650_v35  ;;  %4699 = vmatpush1.bf16.msra.mxu0 %v11653_v36  ;;  %v11698_v35 = vld [vmem:[%s15111_s27 + $0x240] sm:$0xff]  }
0x1170   : > { %4659 = vmatprep.subr.bf16.mxu1 %v11658_v37  ;;  %4700 = vmatprep.subr.bf16.mxu0 %v11661_v38  ;;  %v11699_v36 = vld [vmem:[%s15111_s27 + $0x200] sm:$0xff]  }
0x1171   : > { %v11700_v37 = vld [vmem:[%s15067_s5 + $0x240] sm:$0xff]  }
0x1172   : > { %v11701_v38 = vld [vmem:[%s15067_s5 + $0x200] sm:$0xff]  }
0x1173   : > { %4660 = vmatpush1.bf16.msra.mxu1 %v11656_v39  ;;  %4701 = vmatpush1.bf16.msra.mxu0 %v11659_v40  ;;  %v11702_v39 = vld [vmem:[%s15111_s27 + $0x248] sm:$0xff]   ;;  %v4309_v40 = vld [vmem:[%s15078_s16] sm:$0x3] }
0x1174   : > { %4661 = vmatprep.subr.bf16.mxu1 %v11664_v41  ;;  %4702 = vmatprep.subr.bf16.mxu0 %v11667_v42  ;;  %v4314_v41 = vrot.slane %v4309_v40, %v12545_v55  ;;  %v4318_v42 = vrot.slane %v4309_v40, %v12548_v56  ;;  %v4726_v40 = vld [vmem:[%s15080_s18] sm:$0x3] }
0x1177   : > { %4662 = vmatpush1.bf16.msra.mxu1 %v11662_v26  ;;  %4703 = vmatpush1.bf16.msra.mxu0 %v11665_v43 }
0x1178   : > { %4663 = vmatprep.subr.bf16.mxu1 %v11670_v44  ;;  %4704 = vmatprep.subr.bf16.mxu0 %v11673_v45 }
0x117b   : > { %4664 = vmatpush1.bf16.msra.mxu1 %v11668_v21  ;;  %4705 = vmatpush1.bf16.msra.mxu0 %v11671_v46 }
0x117c   : > { %4665 = vmatprep.subr.bf16.mxu1 %v11676_v47  ;;  %4706 = vmatprep.subr.bf16.mxu0 %v11679_v48 }
0x117f   : > { %4666 = vmatpush1.bf16.msra.mxu1 %v11674_v49  ;;  %4707 = vmatpush1.bf16.msra.mxu0 %v11677_v50 }
0x1180   : > { %4667 = vmatprep.subr.bf16.mxu1 %v11682_v52  ;;  %4708 = vmatprep.subr.bf16.mxu0 %v11685_v53 }
0x1183   : > { %4668 = vmatpush1.bf16.msra.mxu1 %v11680_v58  ;;  %4709 = vmatpush1.bf16.msra.mxu0 %v11683_v62 }
0x1184   : > { %4669 = vmatprep.subr.bf16.mxu1 %v11688_v0  ;;  %4710 = vmatprep.subr.bf16.mxu0 %v11691_v3 }
0x1187   : > { %4670 = vmatpush1.bf16.msra.mxu1 %v11686_v4  ;;  %4711 = vmatpush1.bf16.msra.mxu0 %v11689_v6 }
0x1188   : > { %4671 = vmatprep.subr.bf16.mxu1 %v11694_v7  ;;  %4712 = vmatprep.subr.bf16.mxu0 %v11697_v9  ;;  %v11705_v7 = vld [vmem:[%s15067_s5 + $0x208] sm:$0xff]   ;;  %v11706_v9 = vld [vmem:[%s15111_s27 + $0x250] sm:$0xff]  }
0x118b   : > { %4672 = vmatpush1.bf16.msra.mxu1 %v11692_v20  ;;  %4713 = vmatpush1.bf16.msra.mxu0 %v11695_v23  ;;  %v11707_v20 = vld [vmem:[%s15111_s27 + $0x210] sm:$0xff]  }
0x118c   : > { %10824 = vmatprep.subr.bf16.mxu1 %v11698_v35  ;;  %10846 = vmatprep.subr.bf16.mxu0 %v11700_v37  ;;  %v11708_v23 = vld [vmem:[%s15067_s5 + $0x250] sm:$0xff]  }
0x1221   : > { %v4189_v12 = vpop.f32.mrb[48].mxu1  ;;  %v4230_v13 = vpop.f32.mrb[52].mxu0 }
0x1222   : > { %v4190_v14 = vadd.f32 %v4189_v12, %v3818_v59  ;;  %v4231_v15 = vadd.f32 %v4230_v13, %v3826_v5  ;;  %v4191_v16 = vpop.f32.mrb[49].mxu1  ;;  %v4232_v17 = vpop.f32.mrb[53].mxu0  ;;  %v11710_v59 = vld [vmem:[%s15111_s27 + $0x258] sm:$0xff]   ;;  %v11714_v12 = vld [vmem:[%s15111_s27 + $0x260] sm:$0xff]  }
0x1223   : > { %v4192_v18 = vadd.f32 %v4191_v16, %v3822_v29  ;;  %v4233_v22 = vadd.f32 %v4232_v17, %v3830_v11  ;;  %v4193_v24 = vpop.f32.mrb[50].mxu1  ;;  %v4234_v25 = vpop.f32.mrb[54].mxu0  ;;  %v11711_v5 = vld [vmem:[%s15111_s27 + $0x218] sm:$0xff]   ;;  %v11715_v13 = vld [vmem:[%s15111_s27 + $0x220] sm:$0xff]   ;;  %v11718_v16 = vld [vmem:[%s15111_s27 + $0x268] sm:$0xff]  }
0x1224   : > { %v4237_v27 = vmax.f32 %v4190_v14, 0.0  ;;  %v4239_v28 = vmax.f32 %v4231_v15, 0.0  ;;  %v4194_v30 = vpop.f32.mrb[51].mxu1  ;;  %v4235_v8 = vpop.f32.mrb[55].mxu0  ;;  %v11712_v29 = vld [vmem:[%s15067_s5 + $0x258] sm:$0xff]   ;;  %v11716_v14 = vld [vmem:[%s15067_s5 + $0x260] sm:$0xff]  }
0x1225   : > { %v4238_v31 = vmax.f32 %v4192_v18, 0.0  ;;  %v4240_v32 = vmax.f32 %v4233_v22, 0.0  ;;  %v11713_v11 = vld [vmem:[%s15067_s5 + $0x218] sm:$0xff]   ;;  %v11717_v15 = vld [vmem:[%s15067_s5 + $0x220] sm:$0xff]   ;;  %v11719_v17 = vld [vmem:[%s15111_s27 + $0x228] sm:$0xff]  }
0x1226   : > { %v4241_v34 = vpack.c.bf16 %v4237_v27, %v4237_v27  ;;  %v4243_v60 = vpack.c.bf16 %v4239_v28, %v4239_v28  ;;  %v11720_v18 = vld [vmem:[%s15067_s5 + $0x268] sm:$0xff]   ;;  %v11722_v24 = vld [vmem:[%s15111_s27 + $0x270] sm:$0xff]   ;;  %v11726_v30 = vld [vmem:[%s15111_s27 + $0x278] sm:$0xff]  }
0x1227   : > { %v4242_v33 = vpack.c.bf16 %v4238_v31, %v4238_v31  ;;  %v4244_v57 = vpack.c.bf16 %v4240_v32, %v4240_v32  ;;  %v11721_v22 = vld [vmem:[%s15067_s5 + $0x228] sm:$0xff]   ;;  %v11723_v25 = vld [vmem:[%s15111_s27 + $0x230] sm:$0xff]   ;;  %v11727_v8 = vld [vmem:[%s15111_s27 + $0x238] sm:$0xff]  }
0x1228   : > { %v11724_v27 = vld [vmem:[%s15067_s5 + $0x270] sm:$0xff]   ;;  %v11728_v31 = vld [vmem:[%s15067_s5 + $0x278] sm:$0xff]  }
0x1229   : > { %4673 = vmatprep.mubr.bf16.mxu1 %v4242_v33  ;;  %4714 = vmatprep.mubr.bf16.mxu0 %v4244_v57  ;;  %v11725_v28 = vld [vmem:[%s15067_s5 + $0x230] sm:$0xff]   ;;  %v11729_v32 = vld [vmem:[%s15067_s5 + $0x238] sm:$0xff]   ;;  %v11730_v33 = vld [vmem:[%s15069_s7 + $0x240] sm:$0xff]  }
0x122a   : > { %4674 = vmatmul.mubr.bf16.vlgmr.msra.gmra.mrb[52].mxu1 %v4241_v34  ;;  %4715 = vmatmul.mubr.bf16.vlgmr.msra.gmra.mrb[56].mxu0 %v4243_v60 }
0x122b   : > { %10825 = vmatpush3.bf16.msra.mxu1 %v11699_v36  ;;  %10847 = vmatpush3.bf16.msra.mxu0 %v11701_v38 }
0x122c   : > { %10826 = vmatprep.subr.bf16.mxu1 %v11702_v39  ;;  %v4725_v39 = vld [vmem:[%s15079_s17] sm:$0x3] }
0x12fd   : > { %v4675_v26 = vpop.f32.mrb[52].mxu1  ;;  %v4716_v43 = vpop.f32.mrb[56].mxu0 }
0x12fe   : > { %v4676_v44 = vadd.f32 %v4675_v26, %v4314_v41  ;;  %v4677_v45 = vpop.f32.mrb[53].mxu1  ;;  %v4718_v21 = vpop.f32.mrb[57].mxu0  ;;  %v4749_v26 = vrot.slane %v4725_v39, %v12545_v55 }
0x12ff   : > { %v4678_v46 = vadd.f32 %v4677_v45, %v4318_v42  ;;  %v4679_v47 = vpop.f32.mrb[54].mxu1  ;;  %v4720_v48 = vpop.f32.mrb[58].mxu0  ;;  %v4762_v45 = vrot.slane %v4726_v40, %v12545_v55 }
0x1300   : > { %v4717_v49 = vadd.f32 %v4716_v43, %v4676_v44  ;;  %v4680_v50 = vpop.f32.mrb[55].mxu1  ;;  %v4721_v52 = vpop.f32.mrb[59].mxu0  ;;  %v4753_v43 = vrot.slane %v4725_v39, %v12548_v56 }
0x1301   : > { %v4719_v53 = vadd.f32 %v4718_v21, %v4678_v46  ;;  %v4766_v21 = vrot.slane %v4726_v40, %v12548_v56 }
0x1302   : > { %v13736_v58 = vadd.f32 %v4717_v49, %v13512_v1  ;;  %v11703_v1 = vld [vmem:[%s15111_s27 + $0x208] sm:$0xff]  }
0x1303   : > { %v13739_v62 = vadd.f32 %v4719_v53, %v13510_v19  ;;  %v11704_v19 = vld [vmem:[%s15067_s5 + $0x248] sm:$0xff]   ;;  %10827 = vmatpush3.bf16.msra.mxu1 %v11703_v1  ;;  %v11736_v1 = vld [vmem:[%s15069_s7 + $0x258] sm:$0xff]  }
0x1304   : > { %v4731_v0 = vmul.f32 %v13736_v58, %v13736_v58  ;;  %10848 = vmatprep.subr.bf16.mxu0 %v11704_v19  ;;  %10828 = vmatprep.subr.bf16.mxu1 %v11706_v9  ;;  %v11737_v19 = vld [vmem:[%s15069_s7 + $0x218] sm:$0xff]   ;;  %v11739_v9 = vld [vmem:[%s15069_s7 + $0x220] sm:$0xff]  }
0x1305   : > { %v4727_v3 = vadd.f32 %v13739_v62, %v13736_v58  ;;  %v4732_v4 = vmul.f32 %v13739_v62, %v13739_v62  ;;  %10849 = vmatpush3.bf16.msra.mxu0 %v11705_v7  ;;  %v11738_v7 = vld [vmem:[%s15069_s7 + $0x260] sm:$0xff]  }
0x1306   : > { %10850 = vmatprep.subr.bf16.mxu0 %v11708_v23  ;;  %v11741_v23 = vld [vmem:[%s15069_s7 + $0x228] sm:$0xff]  }
0x1307   : > { %4728 = vadd.xlane.f32.xlu0 %v4727_v3  ;;  %v4733_v6 = vadd.f32 %v4732_v4, %v4731_v0  ;;  %10829 = vmatpush3.bf16.msra.mxu1 %v11707_v20  ;;  %v11732_v0 = vld [vmem:[%s15069_s7 + $0x248] sm:$0xff]   ;;  %v11734_v4 = vld [vmem:[%s15069_s7 + $0x250] sm:$0xff]  }
0x1308   : > { %10830 = vmatprep.subr.bf16.mxu1 %v11710_v59  ;;  %v11733_v3 = vld [vmem:[%s15069_s7 + $0x208] sm:$0xff]   ;;  %v11743_v59 = vld [vmem:[%s15069_s7 + $0x230] sm:$0xff]  }
0x1309   : > { %4734 = vadd.xlane.f32.xlu1 %v4733_v6  ;;  %10851 = vmatpush3.bf16.msra.mxu0 %v11709_v63  ;;  %v11735_v6 = vld [vmem:[%s15069_s7 + $0x210] sm:$0xff]   ;;  %v11740_v20 = vld [vmem:[%s15069_s7 + $0x268] sm:$0xff]  }
0x130a   : > { %10852 = vmatprep.subr.bf16.mxu0 %v11712_v29  ;;  %v11742_v63 = vld [vmem:[%s15069_s7 + $0x270] sm:$0xff]   ;;  %v11745_v29 = vld [vmem:[%s15069_s7 + $0x238] sm:$0xff]  }
0x130b   : > { %10831 = vmatpush3.bf16.msra.mxu1 %v11711_v5  ;;  %v11744_v5 = vld [vmem:[%s15069_s7 + $0x278] sm:$0xff]  }
0x130c   : > { %10832 = vmatprep.subr.bf16.mxu1 %v11714_v12  ;;  %v11747_v12 = vld [vmem:[%s15067_s5 + $0x280] sm:$0xff]  }
0x130d   : > { %10853 = vmatpush3.bf16.msra.mxu0 %v11713_v11  ;;  %v11746_v11 = vld [vmem:[%s15067_s5 + $0x2c0] sm:$0xff]  }
0x130e   : > { %10854 = vmatprep.subr.bf16.mxu0 %v11716_v14  ;;  %v11749_v14 = vld [vmem:[%s15067_s5 + $0x288] sm:$0xff]  }
0x130f   : > { %10833 = vmatpush3.bf16.msra.mxu1 %v11715_v13  ;;  %v11748_v13 = vld [vmem:[%s15067_s5 + $0x2c8] sm:$0xff]  }
0x1310   : > { %10834 = vmatprep.subr.bf16.mxu1 %v11718_v16  ;;  %v11751_v16 = vld [vmem:[%s15067_s5 + $0x290] sm:$0xff]  }
0x1311   : > { %10855 = vmatpush3.bf16.msra.mxu0 %v11717_v15  ;;  %v11750_v15 = vld [vmem:[%s15067_s5 + $0x2d0] sm:$0xff]  }
0x1312   : > { %10856 = vmatprep.subr.bf16.mxu0 %v11720_v18  ;;  %v11753_v18 = vld [vmem:[%s15067_s5 + $0x298] sm:$0xff]  }
0x1313   : > { %10835 = vmatpush3.bf16.msra.mxu1 %v11719_v17  ;;  %v11752_v17 = vld [vmem:[%s15067_s5 + $0x2d8] sm:$0xff]  }
0x1314   : > { %10836 = vmatprep.subr.bf16.mxu1 %v11722_v24  ;;  %v11755_v24 = vld [vmem:[%s15067_s5 + $0x2a0] sm:$0xff]  }
0x1315   : > { %10857 = vmatpush3.bf16.msra.mxu0 %v11721_v22  ;;  %v11754_v22 = vld [vmem:[%s15067_s5 + $0x2e0] sm:$0xff]  }
0x1316   : > { %10858 = vmatprep.subr.bf16.mxu0 %v11724_v27  ;;  %v11757_v27 = vld [vmem:[%s15067_s5 + $0x2a8] sm:$0xff]  }
0x1317   : > { %10837 = vmatpush3.bf16.msra.mxu1 %v11723_v25  ;;  %v11756_v25 = vld [vmem:[%s15067_s5 + $0x2e8] sm:$0xff]  }
0x1318   : > { %10838 = vmatprep.subr.bf16.mxu1 %v11726_v30  ;;  %v11759_v30 = vld [vmem:[%s15067_s5 + $0x2b0] sm:$0xff]  }
0x1319   : > { %10859 = vmatpush3.bf16.msra.mxu0 %v11725_v28  ;;  %v11758_v28 = vld [vmem:[%s15067_s5 + $0x2f0] sm:$0xff]  }
0x131a   : > { %10860 = vmatprep.subr.bf16.mxu0 %v11728_v31  ;;  %v11761_v31 = vld [vmem:[%s15067_s5 + $0x2b8] sm:$0xff]  }
0x131b   : > { %10839 = vmatpush3.bf16.msra.mxu1 %v11727_v8  ;;  %v11760_v8 = vld [vmem:[%s15067_s5 + $0x2f8] sm:$0xff]  }
0x131c   : > { %10868 = vmatprep.subr.bf16.mxu1 %v11730_v33 }
0x131d   : > { %10861 = vmatpush3.bf16.msra.mxu0 %v11729_v32 }
0x131e   : > { %11152 = vmatprep.subr.bf16.mxu0 %v12235_v51 }
0x1394   : > { %v4729_v57 = vpop.xlane.xlu0 %4728 }
0x1395   : > { %v4730_v34 = vmul.f32 0.00390625, %v4729_v57 }
0x1396   : > { %v4735_v60 = vpop.xlane.xlu1 %4734 }
0x1397   : > { %v4736_v35 = vmul.f32 0.00390625, %v4735_v60  ;;  %v4737_v36 = vmul.f32 %v4730_v34, %v4730_v34  ;;  %v4739_v41 = vsub.f32 %v13736_v58, %v4730_v34  ;;  %v4740_v42 = vsub.f32 %v13739_v62, %v4730_v34  ;;  %v11731_v62 = vld [vmem:[%s15069_s7 + $0x200] sm:$0xff]  }
0x1398   : > { %v9682_v34 = vld [vmem:[%s15068_s6 + $0x4] ss:$0 sm:$0xff] }
0x1399   : > { %v4738_v37 = vsub.f32 %v4736_v35, %v4737_v36 }
0x139b   : > { %v4741_v38 = vadd.f32 1e-05, %v4738_v37 }
0x139d   : > { %12148 = vrsqrt.f32 %v4741_v38 }
0x13a7   : > { %v12149_v44 = vpop.eup %12148 }
0x13a8   : > { %v4743_v46 = vmul.f32 %v12149_v44, %v4739_v41  ;;  %v4744_v47 = vmul.f32 %v12149_v44, %v4740_v42 }
0x13aa   : > { %v4756_v48 = vmul.f32 %v4749_v26, %v4743_v46  ;;  %v4757_v49 = vmul.f32 %v4753_v43, %v4744_v47  ;;  %v9632_v26 = vld [vmem:[%s15114_s4 + $0x4] ss:$0 sm:$0xff] }
0x13ab   : > { %v9732_v46 = vld [vmem:[%s15070_s8 + $0x4] ss:$0 sm:$0xff] }
0x13ac   : > { %v13844_v50 = vadd.f32 %v4762_v45, %v4756_v48  ;;  %v13846_v52 = vadd.f32 %v4766_v21, %v4757_v49 }
0x13ae   : > { %v13850_v53 = vpack.c.bf16 %v13844_v50, %v13844_v50  ;;  %v13854_v58 = vpack.c.bf16 %v13846_v52, %v13846_v52 }
0x13b0   : > { %4942 = vmatprep.mubr.bf16.mxu1 %v13854_v58  ;;  %5119 = vmatprep.mubr.bf16.mxu0 %v13854_v58 }
0x13b1   : > { %4943 = vmatmul.mubr.bf16.vlgmr.msra.gmra.mrb[56].mxu1 %v13850_v53  ;;  %5120 = vmatmul.mubr.bf16.vlgmr.msra.gmra.mrb[60].mxu0 %v13850_v53 }
0x13b2   : > { %10869 = vmatpush3.bf16.msra.mxu1 %v11731_v62  ;;  %5296 = vmatprep.mubr.bf16.mxu1 %v13854_v58 }
0x13b3   : > { %10870 = vmatprep.subr.bf16.mxu1 %v11732_v0  ;;  %11154 = vmatprep.mubr.msk.bf16.mxu0 %vm12236_vm0, %v12235_v51 }
0x13b6   : > { %10871 = vmatpush3.bf16.msra.mxu1 %v11733_v3 }
0x13b7   : > { %10872 = vmatprep.subr.bf16.mxu1 %v11734_v4 }
0x13ba   : > { %10873 = vmatpush3.bf16.msra.mxu1 %v11735_v6 }
0x13bb   : > { %10874 = vmatprep.subr.bf16.mxu1 %v11736_v1  ;;  %v9842_v1 = vld [vmem:[%s15068_s6 + $0x5] ss:$0 sm:$0xff] }
0x13be   : > { %10875 = vmatpush3.bf16.msra.mxu1 %v11737_v19 }
0x13bf   : > { %10876 = vmatprep.subr.bf16.mxu1 %v11738_v7 }
0x13c2   : > { %10877 = vmatpush3.bf16.msra.mxu1 %v11739_v9 }
0x13c3   : > { %10878 = vmatprep.subr.bf16.mxu1 %v11740_v20 }
0x13c6   : > { %10879 = vmatpush3.bf16.msra.mxu1 %v11741_v23 }
0x13c7   : > { %10880 = vmatprep.subr.bf16.mxu1 %v11742_v63 }
0x13ca   : > { %10881 = vmatpush3.bf16.msra.mxu1 %v11743_v59 }
0x13cb   : > { %10882 = vmatprep.subr.bf16.mxu1 %v11744_v5 }
0x13ce   : > { %10883 = vmatpush3.bf16.msra.mxu1 %v11745_v29 }
0x13cf   : > { %10916 = vmatprep.subr.bf16.mxu1 %v11746_v11 }
0x13d1   : > { %5297 = vmatmul.mubr.bf16.vlgmr.msra.gmra.mrb[60].mxu1 %v13850_v53 }
0x13d2   : > { %10917 = vmatpush3.bf16.msra.mxu1 %v11747_v12  ;;  %5768 = vmatprep.mubr.bf16.mxu1 %v13854_v58 }
0x13d3   : > { %10918 = vmatprep.subr.bf16.mxu1 %v11748_v13 }
0x13d6   : > { %10919 = vmatpush3.bf16.msra.mxu1 %v11749_v14 }
0x13d7   : > { %10920 = vmatprep.subr.bf16.mxu1 %v11750_v15 }
0x13da   : > { %10921 = vmatpush3.bf16.msra.mxu1 %v11751_v16 }
0x13db   : > { %10922 = vmatprep.subr.bf16.mxu1 %v11752_v17 }
0x13de   : > { %10923 = vmatpush3.bf16.msra.mxu1 %v11753_v18 }
0x13df   : > { %10924 = vmatprep.subr.bf16.mxu1 %v11754_v22 }
0x13e2   : > { %10925 = vmatpush3.bf16.msra.mxu1 %v11755_v24  ;;  %v11762_v24 = vld [vmem:[%s15111_s27 + $0x2c0] sm:$0xff]  }
0x13e3   : > { %10926 = vmatprep.subr.bf16.mxu1 %v11756_v25 }
0x13e6   : > { %10927 = vmatpush3.bf16.msra.mxu1 %v11757_v27 }
0x13e7   : > { %10928 = vmatprep.subr.bf16.mxu1 %v11758_v28 }
0x13ea   : > { %10929 = vmatpush3.bf16.msra.mxu1 %v11759_v30  ;;  %v11763_v30 = vld [vmem:[%s15111_s27 + $0x280] sm:$0xff]  }
0x13eb   : > { %10930 = vmatprep.subr.bf16.mxu1 %v11760_v8 }
0x13ee   : > { %10931 = vmatpush3.bf16.msra.mxu1 %v11761_v31  ;;  %v11764_v31 = vld [vmem:[%s15111_s27 + $0x2c8] sm:$0xff]  }
0x13ef   : > { %11164 = vmatprep.subr.bf16.mxu1 %v12235_v51 }
0x13f1   : > { %5769 = vmatmul.mubr.bf16.vlgmr.msra.gmra.mrb[64].mxu1 %v13850_v53 }
0x13f2   : > { %11166 = vmatprep.mubr.msk.bf16.mxu1 %vm12236_vm0, %v12235_v51 }
0x1484   : > { %v10840_v32 = vpop.f32.mrb[56].mxu1  ;;  %v10862_v33 = vpop.f32.mrb[60].mxu0 }
0x1485   : > { %v10841_v57 = vpop.f32.mrb[57].mxu1  ;;  %v10863_v60 = vpop.f32.mrb[61].mxu0 }
0x1486   : > { %v10842_v35 = vadd.f32 %v10841_v57, %v10840_v32  ;;  %v10864_v36 = vadd.f32 %v10863_v60, %v10862_v33  ;;  %v10843_v37 = vpop.f32.mrb[58].mxu1  ;;  %v10865_v38 = vpop.f32.mrb[62].mxu0  ;;  %v11765_v32 = vld [vmem:[%s15111_s27 + $0x288] sm:$0xff]   ;;  %v11766_v33 = vld [vmem:[%s15111_s27 + $0x2d0] sm:$0xff]   ;;  %v11769_v60 = vld [vmem:[%s15111_s27 + $0x298] sm:$0xff]  }
0x1487   : > { %v10844_v39 = vpop.f32.mrb[59].mxu1  ;;  %v10866_v40 = vpop.f32.mrb[63].mxu0  ;;  %v11767_v57 = vld [vmem:[%s15111_s27 + $0x290] sm:$0xff]   ;;  %v11772_v37 = vld [vmem:[%s15111_s27 + $0x2e8] sm:$0xff]  }
0x1488   : > { %v5122_v41 = vadd.f32 %v10864_v36, %v9682_v34  ;;  %v4945_v44 = vadd.f32 %v10842_v35, %v9632_v26  ;;  %v11768_v34 = vld [vmem:[%s15111_s27 + $0x2d8] sm:$0xff]   ;;  %v11770_v35 = vld [vmem:[%s15111_s27 + $0x2e0] sm:$0xff]   ;;  %v11773_v38 = vld [vmem:[%s15111_s27 + $0x2a8] sm:$0xff]  }
0x1489   : > { %v11771_v36 = vld [vmem:[%s15111_s27 + $0x2a0] sm:$0xff]   ;;  %v11774_v39 = vld [vmem:[%s15111_s27 + $0x2f0] sm:$0xff]  }
0x148a   : > { %v5305_v42 = vpack.c.bf16 %v5122_v41, %v5122_v41  ;;  %v5304_v45 = vpack.c.bf16 %v4945_v44, %v4945_v44  ;;  %v11775_v40 = vld [vmem:[%s15111_s27 + $0x2b0] sm:$0xff]   ;;  %v11776_v41 = vld [vmem:[%s15111_s27 + $0x2f8] sm:$0xff]   ;;  %v11778_v26 = vld [vmem:[%s15069_s7 + $0x2c0] sm:$0xff]  }
0x148b   : > { %v11780_v44 = vld [vmem:[%s15069_s7 + $0x2c8] sm:$0xff]  }
0x148c   : > { %v5310_v43 = vsel %vm1279_vm1, %v5305_v42, 0  ;;  %v11777_v42 = vld [vmem:[%s15111_s27 + $0x2b8] sm:$0xff]  }
0x148d   : > { %11153 = vmatpush3.bf16.xpose.msra.mxu0 %v5310_v43  ;;  %v11779_v43 = vld [vmem:[%s15069_s7 + $0x280] sm:$0xff]  }
0x148e   : > { %11158 = vmatprep.subr.bf16.mxu0 %v12235_v51 }
0x1494   : > { %11155 = vmatmul.mubr.msk.bf16.vlgmr.msra.gmra.mrb[64].mxu0 %vm1279_vm1, %v5304_v45  ;;  %v11781_v45 = vld [vmem:[%s15069_s7 + $0x288] sm:$0xff]  }
0x1495   : > { %11160 = vmatprep.mubr.msk.bf16.mxu0 %vm12236_vm0, %v12235_v51 }
0x14a4   : > { %v10884_v21 = vpop.f32.mrb[60].mxu1 }
0x14a5   : > { %v10885_v47 = vpop.f32.mrb[61].mxu1 }
0x14a6   : > { %v10886_v48 = vadd.f32 %v10885_v47, %v10884_v21  ;;  %v10887_v49 = vpop.f32.mrb[62].mxu1  ;;  %v11782_v21 = vld [vmem:[%s15069_s7 + $0x2d0] sm:$0xff]   ;;  %v11784_v47 = vld [vmem:[%s15069_s7 + $0x2d8] sm:$0xff]  }
0x14a7   : > { %v10888_v62 = vpop.f32.mrb[63].mxu1  ;;  %v11786_v49 = vld [vmem:[%s15069_s7 + $0x2e0] sm:$0xff]  }
0x14a8   : > { %v5299_v0 = vadd.f32 %v10886_v48, %v9732_v46  ;;  %v11783_v46 = vld [vmem:[%s15069_s7 + $0x290] sm:$0xff]   ;;  %v11785_v48 = vld [vmem:[%s15069_s7 + $0x298] sm:$0xff]   ;;  %v11787_v62 = vld [vmem:[%s15069_s7 + $0x2a0] sm:$0xff]  }
0x14aa   : > { %v5365_v3 = vpack.c.bf16 %v5299_v0, %v5299_v0  ;;  %v11788_v0 = vld [vmem:[%s15069_s7 + $0x2e8] sm:$0xff]  }
0x14ac   : > { %v5370_v4 = vsel %vm1344_vm2, %v5365_v3, 0  ;;  %v11789_v3 = vld [vmem:[%s15069_s7 + $0x2a8] sm:$0xff]  }
0x14ad   : > { %11159 = vmatpush3.bf16.msra.mxu0 %v5370_v4  ;;  %v11790_v4 = vld [vmem:[%s15069_s7 + $0x2f0] sm:$0xff]  }
0x14ae   : > { %10894 = vmatprep.subr.bf16.mxu0 %v11762_v24  ;;  %v11810_v24 = vld [vmem:[%s15067_s5 + $0x350] sm:$0xff]  }
0x14c4   : > { %v10932_v6 = vpop.f32.mrb[64].mxu1 }
0x14c5   : > { %v10933_v19 = vpop.f32.mrb[65].mxu1 }
0x14c6   : > { %v10934_v7 = vadd.f32 %v10933_v19, %v10932_v6  ;;  %v10935_v9 = vpop.f32.mrb[66].mxu1  ;;  %v11791_v6 = vld [vmem:[%s15069_s7 + $0x2b0] sm:$0xff]   ;;  %v11793_v19 = vld [vmem:[%s15069_s7 + $0x2b8] sm:$0xff]  }
0x14c7   : > { %v10936_v20 = vpop.f32.mrb[67].mxu1  ;;  %v11794_v9 = vld [vmem:[%s15071_s9 + $0x100] ss:$8 sps:$4 sm:$0xff]  }
0x14c8   : > { %v5771_v23 = vadd.f32 %v10934_v7, %v9842_v1  ;;  %v11792_v1 = vld [vmem:[%s15069_s7 + $0x2f8] sm:$0xff]   ;;  %v11796_v7 = vld [vmem:[%s15071_s9 + $0x104] ss:$8 sps:$4 sm:$0xff]  }
0x14c9   : > { %v11799_v20 = vld [vmem:[%s15071_s9 + $0x114] ss:$8 sps:$4 sm:$0xff]  }
0x14ca   : > { %v5954_v63 = vpack.c.bf16 %v5771_v23, %v5771_v23  ;;  %v11797_v23 = vld [vmem:[%s15071_s9 + $0x110] ss:$8 sps:$4 sm:$0xff]  }
0x14cc   : > { %v5959_v59 = vsel %vm1279_vm1, %v5954_v63, 0  ;;  %v11802_v63 = vld [vmem:[%s15071_s9 + $0x124] ss:$8 sps:$4 sm:$0xff]  }
0x14cd   : > { %11165 = vmatpush3.bf16.xpose.msra.mxu1 %v5959_v59  ;;  %v11800_v59 = vld [vmem:[%s15071_s9 + $0x120] ss:$8 sps:$4 sm:$0xff]  }
0x14ce   : > { %11170 = vmatprep.subr.bf16.mxu1 %v12235_v51 }
0x1567   : > { %v5346_v5 = vpop.f32.mrb[64].mxu0 }
0x1568   : > { %v5352_v29 = vmul.f32 0.125, %v5346_v5  ;;  %v11156_v11 = vpop.f32.mrb[65].mxu0  ;;  %v11805_v5 = vld [vmem:[%s15071_s9 + $0x134] ss:$8 sps:$4 sm:$0xff]  }
0x1569   : > { %v5349_v12 = vpop.f32.mrb[66].mxu0  ;;  %v11806_v11 = vld [vmem:[%s15067_s5 + $0x340] sm:$0xff]  }
0x156a   : > { %v11157_v13 = vpop.f32.mrb[67].mxu0  ;;  %v5353_v14 = vsel %vm1327_vm3, %v5352_v29, -inf }
0x156b   : > { %5354 = vmax.xlane.f32.xlu0 %v5353_v14  ;;  %v11807_v13 = vld [vmem:[%s15067_s5 + $0x300] sm:$0xff]  }
0x15f8   : > { %v5355_v15 = vpop.xlane.xlu0 %5354 }
0x15f9   : > { %v5356_v16 = vsub.f32 %v5352_v29, %v5355_v15  ;;  %v11803_v29 = vld [vmem:[%s15071_s9 + $0x130] ss:$8 sps:$4 sm:$0xff]  }
0x15fb   : > { %v5357_v17 = vmul.f32 1.442695, %v5356_v16  ;;  %v11808_v16 = vld [vmem:[%s15067_s5 + $0x348] sm:$0xff]  }
0x15fd   : > { %12150 = vpow2.f32 %v5357_v17 }
0x1607   : > { %v12151_v18 = vpop.eup %12150 }
0x1608   : > { %v5359_v22 = vsel %vm1327_vm3, %v12151_v18, 0.0 }
0x1609   : > { %5360 = vadd.xlane.f32.xlu1 %v5359_v22  ;;  %v11809_v22 = vld [vmem:[%s15067_s5 + $0x308] sm:$0xff]  }
0x1696   : > { %v5361_v25 = vpop.xlane.xlu1 %5360 }
0x1697   : > { %12152 = vrcp.f32 %v5361_v25  ;;  %v11811_v25 = vld [vmem:[%s15067_s5 + $0x310] sm:$0xff]  }
0x16a1   : > { %v12153_v27 = vpop.eup %12152 }
0x16a2   : > { %v5363_v28 = vmul.f32 %v12153_v27, %v12151_v18  ;;  %v11812_v27 = vld [vmem:[%s15067_s5 + $0x358] sm:$0xff]  }
0x16a4   : > { %v5364_v8 = vpack.c.bf16 %v5363_v28, %v5363_v28  ;;  %v11813_v28 = vld [vmem:[%s15067_s5 + $0x318] sm:$0xff]  }
0x16a6   : > { %11161 = vmatmul.mubr.msk.bf16.vlgmr.msra.gmra.mrb[68].mxu0 %vm1327_vm3, %v5364_v8  ;;  %v11815_v8 = vld [vmem:[%s15067_s5 + $0x320] sm:$0xff]  }
0x16a7   : > { %10895 = vmatpush3.bf16.msra.mxu0 %v11763_v30  ;;  %5591 = vmatprep.mubr.bf16.mxu0 %v13854_v58  ;;  %v11814_v30 = vld [vmem:[%s15067_s5 + $0x360] sm:$0xff]  }
0x16a8   : > { %10896 = vmatprep.subr.bf16.mxu0 %v11764_v31  ;;  %v11816_v31 = vld [vmem:[%s15067_s5 + $0x368] sm:$0xff]  }
0x16ab   : > { %10897 = vmatpush3.bf16.msra.mxu0 %v11765_v32  ;;  %v11817_v32 = vld [vmem:[%s15067_s5 + $0x328] sm:$0xff]  }
0x16ac   : > { %10898 = vmatprep.subr.bf16.mxu0 %v11766_v33  ;;  %v11818_v33 = vld [vmem:[%s15067_s5 + $0x370] sm:$0xff]  }
0x16af   : > { %10899 = vmatpush3.bf16.msra.mxu0 %v11767_v57  ;;  %v11819_v57 = vld [vmem:[%s15067_s5 + $0x330] sm:$0xff]  }
0x16b0   : > { %10900 = vmatprep.subr.bf16.mxu0 %v11768_v34  ;;  %v11820_v34 = vld [vmem:[%s15067_s5 + $0x378] sm:$0xff]  }
0x16b3   : > { %10901 = vmatpush3.bf16.msra.mxu0 %v11769_v60  ;;  %v11821_v60 = vld [vmem:[%s15067_s5 + $0x338] sm:$0xff]  }
0x16b4   : > { %10902 = vmatprep.subr.bf16.mxu0 %v11770_v35 }
0x16b7   : > { %10903 = vmatpush3.bf16.msra.mxu0 %v11771_v36  ;;  %v9792_v36 = vld [vmem:[%s15114_s4 + $0x5] ss:$0 sm:$0xff] }
0x16b8   : > { %10904 = vmatprep.subr.bf16.mxu0 %v11772_v37 }
0x16bb   : > { %10905 = vmatpush3.bf16.msra.mxu0 %v11773_v38 }
0x16bc   : > { %10906 = vmatprep.subr.bf16.mxu0 %v11774_v39 }
0x16bf   : > { %10907 = vmatpush3.bf16.msra.mxu0 %v11775_v40 }
0x16c0   : > { %10908 = vmatprep.subr.bf16.mxu0 %v11776_v41 }
0x16c3   : > { %10909 = vmatpush3.bf16.msra.mxu0 %v11777_v42 }
0x16c4   : > { %10938 = vmatprep.subr.bf16.mxu0 %v11778_v26 }
0x16c6   : > { %5592 = vmatmul.mubr.bf16.vlgmr.msra.gmra.mrb[72].mxu0 %v13850_v53 }
0x16c7   : > { %10939 = vmatpush3.bf16.msra.mxu0 %v11779_v43  ;;  %5945 = vmatprep.mubr.bf16.mxu0 %v13854_v58  ;;  %v9892_v43 = vld [vmem:[%s15070_s8 + $0x5] ss:$0 sm:$0xff] }
0x16c8   : > { %10940 = vmatprep.subr.bf16.mxu0 %v11780_v44 }
0x16cb   : > { %10941 = vmatpush3.bf16.msra.mxu0 %v11781_v45 }
0x16cc   : > { %10942 = vmatprep.subr.bf16.mxu0 %v11782_v21 }
0x16cf   : > { %10943 = vmatpush3.bf16.msra.mxu0 %v11783_v46 }
0x16d0   : > { %10944 = vmatprep.subr.bf16.mxu0 %v11784_v47 }
0x16d3   : > { %10945 = vmatpush3.bf16.msra.mxu0 %v11785_v48 }
0x16d4   : > { %10946 = vmatprep.subr.bf16.mxu0 %v11786_v49 }
0x16d7   : > { %10947 = vmatpush3.bf16.msra.mxu0 %v11787_v62 }
0x16d8   : > { %10948 = vmatprep.subr.bf16.mxu0 %v11788_v0 }
0x16db   : > { %10949 = vmatpush3.bf16.msra.mxu0 %v11789_v3 }
0x16dc   : > { %10950 = vmatprep.subr.bf16.mxu0 %v11790_v4 }
0x16df   : > { %10951 = vmatpush3.bf16.msra.mxu0 %v11791_v6 }
0x16e0   : > { %10952 = vmatprep.subr.bf16.mxu0 %v11792_v1  ;;  %v10020_v1 = vld [vmem:[%s15068_s6 + $0x6] ss:$0 sm:$0xff] }
0x16e3   : > { %10953 = vmatpush3.bf16.msra.mxu0 %v11793_v19 }
0x16e4   : > { %6198 = vmatprep.subr.bf16.mxu0 %v11796_v7 }
0x16e6   : > { %5946 = vmatmul.mubr.bf16.vlgmr.msra.gmra.mrb[76].mxu0 %v13850_v53 }
0x16e7   : > { %6199 = vmatpush1.bf16.msra.mxu0 %v11794_v9  ;;  %6230 = vmatprep.mubr.bf16.mxu0 %v12234_v2 }
0x16e8   : > { %6200 = vmatprep.subr.bf16.mxu0 %v11799_v20 }
0x16eb   : > { %6201 = vmatpush1.bf16.msra.mxu0 %v11797_v23 }
0x16ec   : > { %6202 = vmatprep.subr.bf16.mxu0 %v11802_v63 }
0x16ef   : > { %6203 = vmatpush1.bf16.msra.mxu0 %v11800_v59 }
0x16f0   : > { %6204 = vmatprep.subr.bf16.mxu0 %v11805_v5 }
0x16f3   : > { %6205 = vmatpush1.bf16.msra.mxu0 %v11803_v29 }
0x16f4   : > { %10986 = vmatprep.subr.bf16.mxu0 %v11806_v11 }
0x1779   : > { %v5406_v12 = vpop.f32.mrb[68].mxu0 }
0x177a   : > { %v5412_v14 = vpack.c.bf16 %v5406_v12, %v5406_v12  ;;  %v11162_v15 = vpop.f32.mrb[69].mxu0 }
0x177b   : > { %v5409_v17 = vpop.f32.mrb[70].mxu0 }
0x177c   : > { %v11163_v18 = vpop.f32.mrb[71].mxu0  ;;  %9936 = vmatmul.mubr.msk.bf16.vlgmr.msra.gmra.mrb[80].mxu0 %vm1279_vm1, %v5412_v14 }
0x177d   : > { %10987 = vmatpush3.bf16.msra.mxu0 %v11807_v13  ;;  %6585 = vmatprep.mubr.bf16.mxu0 %v13854_v58 }
0x177e   : > { %10988 = vmatprep.subr.bf16.mxu0 %v11808_v16 }
0x1781   : > { %10989 = vmatpush3.bf16.msra.mxu0 %v11809_v22 }
0x1782   : > { %10990 = vmatprep.subr.bf16.mxu0 %v11810_v24  ;;  %v11824_v24 = vld [vmem:[%s15071_s9 + $0x144] ss:$8 sps:$4 sm:$0xff]  }
0x1785   : > { %10991 = vmatpush3.bf16.msra.mxu0 %v11811_v25 }
0x1786   : > { %10992 = vmatprep.subr.bf16.mxu0 %v11812_v27 }
0x1789   : > { %10993 = vmatpush3.bf16.msra.mxu0 %v11813_v28 }
0x178a   : > { %10994 = vmatprep.subr.bf16.mxu0 %v11814_v30  ;;  %v11822_v30 = vld [vmem:[%s15071_s9 + $0x140] ss:$8 sps:$4 sm:$0xff]  }
0x178d   : > { %10995 = vmatpush3.bf16.msra.mxu0 %v11815_v8 }
0x178e   : > { %10996 = vmatprep.subr.bf16.mxu0 %v11816_v31  ;;  %v11827_v31 = vld [vmem:[%s15071_s9 + $0x154] ss:$8 sps:$4 sm:$0xff]  }
0x1791   : > { %10997 = vmatpush3.bf16.msra.mxu0 %v11817_v32  ;;  %v11825_v32 = vld [vmem:[%s15071_s9 + $0x150] ss:$8 sps:$4 sm:$0xff]  }
0x1792   : > { %10998 = vmatprep.subr.bf16.mxu0 %v11818_v33  ;;  %v11830_v33 = vld [vmem:[%s15071_s9 + $0x164] ss:$8 sps:$4 sm:$0xff]  }
0x1795   : > { %10999 = vmatpush3.bf16.msra.mxu0 %v11819_v57  ;;  %v11828_v57 = vld [vmem:[%s15071_s9 + $0x160] ss:$8 sps:$4 sm:$0xff]  }
0x1796   : > { %11000 = vmatprep.subr.bf16.mxu0 %v11820_v34  ;;  %v11833_v34 = vld [vmem:[%s15071_s9 + $0x174] ss:$8 sps:$4 sm:$0xff]  }
0x1799   : > { %v10910_v35 = vpop.f32.mrb[72].mxu0  ;;  %11001 = vmatpush3.bf16.msra.mxu0 %v11821_v60  ;;  %v11831_v60 = vld [vmem:[%s15071_s9 + $0x170] ss:$8 sps:$4 sm:$0xff]  }
0x179a   : > { %v10911_v37 = vpop.f32.mrb[73].mxu0  ;;  %11176 = vmatprep.subr.bf16.mxu0 %v12235_v51 }
0x179b   : > { %v10912_v38 = vadd.f32 %v10911_v37, %v10910_v35  ;;  %v10913_v39 = vpop.f32.mrb[74].mxu0  ;;  %v11834_v35 = vld [vmem:[%s15111_s27 + $0x340] sm:$0xff]  }
0x179c   : > { %v10914_v40 = vpop.f32.mrb[75].mxu0  ;;  %6586 = vmatmul.mubr.bf16.vlgmr.msra.gmra.mrb[84].mxu0 %v13850_v53  ;;  %v11835_v37 = vld [vmem:[%s15111_s27 + $0x300] sm:$0xff]  }
0x179d   : > { %v5594_v41 = vadd.f32 %v10912_v38, %v9792_v36  ;;  %11178 = vmatprep.mubr.msk.bf16.mxu0 %vm12236_vm0, %v12235_v51  ;;  %v11836_v40 = vld [vmem:[%s15111_s27 + $0x348] sm:$0xff]  }
0x179f   : > { %v5953_v42 = vpack.c.bf16 %v5594_v41, %v5594_v41 }
0x17a1   : > { %11167 = vmatmul.mubr.msk.bf16.vlgmr.msra.gmra.mrb[68].mxu1 %vm1279_vm1, %v5953_v42 }
0x17a2   : > { %11172 = vmatprep.mubr.msk.bf16.mxu1 %vm12236_vm0, %v12235_v51 }
0x17b9   : > { %v10954_v26 = vpop.f32.mrb[76].mxu0 }
0x17ba   : > { %v10955_v44 = vpop.f32.mrb[77].mxu0 }
0x17bb   : > { %v10956_v45 = vadd.f32 %v10955_v44, %v10954_v26  ;;  %v10957_v21 = vpop.f32.mrb[78].mxu0  ;;  %v11837_v26 = vld [vmem:[%s15111_s27 + $0x308] sm:$0xff]   ;;  %v11839_v44 = vld [vmem:[%s15111_s27 + $0x310] sm:$0xff]  }
0x17bc   : > { %v10958_v46 = vpop.f32.mrb[79].mxu0  ;;  %v11841_v21 = vld [vmem:[%s15111_s27 + $0x318] sm:$0xff]  }
0x17bd   : > { %v5948_v47 = vadd.f32 %v10956_v45, %v9892_v43  ;;  %v11838_v43 = vld [vmem:[%s15111_s27 + $0x350] sm:$0xff]   ;;  %v11840_v45 = vld [vmem:[%s15111_s27 + $0x358] sm:$0xff]   ;;  %v11842_v46 = vld [vmem:[%s15111_s27 + $0x360] sm:$0xff]  }
0x17bf   : > { %v6014_v48 = vpack.c.bf16 %v5948_v47, %v5948_v47  ;;  %v11843_v47 = vld [vmem:[%s15111_s27 + $0x320] sm:$0xff]  }
0x17c1   : > { %v6019_v49 = vsel %vm1344_vm2, %v6014_v48, 0  ;;  %v11844_v48 = vld [vmem:[%s15111_s27 + $0x368] sm:$0xff]  }
0x17c2   : > { %11171 = vmatpush3.bf16.msra.mxu1 %v6019_v49  ;;  %v11845_v49 = vld [vmem:[%s15111_s27 + $0x328] sm:$0xff]  }
0x17c3   : > { %6114 = vmatprep.subr.bf16.mxu1 %v11824_v24  ;;  %v11868_v24 = vld [vmem:[%s15111_s27 + $0x3c8] sm:$0xff]  }
0x184f   : > { %v14174_v62 = vpop.f32.mrb[80].mxu0 }
0x1850   : > { %v14176_v0 = vpop.f32.mrb[81].mxu0 }
0x1851   : > { %v6236_v3 = vpop.f32.mrb[82].mxu0 }
0x1852   : > { %v6237_v4 = vpop.f32.mrb[83].mxu0  ;;  %v11846_v3 = vld [vmem:[%s15111_s27 + $0x370] sm:$0xff]  }
0x1853   : > { %v11847_v4 = vld [vmem:[%s15111_s27 + $0x330] sm:$0xff]  }
0x186f   : > { %v11002_v6 = vpop.f32.mrb[84].mxu0 }
0x1870   : > { %v11003_v19 = vpop.f32.mrb[85].mxu0 }
0x1871   : > { %v11004_v7 = vadd.f32 %v11003_v19, %v11002_v6  ;;  %v11005_v9 = vpop.f32.mrb[86].mxu0  ;;  %v11848_v6 = vld [vmem:[%s15111_s27 + $0x378] sm:$0xff]   ;;  %v11850_v19 = vld [vmem:[%s15069_s7 + $0x340] sm:$0xff]  }
0x1872   : > { %v11006_v20 = vpop.f32.mrb[87].mxu0  ;;  %v11852_v9 = vld [vmem:[%s15069_s7 + $0x348] sm:$0xff]  }
0x1873   : > { %v6588_v23 = vadd.f32 %v11004_v7, %v10020_v1  ;;  %v11849_v1 = vld [vmem:[%s15111_s27 + $0x338] sm:$0xff]   ;;  %v11851_v7 = vld [vmem:[%s15069_s7 + $0x300] sm:$0xff]   ;;  %v11853_v20 = vld [vmem:[%s15069_s7 + $0x308] sm:$0xff]  }
0x1874   : > { %v5995_v63 = vpop.f32.mrb[68].mxu1 }
0x1875   : > { %v6771_v59 = vpack.c.bf16 %v6588_v23, %v6588_v23  ;;  %v6001_v5 = vmul.f32 0.125, %v5995_v63  ;;  %v11168_v29 = vpop.f32.mrb[69].mxu1  ;;  %v11854_v23 = vld [vmem:[%s15069_s7 + $0x350] sm:$0xff]  }
0x1876   : > { %v5998_v11 = vpop.f32.mrb[70].mxu1  ;;  %v11855_v63 = vld [vmem:[%s15069_s7 + $0x310] sm:$0xff]   ;;  %v11858_v29 = vld [vmem:[%s15069_s7 + $0x360] sm:$0xff]  }
0x1877   : > { %v11169_v12 = vpop.f32.mrb[71].mxu1  ;;  %v6776_v13 = vsel %vm1279_vm1, %v6771_v59, 0  ;;  %v6002_v14 = vsel %vm1327_vm3, %v6001_v5, -inf  ;;  %v11856_v59 = vld [vmem:[%s15069_s7 + $0x358] sm:$0xff]   ;;  %v11859_v11 = vld [vmem:[%s15069_s7 + $0x320] sm:$0xff]  }
0x1878   : > { %11177 = vmatpush3.bf16.xpose.msra.mxu0 %v6776_v13  ;;  %6003 = vmax.xlane.f32.xlu0 %v6002_v14  ;;  %v11860_v12 = vld [vmem:[%s15069_s7 + $0x368] sm:$0xff]   ;;  %v11862_v14 = vld [vmem:[%s15069_s7 + $0x370] sm:$0xff]  }
0x1879   : > { %11182 = vmatprep.subr.bf16.mxu0 %v12235_v51  ;;  %v11861_v13 = vld [vmem:[%s15069_s7 + $0x328] sm:$0xff]  }
0x1905   : > { %v6004_v15 = vpop.xlane.xlu0 %6003 }
0x1906   : > { %v6005_v16 = vsub.f32 %v6001_v5, %v6004_v15  ;;  %v11857_v5 = vld [vmem:[%s15069_s7 + $0x318] sm:$0xff]   ;;  %v11863_v15 = vld [vmem:[%s15069_s7 + $0x330] sm:$0xff]  }
0x1908   : > { %v6006_v17 = vmul.f32 1.442695, %v6005_v16  ;;  %v11864_v16 = vld [vmem:[%s15069_s7 + $0x378] sm:$0xff]  }
0x190a   : > { %12154 = vpow2.f32 %v6006_v17  ;;  %v11865_v17 = vld [vmem:[%s15069_s7 + $0x338] sm:$0xff]  }
0x1914   : > { %v12155_v18 = vpop.eup %12154 }
0x1915   : > { %v6008_v22 = vsel %vm1327_vm3, %v12155_v18, 0.0 }
0x1916   : > { %6009 = vadd.xlane.f32.xlu1 %v6008_v22  ;;  %v11867_v22 = vld [vmem:[%s15111_s27 + $0x380] sm:$0xff]  }
0x19a3   : > { %v6010_v25 = vpop.xlane.xlu1 %6009 }
0x19a4   : > { %12156 = vrcp.f32 %v6010_v25  ;;  %v11869_v25 = vld [vmem:[%s15111_s27 + $0x388] sm:$0xff]  }
0x19ae   : > { %v12157_v27 = vpop.eup %12156 }
0x19af   : > { %v6012_v28 = vmul.f32 %v12157_v27, %v12155_v18  ;;  %v11866_v18 = vld [vmem:[%s15111_s27 + $0x3c0] sm:$0xff]   ;;  %v11870_v27 = vld [vmem:[%s15111_s27 + $0x3d0] sm:$0xff]  }
0x19b1   : > { %v6013_v8 = vpack.c.bf16 %v6012_v28, %v6012_v28  ;;  %v11871_v28 = vld [vmem:[%s15111_s27 + $0x390] sm:$0xff]  }
0x19b3   : > { %11173 = vmatmul.mubr.msk.bf16.vlgmr.msra.gmra.mrb[72].mxu1 %vm1327_vm3, %v6013_v8  ;;  %v11873_v8 = vld [vmem:[%s15111_s27 + $0x398] sm:$0xff]  }
0x19b4   : > { %6115 = vmatpush1.bf16.msra.mxu1 %v11822_v30  ;;  %6146 = vmatprep.mubr.bf16.mxu1 %v12234_v2  ;;  %v11872_v30 = vld [vmem:[%s15111_s27 + $0x3d8] sm:$0xff]  }
0x19b5   : > { %6116 = vmatprep.subr.bf16.mxu1 %v11827_v31  ;;  %v11874_v31 = vld [vmem:[%s15111_s27 + $0x3e0] sm:$0xff]  }
0x19b8   : > { %6117 = vmatpush1.bf16.msra.mxu1 %v11825_v32  ;;  %v11875_v32 = vld [vmem:[%s15111_s27 + $0x3a0] sm:$0xff]  }
0x19b9   : > { %6118 = vmatprep.subr.bf16.mxu1 %v11830_v33  ;;  %v11876_v33 = vld [vmem:[%s15111_s27 + $0x3e8] sm:$0xff]  }
0x19bc   : > { %6119 = vmatpush1.bf16.msra.mxu1 %v11828_v57  ;;  %v11877_v57 = vld [vmem:[%s15111_s27 + $0x3a8] sm:$0xff]  }
0x19bd   : > { %6120 = vmatprep.subr.bf16.mxu1 %v11833_v34  ;;  %v11878_v34 = vld [vmem:[%s15111_s27 + $0x3f0] sm:$0xff]  }
0x19c0   : > { %6121 = vmatpush1.bf16.msra.mxu1 %v11831_v60  ;;  %v11879_v60 = vld [vmem:[%s15111_s27 + $0x3b0] sm:$0xff]  }
0x19c1   : > { %10964 = vmatprep.subr.bf16.mxu1 %v11834_v35  ;;  %v11880_v35 = vld [vmem:[%s15111_s27 + $0x3f8] sm:$0xff]  }
0x1a86   : > { %v6055_v36 = vpop.f32.mrb[72].mxu1 }
0x1a87   : > { %v6061_v38 = vpack.c.bf16 %v6055_v36, %v6055_v36  ;;  %v11174_v39 = vpop.f32.mrb[73].mxu1  ;;  %v11881_v36 = vld [vmem:[%s15111_s27 + $0x3b8] sm:$0xff]  }
0x1a88   : > { %v6058_v41 = vpop.f32.mrb[74].mxu1  ;;  %v11884_v39 = vld [vmem:[%s15069_s7 + $0x3c8] sm:$0xff]  }
0x1a89   : > { %v11175_v42 = vpop.f32.mrb[75].mxu1  ;;  %9927 = vmatmul.mubr.msk.bf16.vlgmr.msra.gmra.mrb[76].mxu1 %vm1279_vm1, %v6061_v38  ;;  %v11883_v38 = vld [vmem:[%s15069_s7 + $0x380] sm:$0xff]   ;;  %v11886_v41 = vld [vmem:[%s15069_s7 + $0x3d0] sm:$0xff]  }
0x1a8a   : > { %10965 = vmatpush3.bf16.msra.mxu1 %v11835_v37  ;;  %6408 = vmatprep.mubr.bf16.mxu1 %v13854_v58  ;;  %v11882_v37 = vld [vmem:[%s15069_s7 + $0x3c0] sm:$0xff]   ;;  %v11887_v42 = vld [vmem:[%s15069_s7 + $0x390] sm:$0xff]  }
0x1a8b   : > { %10966 = vmatprep.subr.bf16.mxu1 %v11836_v40  ;;  %v11885_v40 = vld [vmem:[%s15069_s7 + $0x388] sm:$0xff]  }
0x1a8e   : > { %10967 = vmatpush3.bf16.msra.mxu1 %v11837_v26  ;;  %v11888_v26 = vld [vmem:[%s15069_s7 + $0x3d8] sm:$0xff]  }
0x1a8f   : > { %10968 = vmatprep.subr.bf16.mxu1 %v11838_v43  ;;  %v11889_v43 = vld [vmem:[%s15069_s7 + $0x398] sm:$0xff]  }
0x1a92   : > { %10969 = vmatpush3.bf16.msra.mxu1 %v11839_v44  ;;  %v11890_v44 = vld [vmem:[%s15069_s7 + $0x3e0] sm:$0xff]  }
0x1a93   : > { %10970 = vmatprep.subr.bf16.mxu1 %v11840_v45  ;;  %v11891_v45 = vld [vmem:[%s15069_s7 + $0x3a0] sm:$0xff]  }
0x1a96   : > { %10971 = vmatpush3.bf16.msra.mxu1 %v11841_v21  ;;  %v11892_v21 = vld [vmem:[%s15069_s7 + $0x3e8] sm:$0xff]  }
0x1a97   : > { %10972 = vmatprep.subr.bf16.mxu1 %v11842_v46  ;;  %v11893_v46 = vld [vmem:[%s15069_s7 + $0x3a8] sm:$0xff]  }
0x1a9a   : > { %10973 = vmatpush3.bf16.msra.mxu1 %v11843_v47  ;;  %v11894_v47 = vld [vmem:[%s15069_s7 + $0x3f0] sm:$0xff]  }
0x1a9b   : > { %10974 = vmatprep.subr.bf16.mxu1 %v11844_v48  ;;  %v11895_v48 = vld [vmem:[%s15069_s7 + $0x3b0] sm:$0xff]  }
0x1a9e   : > { %10975 = vmatpush3.bf16.msra.mxu1 %v11845_v49  ;;  %v11896_v49 = vld [vmem:[%s15069_s7 + $0x3f8] sm:$0xff]  }
0x1a9f   : > { %10976 = vmatprep.subr.bf16.mxu1 %v11846_v3  ;;  %v11897_v3 = vld [vmem:[%s15069_s7 + $0x3b8] sm:$0xff]  }
0x1aa2   : > { %10977 = vmatpush3.bf16.msra.mxu1 %v11847_v4 }
0x1aa3   : > { %10978 = vmatprep.subr.bf16.mxu1 %v11848_v6 }
0x1aa6   : > { %10979 = vmatpush3.bf16.msra.mxu1 %v11849_v1 }
0x1aa7   : > { %11008 = vmatprep.subr.bf16.mxu1 %v11850_v19 }
0x1aa9   : > { %6409 = vmatmul.mubr.bf16.vlgmr.msra.gmra.mrb[80].mxu1 %v13850_v53 }
0x1aaa   : > { %11009 = vmatpush3.bf16.msra.mxu1 %v11851_v7  ;;  %6762 = vmatprep.mubr.bf16.mxu1 %v13854_v58 }
0x1aab   : > { %11010 = vmatprep.subr.bf16.mxu1 %v11852_v9 }
0x1aae   : > { %11011 = vmatpush3.bf16.msra.mxu1 %v11853_v20 }
0x1aaf   : > { %11012 = vmatprep.subr.bf16.mxu1 %v11854_v23  ;;  %v9970_v23 = vld [vmem:[%s15114_s4 + $0x6] ss:$0 sm:$0xff] }
0x1ab2   : > { %11013 = vmatpush3.bf16.msra.mxu1 %v11855_v63 }
0x1ab3   : > { %11014 = vmatprep.subr.bf16.mxu1 %v11856_v59 }
0x1ab6   : > { %11015 = vmatpush3.bf16.msra.mxu1 %v11857_v5 }
0x1ab7   : > { %11016 = vmatprep.subr.bf16.mxu1 %v11858_v29 }
0x1aba   : > { %11017 = vmatpush3.bf16.msra.mxu1 %v11859_v11 }
0x1abb   : > { %11018 = vmatprep.subr.bf16.mxu1 %v11860_v12 }
0x1abe   : > { %11019 = vmatpush3.bf16.msra.mxu1 %v11861_v13 }
0x1abf   : > { %11020 = vmatprep.subr.bf16.mxu1 %v11862_v14 }
0x1ac2   : > { %11021 = vmatpush3.bf16.msra.mxu1 %v11863_v15 }
0x1ac3   : > { %11022 = vmatprep.subr.bf16.mxu1 %v11864_v16 }
0x1ac6   : > { %11023 = vmatpush3.bf16.msra.mxu1 %v11865_v17 }
0x1ac7   : > { %11034 = vmatprep.subr.bf16.mxu1 %v11866_v18 }
0x1ac9   : > { %6763 = vmatmul.mubr.bf16.vlgmr.msra.gmra.mrb[84].mxu1 %v13850_v53 }
0x1aca   : > { %11035 = vmatpush3.bf16.msra.mxu1 %v11867_v22  ;;  %7143 = vmatprep.mubr.bf16.mxu1 %v13854_v58 }
0x1acb   : > { %11036 = vmatprep.subr.bf16.mxu1 %v11868_v24 }
0x1ace   : > { %11037 = vmatpush3.bf16.msra.mxu1 %v11869_v25 }
0x1acf   : > { %11038 = vmatprep.subr.bf16.mxu1 %v11870_v27 }
0x1ad2   : > { %11039 = vmatpush3.bf16.msra.mxu1 %v11871_v28 }
0x1ad3   : > { %11040 = vmatprep.subr.bf16.mxu1 %v11872_v30 }
0x1ad6   : > { %11041 = vmatpush3.bf16.msra.mxu1 %v11873_v8 }
0x1ad7   : > { %11042 = vmatprep.subr.bf16.mxu1 %v11874_v31 }
0x1ada   : > { %11043 = vmatpush3.bf16.msra.mxu1 %v11875_v32 }
0x1adb   : > { %11044 = vmatprep.subr.bf16.mxu1 %v11876_v33 }
0x1ade   : > { %11045 = vmatpush3.bf16.msra.mxu1 %v11877_v57 }
0x1adf   : > { %11046 = vmatprep.subr.bf16.mxu1 %v11878_v34 }
0x1ae2   : > { %11047 = vmatpush3.bf16.msra.mxu1 %v11879_v60 }
0x1ae3   : > { %11048 = vmatprep.subr.bf16.mxu1 %v11880_v35 }
0x1ae6   : > { %11049 = vmatpush3.bf16.msra.mxu1 %v11881_v36 }
0x1ae7   : > { %11078 = vmatprep.subr.bf16.mxu1 %v11882_v37 }
0x1ae9   : > { %7144 = vmatmul.mubr.bf16.vlgmr.msra.gmra.mrb[88].mxu1 %v13850_v53 }
0x1aea   : > { %11079 = vmatpush3.bf16.msra.mxu1 %v11883_v38  ;;  %7497 = vmatprep.mubr.bf16.mxu1 %v13854_v58 }
0x1aeb   : > { %11080 = vmatprep.subr.bf16.mxu1 %v11884_v39 }
0x1aee   : > { %11081 = vmatpush3.bf16.msra.mxu1 %v11885_v40 }
0x1aef   : > { %11082 = vmatprep.subr.bf16.mxu1 %v11886_v41 }
0x1af2   : > { %11083 = vmatpush3.bf16.msra.mxu1 %v11887_v42 }
0x1af3   : > { %11084 = vmatprep.subr.bf16.mxu1 %v11888_v26 }
0x1af6   : > { %11085 = vmatpush3.bf16.msra.mxu1 %v11889_v43  ;;  %v11900_v43 = vld [vmem:[%s15071_s9 + $0x184] ss:$8 sps:$4 sm:$0xff]  }
0x1af7   : > { %11086 = vmatprep.subr.bf16.mxu1 %v11890_v44 }
0x1afa   : > { %11087 = vmatpush3.bf16.msra.mxu1 %v11891_v45 }
0x1afb   : > { %11088 = vmatprep.subr.bf16.mxu1 %v11892_v21 }
0x1afe   : > { %11089 = vmatpush3.bf16.msra.mxu1 %v11893_v46  ;;  %v11898_v46 = vld [vmem:[%s15071_s9 + $0x180] ss:$8 sps:$4 sm:$0xff]  }
0x1aff   : > { %11090 = vmatprep.subr.bf16.mxu1 %v11894_v47 }
0x1b02   : > { %11091 = vmatpush3.bf16.msra.mxu1 %v11895_v48  ;;  %v11903_v48 = vld [vmem:[%s15071_s9 + $0x194] ss:$8 sps:$4 sm:$0xff]  }
0x1b03   : > { %11092 = vmatprep.subr.bf16.mxu1 %v11896_v49  ;;  %v11901_v49 = vld [vmem:[%s15071_s9 + $0x190] ss:$8 sps:$4 sm:$0xff]  }
0x1b06   : > { %11093 = vmatpush3.bf16.msra.mxu1 %v11897_v3  ;;  %v11906_v3 = vld [vmem:[%s15071_s9 + $0x1a4] ss:$8 sps:$4 sm:$0xff]  }
0x1b09   : > { %7498 = vmatmul.mubr.bf16.vlgmr.msra.gmra.mrb[92].mxu1 %v13850_v53 }
0x1b5c   : > { %v6148_v4 = vpop.f32.mrb[76].mxu1 }
0x1b5d   : > { %v14413_v6 = vadd.f32 %v14174_v62, %v6148_v4  ;;  %v6150_v1 = vpop.f32.mrb[77].mxu1  ;;  %v11904_v4 = vld [vmem:[%s15071_s9 + $0x1a0] ss:$8 sps:$4 sm:$0xff]  }
0x1b5e   : > { %v14416_v19 = vadd.f32 %v14176_v0, %v6150_v1  ;;  %v6152_v7 = vpop.f32.mrb[78].mxu1  ;;  %v10070_v0 = vld [vmem:[%s15070_s8 + $0x6] ss:$0 sm:$0xff]  ;;  %v11909_v1 = vld [vmem:[%s15071_s9 + $0x1b4] ss:$8 sps:$4 sm:$0xff]  }
0x1b5f   : > { %v6153_v9 = vpop.f32.mrb[79].mxu1  ;;  %v11907_v7 = vld [vmem:[%s15071_s9 + $0x1b0] ss:$8 sps:$4 sm:$0xff]  }
0x1b60   : > { %v11910_v9 = vld [vmem:[%s15067_s5 + $0x3c0] sm:$0xff]  }
0x1b7c   : > { %v10980_v20 = vpop.f32.mrb[80].mxu1 }
0x1b7d   : > { %v10981_v63 = vpop.f32.mrb[81].mxu1 }
0x1b7e   : > { %v10982_v59 = vadd.f32 %v10981_v63, %v10980_v20  ;;  %v10983_v5 = vpop.f32.mrb[82].mxu1 }
0x1b7f   : > { %v10984_v29 = vpop.f32.mrb[83].mxu1  ;;  %v11912_v5 = vld [vmem:[%s15067_s5 + $0x3c8] sm:$0xff]  }
0x1b80   : > { %v6411_v11 = vadd.f32 %v10982_v59, %v9970_v23  ;;  %v11911_v23 = vld [vmem:[%s15067_s5 + $0x380] sm:$0xff]  }
0x1b82   : > { %v6770_v12 = vpack.c.bf16 %v6411_v11, %v6411_v11 }
0x1b84   : > { %11179 = vmatmul.mubr.msk.bf16.vlgmr.msra.gmra.mrb[88].mxu0 %vm1279_vm1, %v6770_v12  ;;  %v11913_v12 = vld [vmem:[%s15067_s5 + $0x388] sm:$0xff]  }
0x1b85   : > { %11184 = vmatprep.mubr.msk.bf16.mxu0 %vm12236_vm0, %v12235_v51 }
0x1b9c   : > { %v11024_v62 = vpop.f32.mrb[84].mxu1 }
0x1b9d   : > { %v11025_v13 = vpop.f32.mrb[85].mxu1 }
0x1b9e   : > { %v11026_v14 = vadd.f32 %v11025_v13, %v11024_v62  ;;  %v11027_v15 = vpop.f32.mrb[86].mxu1  ;;  %v11914_v62 = vld [vmem:[%s15067_s5 + $0x3d0] sm:$0xff]   ;;  %v11916_v13 = vld [vmem:[%s15067_s5 + $0x3d8] sm:$0xff]  }
0x1b9f   : > { %v11028_v16 = vpop.f32.mrb[87].mxu1  ;;  %v11919_v15 = vld [vmem:[%s15067_s5 + $0x3a0] sm:$0xff]  }
0x1ba0   : > { %v6765_v17 = vadd.f32 %v11026_v14, %v10070_v0  ;;  %v11915_v0 = vld [vmem:[%s15067_s5 + $0x390] sm:$0xff]   ;;  %v11918_v14 = vld [vmem:[%s15067_s5 + $0x3e0] sm:$0xff]   ;;  %v11920_v16 = vld [vmem:[%s15067_s5 + $0x3e8] sm:$0xff]  }
0x1ba2   : > { %v6831_v18 = vpack.c.bf16 %v6765_v17, %v6765_v17  ;;  %v11921_v17 = vld [vmem:[%s15067_s5 + $0x3a8] sm:$0xff]  }
0x1ba4   : > { %v6836_v22 = vsel %vm1344_vm2, %v6831_v18, 0  ;;  %v11922_v18 = vld [vmem:[%s15067_s5 + $0x3f0] sm:$0xff]  }
0x1ba5   : > { %11183 = vmatpush3.bf16.msra.mxu0 %v6836_v22  ;;  %v11923_v22 = vld [vmem:[%s15067_s5 + $0x3b0] sm:$0xff]  }
0x1ba6   : > { %6931 = vmatprep.subr.bf16.mxu0 %v11900_v43 }
0x1bbc   : > { %v11050_v24 = vpop.f32.mrb[88].mxu1 }
0x1bbd   : > { %v11051_v25 = vpop.f32.mrb[89].mxu1 }
0x1bbe   : > { %v14428_v27 = vadd.f32 %v11051_v25, %v11050_v24  ;;  %v11053_v28 = vpop.f32.mrb[90].mxu1  ;;  %v11924_v24 = vld [vmem:[%s15067_s5 + $0x3f8] sm:$0xff]  }
0x1bbf   : > { %v11054_v30 = vpop.f32.mrb[91].mxu1  ;;  %v11925_v25 = vld [vmem:[%s15067_s5 + $0x3b8] sm:$0xff]  }
0x1bdc   : > { %v11094_v8 = vpop.f32.mrb[92].mxu1 }
0x1bdd   : > { %v11095_v31 = vpop.f32.mrb[93].mxu1 }
0x1bde   : > { %v14430_v32 = vadd.f32 %v11095_v31, %v11094_v8  ;;  %v11097_v33 = vpop.f32.mrb[94].mxu1 }
0x1bdf   : > { %v11098_v57 = vpop.f32.mrb[95].mxu1 }
0x1c57   : > { %v6812_v34 = vpop.f32.mrb[88].mxu0 }
0x1c58   : > { %v6818_v60 = vmul.f32 0.125, %v6812_v34  ;;  %v11180_v35 = vpop.f32.mrb[89].mxu0 }
0x1c59   : > { %v6815_v36 = vpop.f32.mrb[90].mxu0 }
0x1c5a   : > { %v11181_v37 = vpop.f32.mrb[91].mxu0  ;;  %v6819_v38 = vsel %vm1327_vm3, %v6818_v60, -inf }
0x1c5b   : > { %6820 = vmax.xlane.f32.xlu0 %v6819_v38 }
0x1ce8   : > { %v6821_v39 = vpop.xlane.xlu0 %6820 }
0x1ce9   : > { %v6822_v40 = vsub.f32 %v6818_v60, %v6821_v39  ;;  %v10189_v60 = vld [vmem:[%s15068_s6 + $0x7] ss:$0 sm:$0xff] }
0x1ceb   : > { %v6823_v41 = vmul.f32 1.442695, %v6822_v40 }
0x1ced   : > { %12158 = vpow2.f32 %v6823_v41 }
0x1cf7   : > { %v12159_v42 = vpop.eup %12158 }
0x1cf8   : > { %v6825_v26 = vsel %vm1327_vm3, %v12159_v42, 0.0 }
0x1cf9   : > { %6826 = vadd.xlane.f32.xlu1 %v6825_v26 }
0x1d86   : > { %v6827_v44 = vpop.xlane.xlu1 %6826 }
0x1d87   : > { %12160 = vrcp.f32 %v6827_v44 }
0x1d91   : > { %v12161_v45 = vpop.eup %12160 }
0x1d92   : > { %v6829_v21 = vmul.f32 %v12161_v45, %v12159_v42 }
0x1d94   : > { %v6830_v47 = vpack.c.bf16 %v6829_v21, %v6829_v21 }
0x1d96   : > { %11185 = vmatmul.mubr.msk.bf16.vlgmr.msra.gmra.mrb[92].mxu0 %vm1327_vm3, %v6830_v47 }
0x1d97   : > { %6932 = vmatpush1.bf16.msra.mxu0 %v11898_v46  ;;  %6963 = vmatprep.mubr.bf16.mxu0 %v12234_v2 }
0x1d98   : > { %6933 = vmatprep.subr.bf16.mxu0 %v11903_v48 }
0x1d9b   : > { %6934 = vmatpush1.bf16.msra.mxu0 %v11901_v49 }
0x1d9c   : > { %6935 = vmatprep.subr.bf16.mxu0 %v11906_v3 }
0x1d9f   : > { %6936 = vmatpush1.bf16.msra.mxu0 %v11904_v4 }
0x1da0   : > { %6937 = vmatprep.subr.bf16.mxu0 %v11909_v1 }
0x1da3   : > { %6938 = vmatpush1.bf16.msra.mxu0 %v11907_v7 }
0x1da4   : > { %11056 = vmatprep.subr.bf16.mxu0 %v11910_v9 }
0x1e69   : > { %v6872_v20 = vpop.f32.mrb[92].mxu0 }
0x1e6a   : > { %v6878_v63 = vpack.c.bf16 %v6872_v20, %v6872_v20  ;;  %v11186_v59 = vpop.f32.mrb[93].mxu0 }
0x1e6b   : > { %v6875_v29 = vpop.f32.mrb[94].mxu0  ;;  %v11931_v59 = vld [vmem:[%s15071_s9 + $0x1d4] ss:$8 sps:$4 sm:$0xff]  }
0x1e6c   : > { %v11187_v11 = vpop.f32.mrb[95].mxu0  ;;  %10105 = vmatmul.mubr.msk.bf16.vlgmr.msra.gmra.mrb[96].mxu0 %vm1279_vm1, %v6878_v63  ;;  %v11934_v29 = vld [vmem:[%s15071_s9 + $0x1e4] ss:$8 sps:$4 sm:$0xff]  }
0x1e6d   : > { %11057 = vmatpush3.bf16.msra.mxu0 %v11911_v23  ;;  %7320 = vmatprep.mubr.bf16.mxu0 %v13854_v58  ;;  %v11917_v58 = vld [vmem:[%s15067_s5 + $0x398] sm:$0xff]   ;;  %v11926_v23 = vld [vmem:[%s15071_s9 + $0x1c0] ss:$8 sps:$4 sm:$0xff]  }
0x1e6e   : > { %11058 = vmatprep.subr.bf16.mxu0 %v11912_v5  ;;  %v11929_v5 = vld [vmem:[%s15071_s9 + $0x1d0] ss:$8 sps:$4 sm:$0xff]   ;;  %v11932_v11 = vld [vmem:[%s15071_s9 + $0x1e0] ss:$8 sps:$4 sm:$0xff]  }
0x1e71   : > { %11059 = vmatpush3.bf16.msra.mxu0 %v11913_v12  ;;  %v11937_v12 = vld [vmem:[%s15071_s9 + $0x1f4] ss:$8 sps:$4 sm:$0xff]  }
0x1e72   : > { %11060 = vmatprep.subr.bf16.mxu0 %v11914_v62 }
0x1e75   : > { %11061 = vmatpush3.bf16.msra.mxu0 %v11915_v0 }
0x1e76   : > { %11062 = vmatprep.subr.bf16.mxu0 %v11916_v13 }
0x1e79   : > { %11063 = vmatpush3.bf16.msra.mxu0 %v11917_v58 }
0x1e7a   : > { %11064 = vmatprep.subr.bf16.mxu0 %v11918_v14 }
0x1e7d   : > { %11065 = vmatpush3.bf16.msra.mxu0 %v11919_v15  ;;  %v11938_v15 = vld [vmem:[%s15075_s13 + $0x200] ss:$16 sps:$4 sm:$0xff]  }
0x1e7e   : > { %11066 = vmatprep.subr.bf16.mxu0 %v11920_v16  ;;  %v11940_v16 = vld [vmem:[%s15075_s13 + $0x204] ss:$16 sps:$4 sm:$0xff]  }
0x1e7f   : > { %8184 = vmatprep.subr.bf16.mxu1 %v11940_v16  ;;  %v12001_v16 = vld [vmem:[%s15075_s13 + $0x348] ss:$16 sps:$4 sm:$0xff]  }
0x1e80   : > { %8185 = vmatpush1.bf16.msra.mxu1 %v11938_v15  ;;  %v11998_v15 = vld [vmem:[%s15075_s13 + $0x340] ss:$16 sps:$4 sm:$0xff]  }
0x1e81   : > { %11067 = vmatpush3.bf16.msra.mxu0 %v11921_v17  ;;  %v11941_v17 = vld [vmem:[%s15075_s13 + $0x208] ss:$16 sps:$4 sm:$0xff]  }
0x1e82   : > { %11068 = vmatprep.subr.bf16.mxu0 %v11922_v18  ;;  %v11943_v18 = vld [vmem:[%s15075_s13 + $0x20c] ss:$16 sps:$4 sm:$0xff]  }
0x1e85   : > { %11069 = vmatpush3.bf16.msra.mxu0 %v11923_v22  ;;  %v11946_v22 = vld [vmem:[%s15075_s13 + $0x224] ss:$16 sps:$4 sm:$0xff]  }
0x1e86   : > { %11070 = vmatprep.subr.bf16.mxu0 %v11924_v24  ;;  %v11949_v24 = vld [vmem:[%s15075_s13 + $0x22c] ss:$16 sps:$4 sm:$0xff]   ;;  %8186 = vmatprep.subr.bf16.mxu1 %v11946_v22  ;;  %v12004_v22 = vld [vmem:[%s15075_s13 + $0x360] ss:$16 sps:$4 sm:$0xff]  }
0x1e89   : > { %11071 = vmatpush3.bf16.msra.mxu0 %v11925_v25  ;;  %v11944_v25 = vld [vmem:[%s15075_s13 + $0x220] ss:$16 sps:$4 sm:$0xff]  }
0x1e8a   : > { %11188 = vmatprep.subr.bf16.mxu0 %v12235_v51  ;;  %8187 = vmatpush1.bf16.msra.mxu1 %v11944_v25  ;;  %v12012_v25 = vld [vmem:[%s15075_s13 + $0x384] ss:$16 sps:$4 sm:$0xff]  }
0x1e8c   : > { %7321 = vmatmul.mubr.bf16.vlgmr.msra.gmra.mrb[100].mxu0 %v13850_v53 }
0x1e8d   : > { %11190 = vmatprep.mubr.msk.bf16.mxu0 %vm12236_vm0, %v12235_v51 }
0x1f3f   : > { %v6965_v28 = vpop.f32.mrb[96].mxu0 }
0x1f40   : > { %v14515_v30 = vadd.f32 %v6965_v28, %v14413_v6  ;;  %v6967_v8 = vpop.f32.mrb[97].mxu0  ;;  %v10239_v6 = vld [vmem:[%s15070_s8 + $0x7] ss:$0 sm:$0xff]  ;;  %v11947_v28 = vld [vmem:[%s15075_s13 + $0x228] ss:$16 sps:$4 sm:$0xff]  }
0x1f41   : > { %v14518_v31 = vadd.f32 %v6967_v8, %v14416_v19  ;;  %v6969_v33 = vpop.f32.mrb[98].mxu0  ;;  %v10139_v19 = vld [vmem:[%s15114_s4 + $0x7] ss:$0 sm:$0xff]  ;;  %v7500_v40 = vadd.f32 %v14430_v32, %v10239_v6  ;;  %v11962_v6 = vld [vmem:[%s15075_s13 + $0x280] ss:$16 sps:$4 sm:$0xff]   ;;  %s12176_s4 = scalar_lea.vmem %s12175_s26, 512 }
0x1f42   : > { %v6970_v57 = vpop.f32.mrb[99].mxu0  ;;  %v7146_v42 = vadd.f32 %v14428_v27, %v10139_v19  ;;  %v11952_v8 = vld [vmem:[%s15075_s13 + $0x244] ss:$16 sps:$4 sm:$0xff]   ;;  %v11955_v33 = vld [vmem:[%s15075_s13 + $0x24c] ss:$16 sps:$4 sm:$0xff]   ;;  %p12178_p1 = scmp.lt.s32.totalorder %s12176_s4, %s12170_s24 }
0x1f43   : > { %v7566_v26 = vpack.c.bf16 %v7500_v40, %v7500_v40  ;;  %v11950_v57 = vld [vmem:[%s15075_s13 + $0x240] ss:$16 sps:$4 sm:$0xff]   ;;  %8188 = vmatprep.subr.bf16.mxu1 %v11952_v8  ;;  %v11970_v19 = vld [vmem:[%s15075_s13 + $0x2a4] ss:$16 sps:$4 sm:$0xff]   ;;  %v11973_v40 = vld [vmem:[%s15075_s13 + $0x2ac] ss:$16 sps:$4 sm:$0xff]  }
0x1f44   : > { %v7505_v43 = vpack.c.bf16 %v7146_v42, %v7146_v42  ;;  %8189 = vmatpush1.bf16.msra.mxu1 %v11950_v57  ;;  %v11971_v42 = vld [vmem:[%s15075_s13 + $0x2a8] ss:$16 sps:$4 sm:$0xff]   ;;  %v12018_v57 = vld [vmem:[%s15075_s13 + $0x3a4] ss:$16 sps:$4 sm:$0xff]   ;;  %p12179_p2 = por %p12178_p1, %p12177_p0 }
0x1f45   : > { %v7571_v44 = vsel %vm1344_vm2, %v7566_v26, 0  ;;  %v11976_v26 = vld [vmem:[%s15075_s13 + $0x2c4] ss:$16 sps:$4 sm:$0xff]   ;;  %v12013_v8 = vld [vmem:[%s15075_s13 + $0x388] ss:$16 sps:$4 sm:$0xff]  }
0x1f46   : > { %p12180_p3 = pnand %p12179_p2, %p12173_p13 }
0x1f5f   : > { %v11072_v34 = vpop.f32.mrb[100].mxu0 }
0x1f60   : > { %v11073_v35 = vpop.f32.mrb[101].mxu0 }
0x1f61   : > { %v11074_v53 = vadd.f32 %v11073_v35, %v11072_v34  ;;  %v11075_v36 = vpop.f32.mrb[102].mxu0  ;;  %v11953_v34 = vld [vmem:[%s15075_s13 + $0x248] ss:$16 sps:$4 sm:$0xff]   ;;  %v11961_v35 = vld [vmem:[%s15075_s13 + $0x26c] ss:$16 sps:$4 sm:$0xff]  }
0x1f62   : > { %v11076_v37 = vpop.f32.mrb[103].mxu0  ;;  %v11959_v36 = vld [vmem:[%s15075_s13 + $0x268] ss:$16 sps:$4 sm:$0xff]  }
0x1f63   : > { %v7323_v38 = vadd.f32 %v11074_v53, %v10189_v60  ;;  %v11958_v60 = vld [vmem:[%s15075_s13 + $0x264] ss:$16 sps:$4 sm:$0xff]   ;;  %v11956_v53 = vld [vmem:[%s15075_s13 + $0x260] ss:$16 sps:$4 sm:$0xff]  }
0x1f64   : > { %8190 = vmatprep.subr.bf16.mxu1 %v11958_v60  ;;  %v11964_v37 = vld [vmem:[%s15075_s13 + $0x284] ss:$16 sps:$4 sm:$0xff]   ;;  %v12016_v60 = vld [vmem:[%s15075_s13 + $0x3a0] ss:$16 sps:$4 sm:$0xff]  }
0x1f65   : > { %v7506_v39 = vpack.c.bf16 %v7323_v38, %v7323_v38  ;;  %v11967_v38 = vld [vmem:[%s15075_s13 + $0x28c] ss:$16 sps:$4 sm:$0xff]   ;;  %8191 = vmatpush1.bf16.msra.mxu1 %v11956_v53  ;;  %v12024_v53 = vld [vmem:[%s15075_s13 + $0x3c4] ss:$16 sps:$4 sm:$0xff]  }
0x1f66   : > { %8192 = vmatprep.subr.bf16.mxu1 %v11964_v37  ;;  %v12022_v37 = vld [vmem:[%s15075_s13 + $0x3c0] ss:$16 sps:$4 sm:$0xff]  }
0x1f67   : > { %v7511_v41 = vsel %vm1279_vm1, %v7506_v39, 0  ;;  %v11965_v39 = vld [vmem:[%s15075_s13 + $0x288] ss:$16 sps:$4 sm:$0xff]  }
0x1f68   : > { %11189 = vmatpush3.bf16.xpose.msra.mxu0 %v7511_v41  ;;  %v11968_v41 = vld [vmem:[%s15075_s13 + $0x2a0] ss:$16 sps:$4 sm:$0xff]  }
0x1f69   : > { %11194 = vmatprep.subr.bf16.mxu0 %v12235_v51  ;;  %8193 = vmatpush1.bf16.msra.mxu1 %v11962_v6  ;;  %v12030_v6 = vld [vmem:[%s15075_s13 + $0x3e4] ss:$16 sps:$4 sm:$0xff]  }
0x1f6a   : > { %8194 = vmatprep.subr.bf16.mxu1 %v11970_v19  ;;  %v12028_v19 = vld [vmem:[%s15075_s13 + $0x3e0] ss:$16 sps:$4 sm:$0xff]  }
0x1f6d   : > { %8195 = vmatpush1.bf16.msra.mxu1 %v11968_v41  ;;  %v12036_v41 = vld [vmem:[%s15077_s15 + $0x204] ss:$8 sps:$4 sm:$0xff]  }
0x1f6e   : > { %8196 = vmatprep.subr.bf16.mxu1 %v11976_v26 }
0x1f6f   : > { %11191 = vmatmul.mubr.msk.bf16.vlgmr.msra.gmra.mrb[104].mxu0 %vm1279_vm1, %v7505_v43  ;;  %v11979_v43 = vld [vmem:[%s15075_s13 + $0x2cc] ss:$16 sps:$4 sm:$0xff]  }
0x1f70   : > { %11195 = vmatpush3.bf16.msra.mxu0 %v7571_v44  ;;  %11196 = vmatprep.mubr.msk.bf16.mxu0 %vm12236_vm0, %v12235_v51  ;;  %v11928_v51 = vld [vmem:[%s15071_s9 + $0x1c4] ss:$8 sps:$4 sm:$0xff]   ;;  %v11974_v44 = vld [vmem:[%s15075_s13 + $0x2c0] ss:$16 sps:$4 sm:$0xff]  }
0x1f71   : > { %7666 = vmatprep.subr.bf16.mxu0 %v11928_v51  ;;  %8197 = vmatpush1.bf16.msra.mxu1 %v11974_v44 }
0x2042   : > { %v7547_v45 = vpop.f32.mrb[104].mxu0 }
0x2043   : > { %v7553_v21 = vmul.f32 0.125, %v7547_v45  ;;  %v11192_v32 = vpop.f32.mrb[105].mxu0  ;;  %v11977_v45 = vld [vmem:[%s15075_s13 + $0x2c8] ss:$16 sps:$4 sm:$0xff]  }
0x2044   : > { %v7550_v46 = vpop.f32.mrb[106].mxu0  ;;  %v11985_v32 = vld [vmem:[%s15075_s13 + $0x2ec] ss:$16 sps:$4 sm:$0xff]  }
0x2045   : > { %v11193_v47 = vpop.f32.mrb[107].mxu0  ;;  %v7554_v48 = vsel %vm1327_vm3, %v7553_v21, -inf  ;;  %v11980_v46 = vld [vmem:[%s15075_s13 + $0x2e0] ss:$16 sps:$4 sm:$0xff]  }
0x2046   : > { %7555 = vmax.xlane.f32.xlu0 %v7554_v48  ;;  %v11983_v47 = vld [vmem:[%s15075_s13 + $0x2e8] ss:$16 sps:$4 sm:$0xff]   ;;  %v11988_v48 = vld [vmem:[%s15075_s13 + $0x304] ss:$16 sps:$4 sm:$0xff]  }
0x20d3   : > { %v7556_v27 = vpop.xlane.xlu0 %7555 }
0x20d4   : > { %v7557_v49 = vsub.f32 %v7553_v21, %v7556_v27  ;;  %v11982_v21 = vld [vmem:[%s15075_s13 + $0x2e4] ss:$16 sps:$4 sm:$0xff]   ;;  %v11991_v27 = vld [vmem:[%s15075_s13 + $0x30c] ss:$16 sps:$4 sm:$0xff]  }
0x20d5   : > { %8198 = vmatprep.subr.bf16.mxu1 %v11982_v21 }
0x20d6   : > { %v7558_v3 = vmul.f32 1.442695, %v7557_v49  ;;  %8199 = vmatpush1.bf16.msra.mxu1 %v11980_v46  ;;  %v11986_v49 = vld [vmem:[%s15075_s13 + $0x300] ss:$16 sps:$4 sm:$0xff]  }
0x20d7   : > { %8200 = vmatprep.subr.bf16.mxu1 %v11988_v48  ;;  %v10277_v48 = vld [vmem:[%s15074_s12 + $0x2] sm:$0x3] }
0x20d8   : > { %12162 = vpow2.f32 %v7558_v3  ;;  %v11989_v3 = vld [vmem:[%s15075_s13 + $0x308] ss:$16 sps:$4 sm:$0xff]  }
0x20da   : > { %8201 = vmatpush1.bf16.msra.mxu1 %v11986_v49 }
0x20e2   : > { %v12163_v4 = vpop.eup %12162 }
0x20e3   : > { %v7560_v1 = vsel %vm1327_vm3, %v12163_v4, 0.0 }
0x20e4   : > { %7561 = vadd.xlane.f32.xlu1 %v7560_v1 }
0x2171   : > { %v7562_v7 = vpop.xlane.xlu1 %7561 }
0x2172   : > { %12164 = vrcp.f32 %v7562_v7 }
0x217c   : > { %v12165_v9 = vpop.eup %12164 }
0x217d   : > { %v7564_v20 = vmul.f32 %v12165_v9, %v12163_v4  ;;  %v10275_v4 = vld [vmem:[%s15072_s10 + $0x2] sm:$0x3] }
0x217e   : > { %v7715_v1 = vrot.slane %v10275_v4, %v12545_v55  ;;  %v7719_v7 = vrot.slane %v10275_v4, %v12548_v56 }
0x217f   : > { %v7565_v63 = vpack.c.bf16 %v7564_v20, %v7564_v20 }
0x2181   : > { %11197 = vmatmul.mubr.msk.bf16.vlgmr.msra.gmra.mrb[108].mxu0 %vm1327_vm3, %v7565_v63 }
0x2182   : > { %7667 = vmatpush1.bf16.msra.mxu0 %v11926_v23  ;;  %7698 = vmatprep.mubr.bf16.mxu0 %v12234_v2  ;;  %v11935_v2 = vld [vmem:[%s15071_s9 + $0x1f0] ss:$8 sps:$4 sm:$0xff]  }
0x2183   : > { %7668 = vmatprep.subr.bf16.mxu0 %v11931_v59 }
0x2186   : > { %7669 = vmatpush1.bf16.msra.mxu0 %v11929_v5 }
0x2187   : > { %7670 = vmatprep.subr.bf16.mxu0 %v11934_v29 }
0x218a   : > { %7671 = vmatpush1.bf16.msra.mxu0 %v11932_v11 }
0x218b   : > { %7672 = vmatprep.subr.bf16.mxu0 %v11937_v12 }
0x218e   : > { %7673 = vmatpush1.bf16.msra.mxu0 %v11935_v2 }
0x218f   : > { %8225 = vmatprep.subr.bf16.mxu0 %v11943_v18  ;;  %v12009_v18 = vld [vmem:[%s15075_s13 + $0x36c] ss:$16 sps:$4 sm:$0xff]  }
0x2254   : > { %v7607_v62 = vpop.f32.mrb[108].mxu0 }
0x2255   : > { %v7613_v0 = vpack.c.bf16 %v7607_v62, %v7607_v62  ;;  %v11198_v13 = vpop.f32.mrb[109].mxu0 }
0x2256   : > { %v7610_v58 = vpop.f32.mrb[110].mxu0  ;;  %v11995_v13 = vld [vmem:[%s15075_s13 + $0x328] ss:$16 sps:$4 sm:$0xff]  }
0x2257   : > { %v11199_v14 = vpop.f32.mrb[111].mxu0  ;;  %10274 = vmatmul.mubr.msk.bf16.vlgmr.msra.gmra.mrb[112].mxu0 %vm1279_vm1, %v7613_v0  ;;  %v11992_v0 = vld [vmem:[%s15075_s13 + $0x320] ss:$16 sps:$4 sm:$0xff]   ;;  %v12000_v58 = vld [vmem:[%s15075_s13 + $0x344] ss:$16 sps:$4 sm:$0xff]  }
0x2258   : > { %8226 = vmatpush1.bf16.msra.mxu0 %v11941_v17  ;;  %v12003_v14 = vld [vmem:[%s15075_s13 + $0x34c] ss:$16 sps:$4 sm:$0xff]   ;;  %v12006_v17 = vld [vmem:[%s15075_s13 + $0x364] ss:$16 sps:$4 sm:$0xff]  }
0x2259   : > { %8227 = vmatprep.subr.bf16.mxu0 %v11949_v24  ;;  %v12007_v24 = vld [vmem:[%s15075_s13 + $0x368] ss:$16 sps:$4 sm:$0xff]  }
0x225c   : > { %8228 = vmatpush1.bf16.msra.mxu0 %v11947_v28  ;;  %v12010_v28 = vld [vmem:[%s15075_s13 + $0x380] ss:$16 sps:$4 sm:$0xff]  }
0x225d   : > { %8229 = vmatprep.subr.bf16.mxu0 %v11955_v33  ;;  %v12015_v33 = vld [vmem:[%s15075_s13 + $0x38c] ss:$16 sps:$4 sm:$0xff]  }
0x2260   : > { %8230 = vmatpush1.bf16.msra.mxu0 %v11953_v34  ;;  %v12021_v34 = vld [vmem:[%s15075_s13 + $0x3ac] ss:$16 sps:$4 sm:$0xff]  }
0x2261   : > { %8231 = vmatprep.subr.bf16.mxu0 %v11961_v35  ;;  %v12019_v35 = vld [vmem:[%s15075_s13 + $0x3a8] ss:$16 sps:$4 sm:$0xff]  }
0x2264   : > { %8232 = vmatpush1.bf16.msra.mxu0 %v11959_v36  ;;  %v12027_v36 = vld [vmem:[%s15075_s13 + $0x3cc] ss:$16 sps:$4 sm:$0xff]  }
0x2265   : > { %8233 = vmatprep.subr.bf16.mxu0 %v11967_v38  ;;  %v12025_v38 = vld [vmem:[%s15075_s13 + $0x3c8] ss:$16 sps:$4 sm:$0xff]  }
0x2268   : > { %8234 = vmatpush1.bf16.msra.mxu0 %v11965_v39  ;;  %v12033_v39 = vld [vmem:[%s15075_s13 + $0x3ec] ss:$16 sps:$4 sm:$0xff]  }
0x2269   : > { %8235 = vmatprep.subr.bf16.mxu0 %v11973_v40  ;;  %v12031_v40 = vld [vmem:[%s15075_s13 + $0x3e8] ss:$16 sps:$4 sm:$0xff]  }
0x226c   : > { %8236 = vmatpush1.bf16.msra.mxu0 %v11971_v42  ;;  %v12039_v42 = vld [vmem:[%s15077_s15 + $0x304] ss:$8 sps:$4 sm:$0xff]  }
0x226d   : > { %8237 = vmatprep.subr.bf16.mxu0 %v11979_v43 }
0x2270   : > { %8238 = vmatpush1.bf16.msra.mxu0 %v11977_v45 }
0x2271   : > { %8239 = vmatprep.subr.bf16.mxu0 %v11985_v32 }
0x2274   : > { %8240 = vmatpush1.bf16.msra.mxu0 %v11983_v47  ;;  %v10276_v47 = vld [vmem:[%s15073_s11 + $0x2] sm:$0x3] }
0x2275   : > { %8241 = vmatprep.subr.bf16.mxu0 %v11991_v27  ;;  %v7756_v4 = vrot.slane %v10276_v47, %v12548_v56 }
0x2278   : > { %8242 = vmatpush1.bf16.msra.mxu0 %v11989_v3  ;;  %v7752_v3 = vrot.slane %v10276_v47, %v12545_v55  ;;  %v12102_v47 = vld [vmem:[%s15077_s15 + $0x2b4] ss:$8 sps:$4 sm:$0xff]  }
0x232a   : > { %v7700_v51 = vpop.f32.mrb[112].mxu0 }
0x232b   : > { %v7707_v9 = vadd.f32 %v7700_v51, %v14515_v30  ;;  %v7702_v20 = vpop.f32.mrb[113].mxu0 }
0x232c   : > { %v7708_v23 = vadd.f32 %v7702_v20, %v14518_v31  ;;  %v7704_v63 = vpop.f32.mrb[114].mxu0 }
0x232d   : > { %v7722_v59 = vadd.f32 %v7715_v1, %v7707_v9  ;;  %v7705_v5 = vpop.f32.mrb[115].mxu0  ;;  %v7769_v9 = vrot.slane %v10277_v48, %v12548_v56 }
0x232e   : > { %v7723_v29 = vadd.f32 %v7719_v7, %v7708_v23  ;;  %v7765_v7 = vrot.slane %v10277_v48, %v12545_v55  ;;  %v12105_v48 = vld [vmem:[%s15077_s15 + $0x3b4] ss:$8 sps:$4 sm:$0xff]  }
0x232f   : > { %v14682_v11 = vadd.f32 %v7722_v59, %v13844_v50  ;;  %v11994_v50 = vld [vmem:[%s15075_s13 + $0x324] ss:$16 sps:$4 sm:$0xff]  }
0x2330   : > { %v14685_v12 = vadd.f32 %v7723_v29, %v13846_v52  ;;  %v11997_v52 = vld [vmem:[%s15075_s13 + $0x32c] ss:$16 sps:$4 sm:$0xff]   ;;  %8202 = vmatprep.subr.bf16.mxu1 %v11994_v50  ;;  %v12043_v50 = vld [vmem:[%s15077_s15 + $0x310] ss:$8 sps:$4 sm:$0xff]  }
0x2331   : > { %v7734_v2 = vmul.f32 %v14682_v11, %v14682_v11  ;;  %8243 = vmatprep.subr.bf16.mxu0 %v11997_v52  ;;  %8203 = vmatpush1.bf16.msra.mxu1 %v11992_v0  ;;  %v12048_v52 = vld [vmem:[%s15077_s15 + $0x224] ss:$8 sps:$4 sm:$0xff]  }
0x2332   : > { %v7730_v62 = vadd.f32 %v14685_v12, %v14682_v11  ;;  %v7735_v30 = vmul.f32 %v14685_v12, %v14685_v12  ;;  %8244 = vmatpush1.bf16.msra.mxu0 %v11995_v13  ;;  %8204 = vmatprep.subr.bf16.mxu1 %v12000_v58  ;;  %v12051_v0 = vld [vmem:[%s15077_s15 + $0x324] ss:$8 sps:$4 sm:$0xff]   ;;  %v12046_v13 = vld [vmem:[%s15077_s15 + $0x220] ss:$8 sps:$4 sm:$0xff]  }
0x2333   : > { %8245 = vmatprep.subr.bf16.mxu0 %v12003_v14  ;;  %v12049_v58 = vld [vmem:[%s15077_s15 + $0x320] ss:$8 sps:$4 sm:$0xff]   ;;  %v12054_v14 = vld [vmem:[%s15077_s15 + $0x234] ss:$8 sps:$4 sm:$0xff]  }
0x2334   : > { %7731 = vadd.xlane.f32.xlu0 %v7730_v62  ;;  %v7736_v31 = vadd.f32 %v7735_v30, %v7734_v2  ;;  %v12037_v2 = vld [vmem:[%s15077_s15 + $0x300] ss:$8 sps:$4 sm:$0xff]   ;;  %v12042_v62 = vld [vmem:[%s15077_s15 + $0x214] ss:$8 sps:$4 sm:$0xff]  }
0x2335   : > { %8205 = vmatpush1.bf16.msra.mxu1 %v11998_v15  ;;  %v12045_v30 = vld [vmem:[%s15077_s15 + $0x314] ss:$8 sps:$4 sm:$0xff]  }
0x2336   : > { %7737 = vadd.xlane.f32.xlu1 %v7736_v31  ;;  %8246 = vmatpush1.bf16.msra.mxu0 %v12001_v16  ;;  %v12040_v31 = vld [vmem:[%s15077_s15 + $0x210] ss:$8 sps:$4 sm:$0xff]   ;;  %v12057_v15 = vld [vmem:[%s15077_s15 + $0x334] ss:$8 sps:$4 sm:$0xff]  }
0x2337   : > { %8206 = vmatprep.subr.bf16.mxu1 %v12006_v17  ;;  %8247 = vmatprep.subr.bf16.mxu0 %v12009_v18  ;;  %v12052_v16 = vld [vmem:[%s15077_s15 + $0x230] ss:$8 sps:$4 sm:$0xff]   ;;  %v12060_v18 = vld [vmem:[%s15077_s15 + $0x244] ss:$8 sps:$4 sm:$0xff]  }
0x2338   : > { %v12055_v17 = vld [vmem:[%s15077_s15 + $0x330] ss:$8 sps:$4 sm:$0xff]  }
0x2339   : > { %8207 = vmatpush1.bf16.msra.mxu1 %v12004_v22  ;;  %v12063_v22 = vld [vmem:[%s15077_s15 + $0x344] ss:$8 sps:$4 sm:$0xff]  }
0x233a   : > { %8248 = vmatpush1.bf16.msra.mxu0 %v12007_v24  ;;  %8208 = vmatprep.subr.bf16.mxu1 %v12012_v25  ;;  %v12058_v24 = vld [vmem:[%s15077_s15 + $0x240] ss:$8 sps:$4 sm:$0xff]  }
0x233b   : > { %8249 = vmatprep.subr.bf16.mxu0 %v12015_v33  ;;  %v12061_v25 = vld [vmem:[%s15077_s15 + $0x340] ss:$8 sps:$4 sm:$0xff]   ;;  %v12064_v33 = vld [vmem:[%s15077_s15 + $0x250] ss:$8 sps:$4 sm:$0xff]  }
0x233d   : > { %8209 = vmatpush1.bf16.msra.mxu1 %v12010_v28  ;;  %v12066_v28 = vld [vmem:[%s15077_s15 + $0x254] ss:$8 sps:$4 sm:$0xff]  }
0x233e   : > { %8250 = vmatpush1.bf16.msra.mxu0 %v12013_v8  ;;  %8210 = vmatprep.subr.bf16.mxu1 %v12018_v57  ;;  %v12069_v8 = vld [vmem:[%s15077_s15 + $0x354] ss:$8 sps:$4 sm:$0xff]   ;;  %v12067_v57 = vld [vmem:[%s15077_s15 + $0x350] ss:$8 sps:$4 sm:$0xff]  }
0x233f   : > { %8251 = vmatprep.subr.bf16.mxu0 %v12021_v34  ;;  %v12072_v34 = vld [vmem:[%s15077_s15 + $0x264] ss:$8 sps:$4 sm:$0xff]  }
0x2341   : > { %8211 = vmatpush1.bf16.msra.mxu1 %v12016_v60  ;;  %v12075_v60 = vld [vmem:[%s15077_s15 + $0x364] ss:$8 sps:$4 sm:$0xff]  }
0x2342   : > { %8252 = vmatpush1.bf16.msra.mxu0 %v12019_v35  ;;  %8212 = vmatprep.subr.bf16.mxu1 %v12024_v53  ;;  %v12070_v35 = vld [vmem:[%s15077_s15 + $0x260] ss:$8 sps:$4 sm:$0xff]  }
0x2343   : > { %8253 = vmatprep.subr.bf16.mxu0 %v12027_v36  ;;  %v12073_v53 = vld [vmem:[%s15077_s15 + $0x360] ss:$8 sps:$4 sm:$0xff]   ;;  %v12078_v36 = vld [vmem:[%s15077_s15 + $0x274] ss:$8 sps:$4 sm:$0xff]  }
0x2345   : > { %8213 = vmatpush1.bf16.msra.mxu1 %v12022_v37  ;;  %v12081_v37 = vld [vmem:[%s15077_s15 + $0x374] ss:$8 sps:$4 sm:$0xff]  }
0x2346   : > { %8254 = vmatpush1.bf16.msra.mxu0 %v12025_v38  ;;  %8214 = vmatprep.subr.bf16.mxu1 %v12030_v6  ;;  %v12076_v38 = vld [vmem:[%s15077_s15 + $0x270] ss:$8 sps:$4 sm:$0xff]  }
0x2347   : > { %8255 = vmatprep.subr.bf16.mxu0 %v12033_v39  ;;  %v12079_v6 = vld [vmem:[%s15077_s15 + $0x370] ss:$8 sps:$4 sm:$0xff]   ;;  %v12084_v39 = vld [vmem:[%s15077_s15 + $0x284] ss:$8 sps:$4 sm:$0xff]  }
0x2349   : > { %8215 = vmatpush1.bf16.msra.mxu1 %v12028_v19  ;;  %v12087_v19 = vld [vmem:[%s15077_s15 + $0x384] ss:$8 sps:$4 sm:$0xff]  }
0x234a   : > { %8256 = vmatpush1.bf16.msra.mxu0 %v12031_v40  ;;  %8672 = vmatprep.subr.bf16.mxu1 %v12036_v41  ;;  %v12082_v40 = vld [vmem:[%s15077_s15 + $0x280] ss:$8 sps:$4 sm:$0xff]  }
0x234b   : > { %8713 = vmatprep.subr.bf16.mxu0 %v12039_v42  ;;  %v12085_v41 = vld [vmem:[%s15077_s15 + $0x380] ss:$8 sps:$4 sm:$0xff]   ;;  %v12090_v42 = vld [vmem:[%s15077_s15 + $0x294] ss:$8 sps:$4 sm:$0xff]  }
0x23c1   : > { %v7732_v26 = vpop.xlane.xlu0 %7731 }
0x23c2   : > { %v7733_v43 = vmul.f32 0.00390625, %v7732_v26  ;;  %v12093_v26 = vld [vmem:[%s15077_s15 + $0x394] ss:$8 sps:$4 sm:$0xff]  }
0x23c3   : > { %v7738_v44 = vpop.xlane.xlu1 %7737 }
0x23c4   : > { %v7739_v45 = vmul.f32 0.00390625, %v7738_v44  ;;  %v7740_v21 = vmul.f32 %v7733_v43, %v7733_v43  ;;  %v7742_v27 = vsub.f32 %v14682_v11, %v7733_v43  ;;  %v7743_v49 = vsub.f32 %v14685_v12, %v7733_v43  ;;  %v12034_v12 = vld [vmem:[%s15077_s15 + $0x200] ss:$8 sps:$4 sm:$0xff]   ;;  %v12088_v43 = vld [vmem:[%s15077_s15 + $0x290] ss:$8 sps:$4 sm:$0xff]  }
0x23c5   : > { %v12091_v44 = vld [vmem:[%s15077_s15 + $0x390] ss:$8 sps:$4 sm:$0xff]  }
0x23c6   : > { %v7741_v32 = vsub.f32 %v7739_v45, %v7740_v21  ;;  %v12096_v45 = vld [vmem:[%s15077_s15 + $0x2a4] ss:$8 sps:$4 sm:$0xff]  }
0x23c7   : > { %v12099_v21 = vld [vmem:[%s15077_s15 + $0x3a4] ss:$8 sps:$4 sm:$0xff]  }
0x23c8   : > { %v7744_v46 = vadd.f32 1e-05, %v7741_v32  ;;  %v12094_v32 = vld [vmem:[%s15077_s15 + $0x2a0] ss:$8 sps:$4 sm:$0xff]  }
0x23ca   : > { %12166 = vrsqrt.f32 %v7744_v46  ;;  %v12097_v46 = vld [vmem:[%s15077_s15 + $0x3a0] ss:$8 sps:$4 sm:$0xff]  }
0x23d4   : > { %v12167_v1 = vpop.eup %12166 }
0x23d5   : > { %v7747_v51 = vmul.f32 %v12167_v1, %v7743_v49  ;;  %v7746_v20 = vmul.f32 %v12167_v1, %v7742_v27  ;;  %v12100_v27 = vld [vmem:[%s15077_s15 + $0x2b0] ss:$8 sps:$4 sm:$0xff]   ;;  %v12106_v1 = vld [vmem:[%s15077_s15 + $0x2c0] ss:$8 sps:$4 sm:$0xff]  }
0x23d6   : > { %v12103_v49 = vld [vmem:[%s15077_s15 + $0x3b0] ss:$8 sps:$4 sm:$0xff]  }
0x23d7   : > { %v7760_v23 = vmul.f32 %v7756_v4, %v7747_v51  ;;  %v7759_v63 = vmul.f32 %v7752_v3, %v7746_v20  ;;  %v12108_v3 = vld [vmem:[%s15077_s15 + $0x2c4] ss:$8 sps:$4 sm:$0xff]   ;;  %v12109_v51 = vld [vmem:[%s15077_s15 + $0x3c0] ss:$8 sps:$4 sm:$0xff]   ;;  %v12112_v20 = vld [vmem:[%s15077_s15 + $0x2d0] ss:$8 sps:$4 sm:$0xff]  }
0x23d8   : > { %v12111_v4 = vld [vmem:[%s15077_s15 + $0x3c4] ss:$8 sps:$4 sm:$0xff]  }
0x23d9   : > { %v14795_v59 = vadd.f32 %v7769_v9, %v7760_v23  ;;  %v14797_v5 = vadd.f32 %v7765_v7, %v7759_v63  ;;  %v12114_v7 = vld [vmem:[%s15077_s15 + $0x2d4] ss:$8 sps:$4 sm:$0xff]   ;;  %v12115_v23 = vld [vmem:[%s15077_s15 + $0x3d0] ss:$8 sps:$4 sm:$0xff]   ;;  %v12120_v63 = vld [vmem:[%s15077_s15 + $0x2e4] ss:$8 sps:$4 sm:$0xff]  }
0x23da   : > { %v12117_v9 = vld [vmem:[%s15077_s15 + $0x3d4] ss:$8 sps:$4 sm:$0xff]  }
0x23db   : > { %v7775_v29 = vpack.c.bf16 %v14795_v59, %v14795_v59  ;;  %v7774_v11 = vpack.c.bf16 %v14797_v5, %v14797_v5 }
0x23dd   : > { %8216 = vmatprep.mubr.bf16.mxu1 %v7775_v29  ;;  %8257 = vmatprep.mubr.bf16.mxu0 %v7775_v29  ;;  %v12123_v29 = vld [vmem:[%s15077_s15 + $0x3e4] ss:$8 sps:$4 sm:$0xff]  }
0x23de   : > { %8217 = vmatmul.mubr.bf16.vlgmr.msra.gmra.mrb[96].mxu1 %v7774_v11  ;;  %8258 = vmatmul.mubr.bf16.vlgmr.msra.gmra.mrb[116].mxu0 %v7774_v11  ;;  %v12118_v11 = vld [vmem:[%s15077_s15 + $0x2e0] ss:$8 sps:$4 sm:$0xff]  }
0x23df   : > { %8673 = vmatpush1.bf16.msra.mxu1 %v12034_v12  ;;  %8714 = vmatpush1.bf16.msra.mxu0 %v12037_v2  ;;  %v12121_v12 = vld [vmem:[%s15077_s15 + $0x3e0] ss:$8 sps:$4 sm:$0xff]   ;;  %v12126_v2 = vld [vmem:[%s15077_s15 + $0x2f4] ss:$8 sps:$4 sm:$0xff]  }
0x23e0   : > { %8674 = vmatprep.subr.bf16.mxu1 %v12042_v62  ;;  %8715 = vmatprep.subr.bf16.mxu0 %v12045_v30  ;;  %v12129_v62 = vld [vmem:[%s15077_s15 + $0x3f4] ss:$8 sps:$4 sm:$0xff]   ;;  %v12124_v30 = vld [vmem:[%s15077_s15 + $0x2f0] ss:$8 sps:$4 sm:$0xff]  }
0x23e3   : > { %8675 = vmatpush1.bf16.msra.mxu1 %v12040_v31  ;;  %8716 = vmatpush1.bf16.msra.mxu0 %v12043_v50  ;;  %v12127_v31 = vld [vmem:[%s15077_s15 + $0x3f0] ss:$8 sps:$4 sm:$0xff]   ;;  %v10342_v50 = vld [vmem:[%s15076_s14 + $0x4] sm:$0xf] }
0x23e4   : > { %8676 = vmatprep.subr.bf16.mxu1 %v12048_v52  ;;  %8717 = vmatprep.subr.bf16.mxu0 %v12051_v0  ;;  %v7847_v52 = vrot.slane %v10342_v50, %v12545_v55  ;;  %v7855_v0 = vrot.slane %v10342_v50, %v3825_v61 }
0x23e7   : > { %8677 = vmatpush1.bf16.msra.mxu1 %v12046_v13  ;;  %8718 = vmatpush1.bf16.msra.mxu0 %v12049_v58  ;;  %v7851_v13 = vrot.slane %v10342_v50, %v12548_v56  ;;  %v7859_v58 = vrot.slane %v10342_v50, %v3829_v10 }
0x23e8   : > { %8678 = vmatprep.subr.bf16.mxu1 %v12054_v14  ;;  %8719 = vmatprep.subr.bf16.mxu0 %v12057_v15 }
0x23eb   : > { %8679 = vmatpush1.bf16.msra.mxu1 %v12052_v16  ;;  %8720 = vmatpush1.bf16.msra.mxu0 %v12055_v17 }
0x23ec   : > { %8680 = vmatprep.subr.bf16.mxu1 %v12060_v18  ;;  %8721 = vmatprep.subr.bf16.mxu0 %v12063_v22 }
0x23ef   : > { %8681 = vmatpush1.bf16.msra.mxu1 %v12058_v24  ;;  %8722 = vmatpush1.bf16.msra.mxu0 %v12061_v25 }
0x23f0   : > { %8682 = vmatprep.subr.bf16.mxu1 %v12066_v28  ;;  %8723 = vmatprep.subr.bf16.mxu0 %v12069_v8 }
0x23f3   : > { %8683 = vmatpush1.bf16.msra.mxu1 %v12064_v33  ;;  %8724 = vmatpush1.bf16.msra.mxu0 %v12067_v57 }
0x23f4   : > { %8684 = vmatprep.subr.bf16.mxu1 %v12072_v34  ;;  %8725 = vmatprep.subr.bf16.mxu0 %v12075_v60 }
0x23f7   : > { %8685 = vmatpush1.bf16.msra.mxu1 %v12070_v35  ;;  %8726 = vmatpush1.bf16.msra.mxu0 %v12073_v53 }
0x23f8   : > { %8686 = vmatprep.subr.bf16.mxu1 %v12078_v36  ;;  %8727 = vmatprep.subr.bf16.mxu0 %v12081_v37  ;;  %v10471_v37 = vld [vmem:[%s15078_s16 + $0x2] sm:$0x3] }
0x23fb   : > { %8687 = vmatpush1.bf16.msra.mxu1 %v12076_v38  ;;  %8728 = vmatpush1.bf16.msra.mxu0 %v12079_v6  ;;  %v8345_v38 = vrot.slane %v10471_v37, %v12545_v55  ;;  %v8349_v6 = vrot.slane %v10471_v37, %v12548_v56 }
0x23fc   : > { %8688 = vmatprep.subr.bf16.mxu1 %v12084_v39  ;;  %8729 = vmatprep.subr.bf16.mxu0 %v12087_v19 }
0x23ff   : > { %8689 = vmatpush1.bf16.msra.mxu1 %v12082_v40  ;;  %8730 = vmatpush1.bf16.msra.mxu0 %v12085_v41 }
0x2400   : > { %8690 = vmatprep.subr.bf16.mxu1 %v12090_v42  ;;  %8731 = vmatprep.subr.bf16.mxu0 %v12093_v26 }
0x2403   : > { %8691 = vmatpush1.bf16.msra.mxu1 %v12088_v43  ;;  %8732 = vmatpush1.bf16.msra.mxu0 %v12091_v44 }
0x2404   : > { %8692 = vmatprep.subr.bf16.mxu1 %v12096_v45  ;;  %8733 = vmatprep.subr.bf16.mxu0 %v12099_v21 }
0x2407   : > { %8693 = vmatpush1.bf16.msra.mxu1 %v12094_v32  ;;  %8734 = vmatpush1.bf16.msra.mxu0 %v12097_v46 }
0x2408   : > { %8694 = vmatprep.subr.bf16.mxu1 %v12102_v47  ;;  %8735 = vmatprep.subr.bf16.mxu0 %v12105_v48 }
0x240b   : > { %8695 = vmatpush1.bf16.msra.mxu1 %v12100_v27  ;;  %8736 = vmatpush1.bf16.msra.mxu0 %v12103_v49 }
0x240c   : > { %8696 = vmatprep.subr.bf16.mxu1 %v12108_v3  ;;  %8737 = vmatprep.subr.bf16.mxu0 %v12111_v4 }
0x240f   : > { %8697 = vmatpush1.bf16.msra.mxu1 %v12106_v1  ;;  %8738 = vmatpush1.bf16.msra.mxu0 %v12109_v51 }
0x2410   : > { %8698 = vmatprep.subr.bf16.mxu1 %v12114_v7  ;;  %8739 = vmatprep.subr.bf16.mxu0 %v12117_v9 }
0x2413   : > { %8699 = vmatpush1.bf16.msra.mxu1 %v12112_v20  ;;  %8740 = vmatpush1.bf16.msra.mxu0 %v12115_v23 }
0x2414   : > { %8700 = vmatprep.subr.bf16.mxu1 %v12120_v63  ;;  %8741 = vmatprep.subr.bf16.mxu0 %v12123_v29 }
0x2417   : > { %8701 = vmatpush1.bf16.msra.mxu1 %v12118_v11  ;;  %8742 = vmatpush1.bf16.msra.mxu0 %v12121_v12 }
0x2418   : > { %8702 = vmatprep.subr.bf16.mxu1 %v12126_v2  ;;  %8743 = vmatprep.subr.bf16.mxu0 %v12129_v62 }
0x241b   : > { %8703 = vmatpush1.bf16.msra.mxu1 %v12124_v30  ;;  %8744 = vmatpush1.bf16.msra.mxu0 %v12127_v31 }
0x24b1   : > { %v8218_v14 = vpop.f32.mrb[96].mxu1  ;;  %v8259_v15 = vpop.f32.mrb[116].mxu0 }
0x24b2   : > { %v8219_v16 = vadd.f32 %v8218_v14, %v7847_v52  ;;  %v8260_v17 = vadd.f32 %v8259_v15, %v7855_v0  ;;  %v8220_v18 = vpop.f32.mrb[97].mxu1  ;;  %v8261_v22 = vpop.f32.mrb[117].mxu0 }
0x24b3   : > { %v8221_v24 = vadd.f32 %v8220_v18, %v7851_v13  ;;  %v8262_v25 = vadd.f32 %v8261_v22, %v7859_v58  ;;  %v8222_v28 = vpop.f32.mrb[98].mxu1  ;;  %v8263_v8 = vpop.f32.mrb[118].mxu0 }
0x24b4   : > { %v8266_v33 = vmax.f32 %v8219_v16, 0.0  ;;  %v8268_v57 = vmax.f32 %v8260_v17, 0.0  ;;  %v8223_v34 = vpop.f32.mrb[99].mxu1  ;;  %v8264_v60 = vpop.f32.mrb[119].mxu0 }
0x24b5   : > { %v8267_v61 = vmax.f32 %v8221_v24, 0.0  ;;  %v8269_v35 = vmax.f32 %v8262_v25, 0.0 }
0x24b6   : > { %v8270_v54 = vpack.c.bf16 %v8266_v33, %v8266_v33  ;;  %v8272_v10 = vpack.c.bf16 %v8268_v57, %v8268_v57 }
0x24b7   : > { %v8271_v53 = vpack.c.bf16 %v8267_v61, %v8267_v61  ;;  %v8273_v36 = vpack.c.bf16 %v8269_v35, %v8269_v35 }
0x24b9   : > { %8704 = vmatprep.mubr.bf16.mxu1 %v8271_v53  ;;  %8745 = vmatprep.mubr.bf16.mxu0 %v8273_v36 }
0x24ba   : > { %8705 = vmatmul.mubr.bf16.vlgmr.msra.gmra.mrb[100].mxu1 %v8270_v54  ;;  %8746 = vmatmul.mubr.bf16.vlgmr.msra.gmra.mrb[120].mxu0 %v8272_v10 }
0x258d   : > { %v8706_v39 = vpop.f32.mrb[100].mxu1  ;;  %v8747_v19 = vpop.f32.mrb[120].mxu0 }
0x258e   : > { %v8707_v40 = vadd.f32 %v8706_v39, %v8345_v38  ;;  %v8708_v41 = vpop.f32.mrb[101].mxu1  ;;  %v8749_v42 = vpop.f32.mrb[121].mxu0 }
0x258f   : > { %v8709_v26 = vadd.f32 %v8708_v41, %v8349_v6  ;;  %v8710_v43 = vpop.f32.mrb[102].mxu1  ;;  %v8751_v44 = vpop.f32.mrb[122].mxu0 }
0x2590   : > { %v8748_v45 = vadd.f32 %v8747_v19, %v8707_v40  ;;  %v8711_v21 = vpop.f32.mrb[103].mxu1  ;;  %v8752_v32 = vpop.f32.mrb[123].mxu0 }
0x2591   : > { %v8750_v46 = vadd.f32 %v8749_v42, %v8709_v26 }
0x2592   : > { %v8754_v47 = vadd.f32 %v8748_v45, %v14797_v5  ;;  %v10537_v5 = vld [vmem:[%s15080_s18 + $0x2] sm:$0x3] }
0x2593   : > { %v8755_v48 = vadd.f32 %v8750_v46, %v14795_v59  ;;  %v10536_v59 = vld [vmem:[%s15079_s17 + $0x2] sm:$0x3]  ;;  %v8795_v50 = vrot.slane %v10537_v5, %v12545_v55  ;;  %v8799_v52 = vrot.slane %v10537_v5, %v12548_v56 }
0x2594   : > { %v8764_v27 = vmul.f32 %v8754_v47, %v8754_v47  ;;  %v8782_v12 = vrot.slane %v10536_v59, %v12545_v55  ;;  %v8786_v2 = vrot.slane %v10536_v59, %v12548_v56 }
0x2595   : > { %v8760_v49 = vadd.f32 %v8755_v48, %v8754_v47  ;;  %v8765_v3 = vmul.f32 %v8755_v48, %v8755_v48 }
0x2597   : > { %8761 = vadd.xlane.f32.xlu0 %v8760_v49  ;;  %v8766_v4 = vadd.f32 %v8765_v3, %v8764_v27 }
0x2599   : > { %8767 = vadd.xlane.f32.xlu1 %v8766_v4 }
0x2624   : > { %v8762_v1 = vpop.xlane.xlu0 %8761 }
0x2625   : > { %v8763_v51 = vmul.f32 0.00390625, %v8762_v1 }
0x2626   : > { %v8768_v7 = vpop.xlane.xlu1 %8767 }
0x2627   : > { %v8769_v9 = vmul.f32 0.00390625, %v8768_v7  ;;  %v8770_v20 = vmul.f32 %v8763_v51, %v8763_v51  ;;  %v8772_v29 = vsub.f32 %v8754_v47, %v8763_v51  ;;  %v8773_v11 = vsub.f32 %v8755_v48, %v8763_v51 }
0x2629   : > { %v8771_v23 = vsub.f32 %v8769_v9, %v8770_v20 }
0x262b   : > { %v8774_v63 = vadd.f32 1e-05, %v8771_v23 }
0x262d   : > { %12168 = vrsqrt.f32 %v8774_v63 }
0x2637   : > { %v12169_v62 = vpop.eup %12168 }
0x2638   : > { %v8776_v30 = vmul.f32 %v12169_v62, %v8772_v29  ;;  %v8777_v31 = vmul.f32 %v12169_v62, %v8773_v11 }
0x263a   : > { %v8789_v0 = vmul.f32 %v8782_v12, %v8776_v30  ;;  %v8790_v13 = vmul.f32 %v8786_v2, %v8777_v31 }
0x263c   : > { %v8802_v58 = vadd.f32 %v8795_v50, %v8789_v0  ;;  %v8803_v14 = vadd.f32 %v8799_v52, %v8790_v13 }
0x263e   : > { %8804 = vst [vmem:[%s593_s2] sm:$0xff] %v8802_v58  ;;  %8805 = vst [vmem:[%s593_s2 + $0x8] sm:$0xff] %v8803_v14 }
0x263f   : > { %12183 = shalt.err (!%p12180_p3)
}
0x2640   : > { %s12184_s22 = scalar_lea.hbm %s15020_s25, 256  ;;  %s12188_s21 = scalar_lea.hbm %s15117_s1, 512 }
0x2641   : > { %p12185_p4 = scmp.ne.s32.totalorder %s15020_s25, %s12184_s22  ;;  %p12189_p9 = scmp.lt.u32.totalorder %s15020_s25, %s15117_s1 }
0x2642   : > { %p12190_p10 = scmp.lt.u32.totalorder %s12188_s21, %s12184_s22  ;;  %p12192_p12 = scmp.lt.u32.totalorder %s12184_s22, %s15020_s25 }
0x2643   : > { %p12186_p7 = pnand %p12185_p4, %p12376_p5 }
0x2644   : > { %p12191_p11 = por %p12190_p10, %p12189_p9 }
0x2645   : > { %p12187_p8 = pneg %p12186_p7 }
0x2646   : > { %p12193_p13 = por %p12192_p12, %p12191_p11 }
0x2648   : > { %p12194_p0 = pnand %p12193_p13, %p12187_p8 }
0x264a   : > { %12197 = shalt.err (!%p12194_p0)
}
0x264b   : > { %11200 = dma.vmem_to_hbm [thread:$0]  (%p12376_p5), %s15022_s19, 256, %s15020_s25, %s8807_s0  }
0x264c PF: > { %s15118_s4 = sld [smem:[#allocation7_spill]]  ;;  %s15119_s24 = sld [smem:[#allocation5_spill]] }
0x2652   : > { %p11206_p1 = scmp.ge.s32.totalorder %s15118_s4, 2  ;;  %s8833_s20 = sand.u32 1, %s15119_s24  }
0x2653   : > { %s8834_s2 = scalar_lea.sflag [#allocation3], %s8833_s20 }
0x2654   : > { %p11203_p2 = pnand %p11206_p1, %p12380_p6 }
0x2656   : > { %12215 = dma.done.wait (!%p11203_p2), %s8834_s2, 256  }
0x2657   : > { %12217 = vsyncadd (!%p11203_p2), %s8834_s2, 4294967040  ;;  %s15121_s21 = sld [smem:[#allocation9_spill]]  ;;  %s15122_s22 = sld [smem:[#allocation6_spill]] }
0x2658   : > { %s15123_s20 = sld [smem:[#allocation10_spill]]  ;;  %s15124_s0 = smov %s12224_s30 }
0x265d   : > { %p29_p3 = scmp.ge.s32.totalorder %s15121_s21, 4   ;;  %s15125_s30 = smov %s15122_s22 }
0x265f   :  { %31 = sbr.rel (!%p29_p3) target bundleno = 10 (0xa), region = 189 }
0x2666   :  { %8839 = vsyncpa [#allocation3], 1 }
0x2667   :  { %8841 = vsyncpa [#allocation3 + $0x1], 1 }

</bundles_post_ra>
